<compile_context>
chip_gen: v6e
topology: v6e:2x2x1
jax: 0.10.0
libtpu: 0.0.40
codegen_flags: <defaults>
</compile_context>

<pallas_src>
import math

import jax
import jax.numpy as jnp
from jax.experimental import pallas as pl
from jax.experimental.pallas import tpu as pltpu

N_FEATURES = 784
H0, H1, H2 = 1024, 512, 256
N_OUT = 1


def _round_up(x, m):
    return ((x + m - 1) // m) * m


def _epilogue_dtype():
    """bf16 epilogues on chips with a bf16 VPU (v6e / v7x); f32 otherwise."""
    try:
        kind = jax.devices()[0].device_kind.lower()
    except Exception:
        return jnp.float32
    if ("v6" in kind) or ("v7" in kind) or ("7x" in kind):
        return jnp.bfloat16
    return jnp.float32


def _pick_tile_b(B, max_tile_b=1024):
    """Batch tile: multiple of 8, never larger than the batch, capped at
    max_tile_b; for batches > 256 the tile is ~B/2 (rounded to 128) so the
    grid has >= 2 steps and both v7x TensorCores get work."""
    if B <= 8:
        return B                       # one exact block (block dims == array dims)
    if B <= 256:
        return (B // 8) * 8            # one block (+ small ragged tail)
    half = (B + 1) // 2
    tile = _round_up(half, 128)
    return min(max_tile_b, tile, (B // 8) * 8)


def _make_kernel(epilogue_dtype):
    def kernel(x_ref,
               w0_ref, b0_ref,
               w1_ref, b1_ref,
               w2_ref, b2_ref,
               w3_ref, b3_ref,
               o_ref):
        def hidden(h_bf16, w_ref, b_ref, dtype):
            # MXU matmul with f32 accumulation, then bias + LeakyReLU(0.2)
            # epilogue in `dtype` (bf16 on v6e/v7x, f32 on v5e).
            acc = jnp.dot(h_bf16, w_ref[...], preferred_element_type=jnp.float32)
            h = acc.astype(dtype) + b_ref[...].astype(dtype)
            return jnp.maximum(h, 0.2 * h)          # LeakyReLU(0.2)

        # x tile arrives as raw f32 (tile_b, 784); cast to bf16 for the MXU.
        x = x_ref[...].astype(jnp.bfloat16)

        # TODO(synk): Dropout(0.3) is identity in eval mode; training-mode
        # dropout would need pltpu.prng_seed / prng_random_bits masking.
        h = hidden(x, w0_ref, b0_ref, epilogue_dtype)                        # 784 -> 1024
        h = hidden(h.astype(jnp.bfloat16), w1_ref, b1_ref, epilogue_dtype)   # 1024 -> 512
        h = hidden(h.astype(jnp.bfloat16), w2_ref, b2_ref, jnp.float32)      # 512 -> 256

        # out: Linear(256 -> 1) + Sigmoid as a VPU multiply + lane reduction
        # (an N=1 MXU matmul would waste 255/256 of the array).
        z = jnp.sum(h * w3_ref[...], axis=-1, keepdims=True) + b3_ref[...]
        sig = pl.reciprocal(1.0 + jnp.exp(-z), approx=True)
        o_ref[...] = sig.astype(o_ref.dtype)

    return kernel


def discriminator_forward(x, params, *, tile_b=None, epilogue_dtype=None):
    """x: (B, 784) float32 -> (B, 1) float32."""
    (w0, b0), (w1, b1), (w2, b2), (w3_row, b3) = params
    B, F = x.shape
    assert F == N_FEATURES, f"expected {N_FEATURES} input features, got {F}"
    x = x.astype(jnp.float32)

    if tile_b is None:
        tile_b = _pick_tile_b(B)
    if epilogue_dtype is None:
        epilogue_dtype = _epilogue_dtype()

    def resident(arr):
        # Whole-array block with a constant index map: stays VMEM-resident and
        # is only DMA'd once across the grid.
        return pl.BlockSpec(arr.shape, lambda i, _n=arr.ndim: (0,) * _n)

    grid = (pl.cdiv(B, tile_b),)
    return pl.pallas_call(
        _make_kernel(epilogue_dtype),
        out_shape=jax.ShapeDtypeStruct((B, N_OUT), jnp.float32),
        grid_spec=pltpu.PrefetchScalarGridSpec(
            num_scalar_prefetch=0,
            grid=grid,
            in_specs=[
                pl.BlockSpec((tile_b, F), lambda i: (i, 0)),
                resident(w0), resident(b0),
                resident(w1), resident(b1),
                resident(w2), resident(b2),
                resident(w3_row), resident(b3),
            ],
            out_specs=pl.BlockSpec((tile_b, N_OUT), lambda i: (i, 0)),
        ),
        compiler_params=pltpu.CompilerParams(
            dimension_semantics=("parallel",),          # megacore-shardable on v7x
            vmem_limit_bytes=48 * 1024 * 1024,          # safe on v5e/v6e/v7x
        ),
    )(x, w0, b0, w1, b1, w2, b2, w3_row, b3)


def init_params(key):
    """PyTorch-style Linear init: U(-1/sqrt(fan_in), 1/sqrt(fan_in)).

    W0..W2 are stored (in, out) in bf16; biases stay f32 (cast to the epilogue
    dtype in-kernel).  The output layer is a (1, 256) f32 row for the
    in-kernel lane reduction.
    """
    dims = [(N_FEATURES, H0), (H0, H1), (H1, H2), (H2, N_OUT)]
    raw = []
    for fan_in, fan_out in dims:
        key, kw, kb = jax.random.split(key, 3)
        bound = 1.0 / math.sqrt(fan_in)
        w = jax.random.uniform(kw, (fan_in, fan_out), jnp.float32, -bound, bound)
        b = jax.random.uniform(kb, (1, fan_out), jnp.float32, -bound, bound)
        raw.append((w, b))
    (w0, b0), (w1, b1), (w2, b2), (w3, b3) = raw
    return ((w0.astype(jnp.bfloat16), b0),
            (w1.astype(jnp.bfloat16), b1),
            (w2.astype(jnp.bfloat16), b2),
            (jnp.transpose(w3).astype(jnp.float32), b3))   # (1, 256) row


def reference_forward(x, params, epilogue_dtype=jnp.float32):
    """Pure-JAX reference mirroring the kernel's quantization exactly."""
    (w0, b0), (w1, b1), (w2, b2), (w3_row, b3) = params
    h = x.astype(jnp.bfloat16)
    for w, b in ((w0, b0), (w1, b1)):
        acc = h.astype(jnp.float32) @ w.astype(jnp.float32)
        t = acc.astype(epilogue_dtype) + b.astype(epilogue_dtype)
        t = jnp.maximum(t, 0.2 * t)
        h = t.astype(jnp.bfloat16)
    acc = h.astype(jnp.float32) @ w2.astype(jnp.float32)
    t = acc + b2
    t = jnp.maximum(t, 0.2 * t)
    z = jnp.sum(t * w3_row, axis=-1, keepdims=True) + b3
    return jax.nn.sigmoid(z)


if __name__ == "__main__":
    key = jax.random.PRNGKey(0)
    key, kx = jax.random.split(key)

    batch = 20  # small test batch; auto tile (16) exercises a 2-step grid
    x = jax.random.normal(kx, (batch, N_FEATURES), jnp.float32)
    params = init_params(key)

    edt = _epilogue_dtype()
    ref = reference_forward(x, params, epilogue_dtype=edt)

    # Default (auto) tiling path.
    out = jax.block_until_ready(discriminator_forward(x, params))
    assert out.shape == (batch, N_OUT)
    assert bool(jnp.all(jnp.isfinite(out)))
    assert jnp.allclose(out, ref, atol=5e-3, rtol=5e-3), (
        f"max abs err {float(jnp.max(jnp.abs(out - ref)))}"
    )

    # Multi-step grid with a ragged last block (explicit small tile).
    out2 = jax.block_until_ready(discriminator_forward(x, params, tile_b=8))
    assert jnp.allclose(out2, ref, atol=5e-3, rtol=5e-3), (
        f"max abs err (tile_b=8) {float(jnp.max(jnp.abs(out2 - ref)))}"
    )

    print("KERNEL_OK")
</pallas_src>

<mosaic_0001>
module attributes {stable_mosaic.version = 11 : i64} {
  func.func @kernel(%arg0: i32, %arg1: memref<16x784xf32, #tpu.memory_space<vmem>>, %arg2: memref<784x1024xbf16, #tpu.memory_space<vmem>>, %arg3: memref<1x1024xf32, #tpu.memory_space<vmem>>, %arg4: memref<1024x512xbf16, #tpu.memory_space<vmem>>, %arg5: memref<1x512xf32, #tpu.memory_space<vmem>>, %arg6: memref<512x256xbf16, #tpu.memory_space<vmem>>, %arg7: memref<1x256xf32, #tpu.memory_space<vmem>>, %arg8: memref<1x256xf32, #tpu.memory_space<vmem>>, %arg9: memref<1x1xf32, #tpu.memory_space<vmem>>, %arg10: memref<16x1xf32, #tpu.memory_space<vmem>>) attributes {dimension_semantics = [#tpu.dimension_semantics<parallel>], iteration_bounds = array<i64: 2>, scalar_prefetch = 0 : i64, scratch_operands = 0 : i64, tpu.core_type = #tpu.core_type<tc>, window_params = [{transform_indices = @transform_0, window_bounds = array<i64: 16, 784>}, {pipeline_mode = #tpu.pipeline_mode<synchronous>, transform_indices = @transform_1, window_bounds = array<i64: 784, 1024>}, {pipeline_mode = #tpu.pipeline_mode<synchronous>, transform_indices = @transform_2, window_bounds = array<i64: 1, 1024>}, {pipeline_mode = #tpu.pipeline_mode<synchronous>, transform_indices = @transform_3, window_bounds = array<i64: 1024, 512>}, {pipeline_mode = #tpu.pipeline_mode<synchronous>, transform_indices = @transform_4, window_bounds = array<i64: 1, 512>}, {pipeline_mode = #tpu.pipeline_mode<synchronous>, transform_indices = @transform_5, window_bounds = array<i64: 512, 256>}, {pipeline_mode = #tpu.pipeline_mode<synchronous>, transform_indices = @transform_6, window_bounds = array<i64: 1, 256>}, {pipeline_mode = #tpu.pipeline_mode<synchronous>, transform_indices = @transform_7, window_bounds = array<i64: 1, 256>}, {pipeline_mode = #tpu.pipeline_mode<synchronous>, transform_indices = @transform_8, window_bounds = array<i64: 1, 1>}, {transform_indices = @transform_9, window_bounds = array<i64: 16, 1>}]} {
    %c0 = arith.constant 0 : index
    %c0_0 = arith.constant 0 : index
    %0 = vector.load %arg1[%c0, %c0_0] : memref<16x784xf32, #tpu.memory_space<vmem>>, vector<16x784xf32>
    %1 = arith.truncf %0 : vector<16x784xf32> to vector<16x784xbf16>
    %c0_1 = arith.constant 0 : index
    %c0_2 = arith.constant 0 : index
    %2 = vector.load %arg2[%c0_1, %c0_2] : memref<784x1024xbf16, #tpu.memory_space<vmem>>, vector<784x1024xbf16>
    %cst = arith.constant dense<0.000000e+00> : vector<16x1024xf32>
    %3 = tpu.matmul %1, %2, %cst {dimension_numbers = #tpu.dot_dimension_numbers<[1], [0], [0], [1], [0, 0, 1, 1], [], []>} : vector<16x784xbf16>, vector<784x1024xbf16>, vector<16x1024xf32> -> vector<16x1024xf32>
    %c0_3 = arith.constant 0 : index
    %c0_4 = arith.constant 0 : index
    %4 = vector.load %arg3[%c0_3, %c0_4] : memref<1x1024xf32, #tpu.memory_space<vmem>>, vector<1x1024xf32>
    %5 = vector.broadcast %4 : vector<1x1024xf32> to vector<16x1024xf32>
    %6 = arith.addf %3, %5 : vector<16x1024xf32>
    %cst_5 = arith.constant 2.000000e-01 : f32
    %7 = vector.broadcast %cst_5 : f32 to vector<16x1024xf32>
    %8 = arith.mulf %7, %6 : vector<16x1024xf32>
    %9 = arith.maximumf %6, %8 : vector<16x1024xf32>
    %10 = arith.truncf %9 : vector<16x1024xf32> to vector<16x1024xbf16>
    %c0_6 = arith.constant 0 : index
    %c0_7 = arith.constant 0 : index
    %11 = vector.load %arg4[%c0_6, %c0_7] : memref<1024x512xbf16, #tpu.memory_space<vmem>>, vector<1024x512xbf16>
    %cst_8 = arith.constant dense<0.000000e+00> : vector<16x512xf32>
    %12 = tpu.matmul %10, %11, %cst_8 {dimension_numbers = #tpu.dot_dimension_numbers<[1], [0], [0], [1], [0, 0, 1, 1], [], []>} : vector<16x1024xbf16>, vector<1024x512xbf16>, vector<16x512xf32> -> vector<16x512xf32>
    %c0_9 = arith.constant 0 : index
    %c0_10 = arith.constant 0 : index
    %13 = vector.load %arg5[%c0_9, %c0_10] : memref<1x512xf32, #tpu.memory_space<vmem>>, vector<1x512xf32>
    %14 = vector.broadcast %13 : vector<1x512xf32> to vector<16x512xf32>
    %15 = arith.addf %12, %14 : vector<16x512xf32>
    %cst_11 = arith.constant 2.000000e-01 : f32
    %16 = vector.broadcast %cst_11 : f32 to vector<16x512xf32>
    %17 = arith.mulf %16, %15 : vector<16x512xf32>
    %18 = arith.maximumf %15, %17 : vector<16x512xf32>
    %19 = arith.truncf %18 : vector<16x512xf32> to vector<16x512xbf16>
    %c0_12 = arith.constant 0 : index
    %c0_13 = arith.constant 0 : index
    %20 = vector.load %arg6[%c0_12, %c0_13] : memref<512x256xbf16, #tpu.memory_space<vmem>>, vector<512x256xbf16>
    %cst_14 = arith.constant dense<0.000000e+00> : vector<16x256xf32>
    %21 = tpu.matmul %19, %20, %cst_14 {dimension_numbers = #tpu.dot_dimension_numbers<[1], [0], [0], [1], [0, 0, 1, 1], [], []>} : vector<16x512xbf16>, vector<512x256xbf16>, vector<16x256xf32> -> vector<16x256xf32>
    %c0_15 = arith.constant 0 : index
    %c0_16 = arith.constant 0 : index
    %22 = vector.load %arg7[%c0_15, %c0_16] : memref<1x256xf32, #tpu.memory_space<vmem>>, vector<1x256xf32>
    %23 = vector.broadcast %22 : vector<1x256xf32> to vector<16x256xf32>
    %24 = arith.addf %21, %23 : vector<16x256xf32>
    %cst_17 = arith.constant 2.000000e-01 : f32
    %25 = vector.broadcast %cst_17 : f32 to vector<16x256xf32>
    %26 = arith.mulf %25, %24 : vector<16x256xf32>
    %27 = arith.maximumf %24, %26 : vector<16x256xf32>
    %c0_18 = arith.constant 0 : index
    %c0_19 = arith.constant 0 : index
    %28 = vector.load %arg8[%c0_18, %c0_19] : memref<1x256xf32, #tpu.memory_space<vmem>>, vector<1x256xf32>
    %29 = vector.broadcast %28 : vector<1x256xf32> to vector<16x256xf32>
    %30 = arith.mulf %27, %29 : vector<16x256xf32>
    %cst_20 = arith.constant dense<0.000000e+00> : vector<16xf32>
    %31 = vector.multi_reduction <add>, %30, %cst_20 [1] : vector<16x256xf32> to vector<16xf32>
    %32 = vector.shape_cast %31 : vector<16xf32> to vector<16x1xf32>
    %c0_21 = arith.constant 0 : index
    %c0_22 = arith.constant 0 : index
    %33 = vector.load %arg9[%c0_21, %c0_22] : memref<1x1xf32, #tpu.memory_space<vmem>>, vector<1x1xf32>
    %34 = vector.broadcast %33 : vector<1x1xf32> to vector<16x1xf32>
    %35 = arith.addf %32, %34 : vector<16x1xf32>
    %cst_23 = arith.constant 0.000000e+00 : f32
    %36 = vector.broadcast %cst_23 : f32 to vector<16x1xf32>
    %37 = arith.subf %36, %35 : vector<16x1xf32>
    %38 = math.exp %37 : vector<16x1xf32>
    %cst_24 = arith.constant 1.000000e+00 : f32
    %39 = vector.broadcast %cst_24 : f32 to vector<16x1xf32>
    %40 = arith.addf %39, %38 : vector<16x1xf32>
    %41 = tpu.reciprocal %40 {approx = true} : vector<16x1xf32> -> vector<16x1xf32>
    %c0_25 = arith.constant 0 : index
    %c0_26 = arith.constant 0 : index
    %42 = vector.load %arg10[%c0_25, %c0_26] : memref<16x1xf32, #tpu.memory_space<vmem>>, vector<16x1xf32>
    tpu.vector_store %arg10[%c0_25, %c0_26], %41 {strides = array<i32>} : memref<16x1xf32, #tpu.memory_space<vmem>>, vector<16x1xf32>,
    return
  }
  func.func @transform_0(%arg0: i32) -> (i32, i32) {
    %c0_i32 = arith.constant 0 : i32
    %c0_i32_0 = arith.constant 0 : i32
    return %arg0, %c0_i32 : i32, i32
  }
  func.func @transform_1(%arg0: i32) -> (i32, i32) {
    %c0_i32 = arith.constant 0 : i32
    %c0_i32_0 = arith.constant 0 : i32
    %c0_i32_1 = arith.constant 0 : i32
    return %c0_i32, %c0_i32_0 : i32, i32
  }
  func.func @transform_2(%arg0: i32) -> (i32, i32) {
    %c0_i32 = arith.constant 0 : i32
    %c0_i32_0 = arith.constant 0 : i32
    %c0_i32_1 = arith.constant 0 : i32
    return %c0_i32, %c0_i32_0 : i32, i32
  }
  func.func @transform_3(%arg0: i32) -> (i32, i32) {
    %c0_i32 = arith.constant 0 : i32
    %c0_i32_0 = arith.constant 0 : i32
    %c0_i32_1 = arith.constant 0 : i32
    return %c0_i32, %c0_i32_0 : i32, i32
  }
  func.func @transform_4(%arg0: i32) -> (i32, i32) {
    %c0_i32 = arith.constant 0 : i32
    %c0_i32_0 = arith.constant 0 : i32
    %c0_i32_1 = arith.constant 0 : i32
    return %c0_i32, %c0_i32_0 : i32, i32
  }
  func.func @transform_5(%arg0: i32) -> (i32, i32) {
    %c0_i32 = arith.constant 0 : i32
    %c0_i32_0 = arith.constant 0 : i32
    %c0_i32_1 = arith.constant 0 : i32
    return %c0_i32, %c0_i32_0 : i32, i32
  }
  func.func @transform_6(%arg0: i32) -> (i32, i32) {
    %c0_i32 = arith.constant 0 : i32
    %c0_i32_0 = arith.constant 0 : i32
    %c0_i32_1 = arith.constant 0 : i32
    return %c0_i32, %c0_i32_0 : i32, i32
  }
  func.func @transform_7(%arg0: i32) -> (i32, i32) {
    %c0_i32 = arith.constant 0 : i32
    %c0_i32_0 = arith.constant 0 : i32
    %c0_i32_1 = arith.constant 0 : i32
    return %c0_i32, %c0_i32_0 : i32, i32
  }
  func.func @transform_8(%arg0: i32) -> (i32, i32) {
    %c0_i32 = arith.constant 0 : i32
    %c0_i32_0 = arith.constant 0 : i32
    %c0_i32_1 = arith.constant 0 : i32
    return %c0_i32, %c0_i32_0 : i32, i32
  }
  func.func @transform_9(%arg0: i32) -> (i32, i32) {
    %c0_i32 = arith.constant 0 : i32
    %c0_i32_0 = arith.constant 0 : i32
    return %arg0, %c0_i32 : i32, i32
  }
}

</mosaic_0001>

<bundles_post_ra>
// kernel: tpu_custom_call.1
= control target key start
LH: loop header
LB: loop body
LE: loop exit
PB: predicated region body
PF: predicated region fallthrough
CT: control target
= control target key end

     0   :  { %s8624_s0 = inlined_call_operand.hbm [shape: f32[20,784], index: 0, kind: input, shape index: {}]   ;;  %s8625_s1 = inlined_call_operand.hbm [shape: bf16[784,1024], index: 1, kind: input, shape index: {}]   ;;  %s8626_s2 = inlined_call_operand.hbm [shape: f32[1,1024], index: 2, kind: input, shape index: {}]   ;;  %s8627_s3 = inlined_call_operand.hbm [shape: bf16[1024,512], index: 3, kind: input, shape index: {}]   ;;  %s8628_s4 = inlined_call_operand.hbm [shape: f32[1,512], index: 4, kind: input, shape index: {}]   ;;  %s8629_s5 = inlined_call_operand.hbm [shape: bf16[512,256], index: 5, kind: input, shape index: {}]   ;;  %s8630_s6 = inlined_call_operand.hbm [shape: f32[1,256], index: 6, kind: input, shape index: {}]   ;;  %s8631_s7 = inlined_call_operand.hbm [shape: f32[1,256], index: 7, kind: input, shape index: {}]   ;;  %s8632_s8 = inlined_call_operand.<no memory space> [shape: f32[1,1], index: 8, kind: input, shape index: {}]   ;;  %s8633_s9 = inlined_call_operand.vmem [shape: f32[20,1], index: 9, kind: output, shape index: {}]  }
   0x1   :  { %v14_v0 = vstv %s8632_s8 }
   0x2   :  { %15 = vst [vmem:[#allocation2] sm:$0x1] %v14_v0 }
   0x3   :  { %16 = vsyncpa [#allocation4], 0 }
   0x4   :  { %18 = vsyncpa [#allocation4 + $0x1], 0 }
   0x5   :  { %19 = vsyncpa [#allocation6], 0 }
   0x6   :  { %20 = vsyncpa [#allocation9], 0 }
   0x7   :  { %21 = vsyncpa [#allocation12], 0 }
   0x8   :  { %22 = vsyncpa [#allocation15], 0  ;;  %s8190_s11 = smov 0   ;;  %s8192_s12 = smov 0  }
   0x9   :  { %s8194_s13 = smov 0   ;;  %s8196_s14 = smov 0  }
   0xa LB: > { %s8209_s8 = sadd.s32 4294967295, %s8086_s14   ;;  %s8212_s15 = sadd.s32 1, %s8086_s14   ;;  %s8086_s14 = sphi %s8196_s14, %s8660_s14   ;;  %s8082_s13 = sphi %s8194_s13, %s8659_s13   ;;  %s8078_s12 = sphi %s8192_s12, %s8658_s12   ;;  %s8074_s11 = sphi %s8190_s11, %s8657_s11  }
   0xb   : > { %s32_s16 = ssub.s32 %s8086_s14, %s8212_s15  ;;  %s35_s17 = sadd.s32 1, %s8082_s13 }
   0xc   : > { %p33_p0 = scmp.eq.s32.totalorder %s32_s16, 0  ;;  %p42_p1 = scmp.ne.s32.totalorder %s8082_s13, %s8078_s12 }
   0xd   : > { %p43_p2 = scmp.eq.s32.totalorder %s8086_s14, 0  ;;  %p48_p3 = scmp.ne.s32.totalorder %s8078_s12, %s8074_s11 }
   0xe   : > { %s8222_s18 = scalar_select %p33_p0, %s8082_s13, %s35_s17  }
   0xf   : > { %p8224_p4 = por %p43_p2, %p42_p1  ;;  %p8634_p5 = scmp.eq.s32.totalorder %s8209_s8, 0 }
  0x10   : > { %8637 = sst [smem:[#allocation22_spill]] %s8222_s18  ;;  %p240_p6 = scmp.eq.s32.totalorder %s8209_s8, 1 }
  0x11   : > { %s8638_s19 = scalar_select %p8224_p4, 1, 0 }
  0x12   : > { %p6365_p7 = scmp.ge.s32.totalorder %s8086_s14, 1  ;;  %p8233_p8 = por %p8634_p5, %p48_p3 }
  0x13   : > { %p253_p9 = scmp.lt.s32.totalorder %s8086_s14, 3  ;;  %p8238_p10 = por %p240_p6, %p42_p1 }
  0x14   : > { %s8639_s20 = scalar_select %p8233_p8, 1, 0 }
  0x15   : > { %s8640_s21 = scalar_select %p8238_p10, 1, 0 }
  0x16   : > { %p8242_p11 = pnand %p6365_p7, %p253_p9  ;;  %s8120_s23 = smov [#allocation5]  }
  0x17   : > { %s265_s24 = sshll.u32 %s8120_s23, 4  ;;  %s8121_s26 = smov [#allocation8]   ;;  %s266_s24 = int_to_ptr.vmem [resolvable:$true] %s265_s24 }
  0x18   : > { %s8641_s22 = scalar_select %p8242_p11, 1, 0 }
  0x19   : > { %p7159_p12 = pneg %p8242_p11  ;;  %s289_s27 = sshll.u32 %s8121_s26, 4  ;;  %s290_s27 = int_to_ptr.vmem [resolvable:$true] %s289_s27 }
  0x1a   : > { %s7807_s29 = scalar_lea.vmem %s266_s24, 50176  ;;  %p7815_p6 = scmp.lt.s32.totalorder %s266_s24, %s266_s24 }
  0x1b   : > { %p8250_p13 = pnand %p7159_p12, %p8634_p5  ;;  %p7808_p1 = scmp.ne.s32.totalorder %s266_s24, %s7807_s29 }
  0x1c   : > { %p7816_p7 = scmp.lt.s32.totalorder %s7807_s29, %s7807_s29 }
  0x1d   : > { %p8256_p0 = pneg %p8250_p13 }
  0x1e   : > { %p7817_p9 = por %p7816_p7, %p7815_p6 }
  0x1f   : > { %p7810_p2 = pnand %p7808_p1, %p8256_p0 }
  0x21   : > { %p7811_p3 = pneg %p7810_p2 }
  0x23   : > { %p7818_p12 = pnand %p7817_p9, %p7811_p3 }
  0x25   : > { %7821 = shalt.err (!%p7818_p12)
}
  0x26   : > { %s8122_s30 = smov 512   ;;  %s8123_s10 = smov 32  }
  0x27   : > { %7162 = dma.hbm_to_vmem [thread:$0]  (!%p8250_p13), %s8625_s1, 50176, %s266_s24, [#allocation6], %s8122_s30, %s8122_s30, %s8123_s10  }
  0x28   : > { %s7833_s17 = scalar_lea.vmem %s290_s27, 32768  ;;  %p7841_p2 = scmp.lt.s32.totalorder %s290_s27, %s290_s27 }
  0x29   : > { %p7834_p5 = scmp.ne.s32.totalorder %s290_s27, %s7833_s17  ;;  %p7842_p8 = scmp.lt.s32.totalorder %s7833_s17, %s7833_s17 }
  0x2b   : > { %p7836_p10 = pnand %p7834_p5, %p8256_p0  ;;  %p7843_p11 = por %p7842_p8, %p7841_p2 }
  0x2d   : > { %p7837_p1 = pneg %p7836_p10 }
  0x2f   : > { %p7844_p6 = pnand %p7843_p11, %p7837_p1 }
  0x31   : > { %7847 = shalt.err (!%p7844_p6)
}
  0x32   : > { %s8124_s23 = smov 256   ;;  %s8125_s26 = smov 16  }
  0x33   : > { %7168 = dma.hbm_to_vmem [thread:$0]  (!%p8250_p13), %s8627_s3, 32768, %s290_s27, [#allocation9], %s8124_s23, %s8124_s23, %s8125_s26  }
  0x34   : > { %s8126_s24 = smov [#allocation11]  }
  0x35   : > { %s313_s30 = sshll.u32 %s8126_s24, 4  ;;  %s314_s30 = int_to_ptr.vmem [resolvable:$true] %s313_s30 }
  0x36   : > { %s7859_s10 = scalar_lea.vmem %s314_s30, 8192  ;;  %p7867_p8 = scmp.lt.s32.totalorder %s314_s30, %s314_s30 }
  0x37   : > { %p7860_p5 = scmp.ne.s32.totalorder %s314_s30, %s7859_s10  ;;  %p7868_p11 = scmp.lt.s32.totalorder %s7859_s10, %s7859_s10 }
  0x39   : > { %p7862_p10 = pnand %p7860_p5, %p8256_p0  ;;  %p7869_p7 = por %p7868_p11, %p7867_p8 }
  0x3b   : > { %p7863_p3 = pneg %p7862_p10 }
  0x3d   : > { %p7870_p9 = pnand %p7869_p7, %p7863_p3 }
  0x3f   : > { %7873 = shalt.err (!%p7870_p9)
}
  0x40   : > { %s8127_s11 = smov 128   ;;  %s8128_s16 = smov 8  }
  0x41   : > { %7174 = dma.hbm_to_vmem [thread:$0]  (!%p8250_p13), %s8629_s5, 8192, %s314_s30, [#allocation12], %s8127_s11, %s8127_s11, %s8128_s16  }
  0x42   : > { %s8129_s17 = smov [#allocation7]   ;;  %s8130_s26 = smov [#allocation10]  }
  0x43   : > { %s279_s23 = sshll.u32 %s8129_s17, 4  ;;  %s303_s29 = sshll.u32 %s8130_s26, 4  ;;  %s280_s23 = int_to_ptr.vmem [resolvable:$true] %s279_s23  ;;  %s304_s29 = int_to_ptr.vmem [resolvable:$true] %s303_s29 }
  0x44   : > { %s7885_s24 = scalar_lea.vmem %s280_s23, 128  ;;  %p7893_p6 = scmp.lt.s32.totalorder %s280_s23, %s280_s23 }
  0x45   : > { %p7886_p12 = scmp.ne.s32.totalorder %s280_s23, %s7885_s24  ;;  %p7894_p5 = scmp.lt.s32.totalorder %s7885_s24, %s7885_s24 }
  0x47   : > { %p7888_p1 = pnand %p7886_p12, %p8256_p0  ;;  %p7895_p10 = por %p7894_p5, %p7893_p6 }
  0x49   : > { %p7889_p2 = pneg %p7888_p1 }
  0x4b   : > { %p7896_p3 = pnand %p7895_p10, %p7889_p2 }
  0x4d   : > { %7899 = shalt.err (!%p7896_p3)
}
  0x4e   : > { %7165 = dma.hbm_to_vmem [thread:$0]  (!%p8250_p13), %s8626_s2, 128, %s280_s23, [#allocation6]  }
  0x4f   : > { %s7911_s30 = scalar_lea.vmem %s304_s29, 64  ;;  %p7919_p9 = scmp.lt.s32.totalorder %s304_s29, %s304_s29 }
  0x50   : > { %p7912_p8 = scmp.ne.s32.totalorder %s304_s29, %s7911_s30  ;;  %p7920_p12 = scmp.lt.s32.totalorder %s7911_s30, %s7911_s30 }
  0x52   : > { %p7914_p11 = pnand %p7912_p8, %p8256_p0  ;;  %p7921_p1 = por %p7920_p12, %p7919_p9 }
  0x54   : > { %p7915_p7 = pneg %p7914_p11 }
  0x56   : > { %p7922_p4 = pnand %p7921_p1, %p7915_p7 }
  0x58   : > { %7925 = shalt.err (!%p7922_p4)
}
  0x59   : > { %7171 = dma.hbm_to_vmem [thread:$0]  (!%p8250_p13), %s8628_s4, 64, %s304_s29, [#allocation9]  }
  0x5a   : > { %s8131_s27 = smov [#allocation13]   ;;  %s8132_s23 = smov [#allocation14]  }
  0x5b   : > { %s327_s17 = sshll.u32 %s8131_s27, 4  ;;  %s338_s26 = sshll.u32 %s8132_s23, 4  ;;  %s328_s17 = int_to_ptr.vmem [resolvable:$true] %s327_s17  ;;  %s339_s26 = int_to_ptr.vmem [resolvable:$true] %s338_s26 }
  0x5c   : > { %s7937_s24 = scalar_lea.vmem %s328_s17, 32  ;;  %p7945_p10 = scmp.lt.s32.totalorder %s328_s17, %s328_s17 }
  0x5d   : > { %p7938_p2 = scmp.ne.s32.totalorder %s328_s17, %s7937_s24  ;;  %p7946_p3 = scmp.lt.s32.totalorder %s7937_s24, %s7937_s24 }
  0x5f   : > { %p7940_p6 = pnand %p7938_p2, %p8256_p0  ;;  %p7947_p4 = por %p7946_p3, %p7945_p10 }
  0x61   : > { %p7941_p5 = pneg %p7940_p6 }
  0x63   : > { %p7948_p8 = pnand %p7947_p4, %p7941_p5 }
  0x65   : > { %7951 = shalt.err (!%p7948_p8)
}
  0x66   : > { %7177 = dma.hbm_to_vmem [thread:$0]  (!%p8250_p13), %s8630_s6, 32, %s328_s17, [#allocation12]  }
  0x67   : > { %s7963_s29 = scalar_lea.vmem %s339_s26, 32  ;;  %p7971_p12 = scmp.lt.s32.totalorder %s339_s26, %s339_s26 }
  0x68   : > { %p7964_p11 = scmp.ne.s32.totalorder %s339_s26, %s7963_s29  ;;  %p7972_p1 = scmp.lt.s32.totalorder %s7963_s29, %s7963_s29 }
  0x6a   : > { %p7966_p7 = pnand %p7964_p11, %p8256_p0  ;;  %p7973_p2 = por %p7972_p1, %p7971_p12 }
  0x6c   : > { %p7967_p9 = pneg %p7966_p7 }
  0x6e   : > { %p7974_p6 = pnand %p7973_p2, %p7967_p9 }
  0x70   : > { %7977 = shalt.err (!%p7974_p6)
}
  0x71   : > { %7180 = dma.hbm_to_vmem [thread:$0]  (!%p8250_p13), %s8631_s7, 32, %s339_s26, [#allocation15]  }
  0x72   : > { %p6373_p5 = scmp.ge.s32.totalorder %s8086_s14, 2 }
  0x73   : > { %p8644_p10 = scmp.ne.s32.totalorder (!%p6373_p5), %s8638_s19, 0 }
  0x74   : > { %348 = sbr.rel (%p6373_p5) target bundleno = 155 (0x9b), region = 48 }
  0x79   : > { %351 = sbr.rel (!%p8644_p10) target bundleno = 155 (0x9b), region = 52  ;;  %s352_s28 = sand.u32 (%p8644_p10), 1, %s8082_s13  }
  0x7a   : > { %s6374_s16 = sshll.u32 (%p8644_p10), %s8086_s14, 1  ;;  %s7127_s27 = smul.u32 (%p8644_p10), 112, %s352_s28 }
  0x7b   : > { %s358_s17 = ssub.s32 (%p8644_p10), 3, %s6374_s16  ;;  %s8317_s24 = scalar_lea.sflag (%p8644_p10), [#allocation4], %s352_s28 }
  0x7c   : > { %p359_p0 = scmp.lt.s32.totalorder (%p8644_p10), %s358_s17, 2  ;;  %s356_s26 = scalar_lea.vmem (%p8644_p10), [#allocation3], %s7127_s27 }
  0x7e   : > { %s8662_s17 = smov (!%p359_p0, %s358_s17), 2 }
  0x7f   : > { %s8314_s23 = smul.u32 896, %s8662_s17 }
  0x81   : > { %s364_s25 = ssub.s32 1792, %s8314_s23 }
  0x82   : > { %365 = vsyncadd %s8317_s24, %s364_s25  ;;  %p6377_p13 = scmp.ne.s32.totalorder %s8314_s23, 0  ;;  %s7128_s19 = smul.u32 1792, %s8086_s14 }
  0x83   : > { %s371_s10 = sshll.u32 %s356_s26, 4  ;;  %s7982_s14 = scalar_lea.hbm %s8624_s0, 2688  ;;  %s8327_s10 = int_to_ptr.vmem [resolvable:$true] %s371_s10 }
  0x84   : > { %s8325_s30 = scalar_lea.hbm %s8624_s0, %s7128_s19 }
  0x85   : > { %s7978_s11 = scalar_lea.hbm %s8325_s30, %s8314_s23  ;;  %p7983_p11 = scmp.lt.s32.totalorder %s8325_s30, %s8624_s0 }
  0x86   : > { %p7979_p3 = scmp.ne.s32.totalorder %s8325_s30, %s7978_s11  ;;  %p7984_p7 = scmp.lt.s32.totalorder %s7982_s14, %s7978_s11 }
  0x88   : > { %p7980_p4 = pnand %p7979_p3, %p6377_p13  ;;  %p7985_p9 = por %p7984_p7, %p7983_p11 }
  0x8a   : > { %p7981_p8 = pneg %p7980_p4 }
  0x8c   : > { %p7986_p12 = pnand %p7985_p9, %p7981_p8 }
  0x8e   : > { %7989 = shalt.err (!%p7986_p12)
}
  0x8f   : > { %s7990_s25 = scalar_lea.vmem %s8327_s10, %s8314_s23  ;;  %s8133_s26 = smov [#allocation3]  }
  0x90   : > { %p7991_p1 = scmp.ne.s32.totalorder %s8327_s10, %s7990_s25  ;;  %s7994_s19 = sshll.u32 %s8133_s26, 4  ;;  %s7995_s19 = int_to_ptr.vmem [resolvable:$false] %s7994_s19 }
  0x91   : > { %s7996_s18 = scalar_lea.vmem %s7995_s19, 3584  ;;  %p7997_p5 = scmp.lt.s32.totalorder %s8327_s10, %s7995_s19 }
  0x92   : > { %p7992_p2 = pnand %p7991_p1, %p6377_p13  ;;  %p7998_p10 = scmp.lt.s32.totalorder %s7996_s18, %s7990_s25 }
  0x94   : > { %p7993_p6 = pneg %p7992_p2  ;;  %p7999_p0 = por %p7998_p10, %p7997_p5 }
  0x96   : > { %p8000_p3 = pnand %p7999_p0, %p7993_p6 }
  0x98   : > { %8003 = shalt.err (!%p8000_p3)
}
  0x99   : > { %s8134_s29 = smov 896   ;;  %s8135_s11 = smov 56  }
  0x9a   : > { %377 = dma.hbm_to_vmem [thread:$0]  (%p6377_p13), %s8325_s30, %s8314_s23, %s8327_s10, %s8317_s24, %s8134_s29, %s8134_s29, %s8135_s11  }
  0x9b PF: > { %p8645_p4 = scmp.ne.s32.totalorder %s8641_s22, 0 }
  0x9c   : > { %s8356_s28 = sand.u32 (!%p8645_p4), 1, %s8078_s12   ;;  %p8646_p8 = scmp.ne.s32.totalorder (!%p8645_p4), %s8639_s20, 0 }
  0x9d   : > { %383 = sbr.rel (%p8645_p4) target bundleno = 1555 (0x613), region = 56  ;;  %s386_s14 = scalar_lea.sflag (!%p8645_p4), [#allocation4], %s8356_s28 }
  0x9e   : > { %s7129_s16 = smul.u32 (!%p8645_p4), 112, %s8356_s28 }
  0xa0   : > { %s8360_s27 = scalar_lea.vmem (!%p8645_p4), [#allocation3], %s7129_s16 }
  0xa2   : > { %8053 = dma.done.wait (%p8646_p8), %s386_s14, 1792  }
  0xa3   : > { %8055 = vsyncadd (%p8646_p8), %s386_s14, 4294965504  ;;  %p8647_p13 = scmp.eq.s32.totalorder %s8209_s8, 0 }
  0xa5   : > { %8057 = dma.done.wait (%p8647_p13), [#allocation6], 50304   ;;  %p8648_p11 = pmov %p8647_p13 }
  0xa7   : > { %8059 = vsyncadd (%p8648_p11), [#allocation6], 4294916992  ;;  %p8649_p7 = pmov %p8648_p11 }
  0xa9   : > { %8061 = dma.done.wait (%p8649_p7), [#allocation9], 32832   ;;  %p8650_p9 = pmov %p8649_p7 }
  0xaa   : > { %p8651_p12 = pmov %p8649_p7 }
  0xab   : > { %8063 = vsyncadd (%p8650_p9), [#allocation9], 4294934464 }
  0xac   : > { %8065 = dma.done.wait (%p8651_p12), [#allocation12], 8224   ;;  %p8652_p1 = pmov %p8649_p7 }
  0xae   : > { %8067 = vsyncadd (%p8652_p1), [#allocation12], 4294959072  ;;  %p8653_p2 = pmov %p8652_p1 }
  0xaf   : > { %p8654_p6 = pmov %p8652_p1 }
  0xb0   : > { %8069 = dma.done.wait (%p8653_p2), [#allocation15], 32  }
  0xb1   : > { %8071 = vsyncadd (%p8654_p6), [#allocation15], 4294967264  ;;  %v540_v1 = vld [vmem:[#allocation5 + $0x1c0] sm:$0xff]  ;;  %v464_v55 = vld [vmem:[%s8360_s27 + $0x8] sm:$0xff]  ;;  %vm2878_vm0 = vcmask 130048   ;;  %s6389_s20 = sshll.u32 %s8356_s28, 4 }
  0xb2   : > { %v544_v2 = vld [vmem:[#allocation5 + $0x1e0] sm:$0xff]  ;;  %v466_v60 = vld [vmem:[%s8360_s27 + $0x18] sm:$0xff]  ;;  %vm6063_vm1 = vcmask 7168   ;;  %s8576_s22 = scalar_lea.vmem [#allocation16], %s6389_s20   ;;  %p8655_p5 = scmp.ne.s32.totalorder %s8640_s21, 0 }
  0xb3   : > { %v668_v3 = vld [vmem:[#allocation5 + $0x5c0] sm:$0xff]  ;;  %v6447_v4 = vcombine.high %v540_v1, %v544_v2  ;;  %v6446_v6 = vcombine.low %v540_v1, %v544_v2  ;;  %s7108_s23 = sshll.u32 (%p8655_p5), %s8209_s8, 1  ;;  %s7124_s24 = sshll.u32 (%p8655_p5), %s8209_s8, 4 }
  0xb4   : > { %v672_v5 = vld [vmem:[#allocation5 + $0x5e0] sm:$0xff]  ;;  %s6074_s10 = ssub.s32 (%p8655_p5), 3, %s7108_s23  ;;  %s8587_s25 = scalar_lea.vmem (%p8655_p5), %s8633_s9, %s7124_s24  }
  0xb5   : > { %v532_v7 = vld [vmem:[#allocation5 + $0x180] sm:$0xff]  ;;  %v6575_v9 = vcombine.high %v668_v3, %v672_v5  ;;  %v6574_v10 = vcombine.low %v668_v3, %v672_v5  ;;  %2882 = vmatprep.subr.bf16.mxu0 %v6447_v4  ;;  %p6075_p10 = scmp.lt.s32.totalorder (%p8655_p5), %s6074_s10, 2 }
  0xb6   : > { %v536_v8 = vld [vmem:[#allocation5 + $0x1a0] sm:$0xff]  ;;  %2883 = vmatpush1.bf16.msra.mxu0 %v6446_v6 }
  0xb7   : > { %v6439_v11 = vcombine.high %v532_v7, %v536_v8  ;;  %v660_v12 = vld [vmem:[#allocation5 + $0x580] sm:$0xff]  ;;  %2925 = vmatprep.subr.bf16.mxu1 %v6575_v9  ;;  %v6438_v19 = vcombine.low %v532_v7, %v536_v8 }
  0xb8   : > { %v664_v13 = vld [vmem:[#allocation5 + $0x5a0] sm:$0xff]  ;;  %2926 = vmatpush1.bf16.msra.mxu1 %v6574_v10 }
  0xb9   : > { %v524_v14 = vld [vmem:[#allocation5 + $0x140] sm:$0xff]  ;;  %v6567_v15 = vcombine.high %v660_v12, %v664_v13  ;;  %2884 = vmatprep.subr.bf16.mxu0 %v6439_v11  ;;  %v6566_v20 = vcombine.low %v660_v12, %v664_v13 }
  0xba   : > { %v528_v16 = vld [vmem:[#allocation5 + $0x160] sm:$0xff]  ;;  %2885 = vmatpush1.bf16.msra.mxu0 %v6438_v19 }
  0xbb   : > { %v652_v17 = vld [vmem:[#allocation5 + $0x540] sm:$0xff]  ;;  %v6431_v21 = vcombine.high %v524_v14, %v528_v16  ;;  %2927 = vmatprep.subr.bf16.mxu1 %v6567_v15  ;;  %v6430_v27 = vcombine.low %v524_v14, %v528_v16 }
  0xbc   : > { %v656_v18 = vld [vmem:[#allocation5 + $0x560] sm:$0xff]  ;;  %2928 = vmatpush1.bf16.msra.mxu1 %v6566_v20 }
  0xbd   : > { %v6559_v22 = vcombine.high %v652_v17, %v656_v18  ;;  %v516_v23 = vld [vmem:[#allocation5 + $0x100] sm:$0xff]  ;;  %2886 = vmatprep.subr.bf16.mxu0 %v6431_v21  ;;  %v6558_v28 = vcombine.low %v652_v17, %v656_v18 }
  0xbe   : > { %v520_v24 = vld [vmem:[#allocation5 + $0x120] sm:$0xff]  ;;  %2887 = vmatpush1.bf16.msra.mxu0 %v6430_v27 }
  0xbf   : > { %v644_v25 = vld [vmem:[#allocation5 + $0x500] sm:$0xff]  ;;  %v6423_v29 = vcombine.high %v516_v23, %v520_v24  ;;  %2929 = vmatprep.subr.bf16.mxu1 %v6559_v22  ;;  %v6422_v35 = vcombine.low %v516_v23, %v520_v24 }
  0xc0   : > { %v648_v26 = vld [vmem:[#allocation5 + $0x520] sm:$0xff]  ;;  %2930 = vmatpush1.bf16.msra.mxu1 %v6558_v28 }
  0xc1   : > { %v6551_v30 = vcombine.high %v644_v25, %v648_v26  ;;  %v508_v31 = vld [vmem:[#allocation5 + $0xc0] sm:$0xff]  ;;  %2888 = vmatprep.subr.bf16.mxu0 %v6423_v29  ;;  %v6550_v36 = vcombine.low %v644_v25, %v648_v26 }
  0xc2   : > { %v512_v32 = vld [vmem:[#allocation5 + $0xe0] sm:$0xff]  ;;  %2889 = vmatpush1.bf16.msra.mxu0 %v6422_v35 }
  0xc3   : > { %v636_v33 = vld [vmem:[#allocation5 + $0x4c0] sm:$0xff]  ;;  %v6415_v37 = vcombine.high %v508_v31, %v512_v32  ;;  %2931 = vmatprep.subr.bf16.mxu1 %v6551_v30  ;;  %v6414_v43 = vcombine.low %v508_v31, %v512_v32 }
  0xc4   : > { %v640_v34 = vld [vmem:[#allocation5 + $0x4e0] sm:$0xff]  ;;  %2932 = vmatpush1.bf16.msra.mxu1 %v6550_v36 }
  0xc5   : > { %v6543_v38 = vcombine.high %v636_v33, %v640_v34  ;;  %v500_v39 = vld [vmem:[#allocation5 + $0x80] sm:$0xff]  ;;  %2890 = vmatprep.subr.bf16.mxu0 %v6415_v37  ;;  %v6542_v44 = vcombine.low %v636_v33, %v640_v34 }
  0xc6   : > { %v504_v40 = vld [vmem:[#allocation5 + $0xa0] sm:$0xff]  ;;  %2891 = vmatpush1.bf16.msra.mxu0 %v6414_v43 }
  0xc7   : > { %v628_v41 = vld [vmem:[#allocation5 + $0x480] sm:$0xff]  ;;  %v6407_v45 = vcombine.high %v500_v39, %v504_v40  ;;  %2933 = vmatprep.subr.bf16.mxu1 %v6543_v38  ;;  %v6406_v51 = vcombine.low %v500_v39, %v504_v40 }
  0xc8   : > { %v632_v42 = vld [vmem:[#allocation5 + $0x4a0] sm:$0xff]  ;;  %2934 = vmatpush1.bf16.msra.mxu1 %v6542_v44 }
  0xc9   : > { %v6535_v46 = vcombine.high %v628_v41, %v632_v42  ;;  %v492_v47 = vld [vmem:[#allocation5 + $0x40] sm:$0xff]  ;;  %2892 = vmatprep.subr.bf16.mxu0 %v6407_v45  ;;  %v6534_v52 = vcombine.low %v628_v41, %v632_v42 }
  0xca   : > { %v496_v48 = vld [vmem:[#allocation5 + $0x60] sm:$0xff]  ;;  %2893 = vmatpush1.bf16.msra.mxu0 %v6406_v51 }
  0xcb   : > { %v620_v49 = vld [vmem:[#allocation5 + $0x440] sm:$0xff]  ;;  %v6399_v53 = vcombine.high %v492_v47, %v496_v48  ;;  %2935 = vmatprep.subr.bf16.mxu1 %v6535_v46  ;;  %v6398_v1 = vcombine.low %v492_v47, %v496_v48 }
  0xcc   : > { %v624_v50 = vld [vmem:[#allocation5 + $0x460] sm:$0xff]  ;;  %2936 = vmatpush1.bf16.msra.mxu1 %v6534_v52 }
  0xcd   : > { %v484_v54 = vld [vmem:[#allocation5] sm:$0xff]  ;;  %v6527_v57 = vcombine.high %v620_v49, %v624_v50  ;;  %2894 = vmatprep.subr.bf16.mxu0 %v6399_v53  ;;  %v6526_v2 = vcombine.low %v620_v49, %v624_v50 }
  0xce   : > { %v471_v56 = vld [vmem:[%s8360_s27 + $0x40] sm:$0xff]  ;;  %v473_v61 = vld [vmem:[%s8360_s27 + $0x50] sm:$0xff]  ;;  %2895 = vmatpush1.bf16.msra.mxu0 %v6398_v1 }
  0xcf   : > { %v488_v58 = vld [vmem:[#allocation5 + $0x20] sm:$0xff]  ;;  %v8384_v59 = vpack.c.bf16 %v471_v56, %v464_v55  ;;  %v8388_v0 = vpack.c.bf16 %v473_v61, %v466_v60  ;;  %2937 = vmatprep.subr.bf16.mxu1 %v6527_v57 }
  0xd0   : > { %v612_v62 = vld [vmem:[#allocation5 + $0x400] sm:$0xff]  ;;  %v6391_v3 = vcombine.high %v484_v54, %v488_v58  ;;  %v6390_v9 = vcombine.low %v484_v54, %v488_v58  ;;  %2938 = vmatpush1.bf16.msra.mxu1 %v6526_v2 }
  0xd1   : > { %v616_v63 = vld [vmem:[#allocation5 + $0x420] sm:$0xff]  ;;  %2914 = vmatprep.mubr.bf16.mxu0 %v8384_v59  ;;  %2957 = vmatprep.mubr.bf16.mxu1 %v8388_v0 }
  0xd2   : > { %v6519_v4 = vcombine.high %v612_v62, %v616_v63  ;;  %v604_v5 = vld [vmem:[#allocation5 + $0x3c0] sm:$0xff]  ;;  %2896 = vmatprep.subr.bf16.mxu0 %v6391_v3  ;;  %v6518_v10 = vcombine.low %v612_v62, %v616_v63 }
  0xd3   : > { %v608_v6 = vld [vmem:[#allocation5 + $0x3e0] sm:$0xff]  ;;  %2897 = vmatpush1.bf16.msra.mxu0 %v6390_v9 }
  0xd4   : > { %v732_v7 = vld [vmem:[#allocation5 + $0x7c0] sm:$0xff]  ;;  %v6511_v11 = vcombine.high %v604_v5, %v608_v6  ;;  %2939 = vmatprep.subr.bf16.mxu1 %v6519_v4  ;;  %v6510_v17 = vcombine.low %v604_v5, %v608_v6 }
  0xd5   : > { %v736_v8 = vld [vmem:[#allocation5 + $0x7e0] sm:$0xff]  ;;  %2940 = vmatpush1.bf16.msra.mxu1 %v6518_v10 }
  0xd6   : > { %v6639_v12 = vcombine.high %v732_v7, %v736_v8  ;;  %v596_v13 = vld [vmem:[#allocation5 + $0x380] sm:$0xff]  ;;  %2898 = vmatprep.subr.bf16.mxu0 %v6511_v11  ;;  %v6638_v18 = vcombine.low %v732_v7, %v736_v8 }
  0xd7   : > { %v600_v14 = vld [vmem:[#allocation5 + $0x3a0] sm:$0xff]  ;;  %2899 = vmatpush2.bf16.msra.mxu0 %v6510_v17 }
  0xd8   : > { %v724_v15 = vld [vmem:[#allocation5 + $0x780] sm:$0xff]  ;;  %v6503_v19 = vcombine.high %v596_v13, %v600_v14  ;;  %2941 = vmatprep.subr.bf16.mxu1 %v6639_v12  ;;  %v6502_v25 = vcombine.low %v596_v13, %v600_v14  ;;  %v470_v13 = vld [vmem:[%s8360_s27 + $0x38] sm:$0xff] }
  0xd9   : > { %v728_v16 = vld [vmem:[#allocation5 + $0x7a0] sm:$0xff]  ;;  %2942 = vmatpush2.bf16.msra.mxu1 %v6638_v18 }
  0xda   : > { %v6631_v20 = vcombine.high %v724_v15, %v728_v16  ;;  %v588_v21 = vld [vmem:[#allocation5 + $0x340] sm:$0xff]  ;;  %2900 = vmatprep.subr.bf16.mxu0 %v6503_v19  ;;  %v6630_v26 = vcombine.low %v724_v15, %v728_v16  ;;  %v472_v16 = vld [vmem:[%s8360_s27 + $0x48] sm:$0xff] }
  0xdb   : > { %v592_v22 = vld [vmem:[#allocation5 + $0x360] sm:$0xff]  ;;  %2901 = vmatpush2.bf16.msra.mxu0 %v6502_v25 }
  0xdc   : > { %v716_v23 = vld [vmem:[#allocation5 + $0x740] sm:$0xff]  ;;  %v6495_v27 = vcombine.high %v588_v21, %v592_v22  ;;  %2943 = vmatprep.subr.bf16.mxu1 %v6631_v20  ;;  %v6494_v33 = vcombine.low %v588_v21, %v592_v22  ;;  %v541_v22 = vld [vmem:[#allocation5 + $0x1c8] sm:$0xff] }
  0xdd   : > { %v720_v24 = vld [vmem:[#allocation5 + $0x760] sm:$0xff]  ;;  %2944 = vmatpush2.bf16.msra.mxu1 %v6630_v26  ;;  %v468_v26 = vld [vmem:[%s8360_s27 + $0x28] sm:$0xff] }
  0xde   : > { %v6623_v28 = vcombine.high %v716_v23, %v720_v24  ;;  %v580_v29 = vld [vmem:[#allocation5 + $0x300] sm:$0xff]  ;;  %2902 = vmatprep.subr.bf16.mxu0 %v6495_v27  ;;  %v6622_v34 = vcombine.low %v716_v23, %v720_v24  ;;  %v545_v23 = vld [vmem:[#allocation5 + $0x1e8] sm:$0xff] }
  0xdf   : > { %v584_v30 = vld [vmem:[#allocation5 + $0x320] sm:$0xff]  ;;  %2903 = vmatpush2.bf16.msra.mxu0 %v6494_v33 }
  0xe0   : > { %v708_v31 = vld [vmem:[#allocation5 + $0x700] sm:$0xff]  ;;  %v6487_v35 = vcombine.high %v580_v29, %v584_v30  ;;  %2945 = vmatprep.subr.bf16.mxu1 %v6623_v28  ;;  %v6486_v41 = vcombine.low %v580_v29, %v584_v30  ;;  %v6449_v30 = vcombine.high %v541_v22, %v545_v23 }
  0xe1   : > { %v712_v32 = vld [vmem:[#allocation5 + $0x720] sm:$0xff]  ;;  %2946 = vmatpush2.bf16.msra.mxu1 %v6622_v34 }
  0xe2   : > { %v6615_v36 = vcombine.high %v708_v31, %v712_v32  ;;  %v572_v37 = vld [vmem:[#allocation5 + $0x2c0] sm:$0xff]  ;;  %2904 = vmatprep.subr.bf16.mxu0 %v6487_v35  ;;  %v6614_v42 = vcombine.low %v708_v31, %v712_v32 }
  0xe3   : > { %v576_v38 = vld [vmem:[#allocation5 + $0x2e0] sm:$0xff]  ;;  %2905 = vmatpush2.bf16.msra.mxu0 %v6486_v41  ;;  %v8136_v41 = vmov 0  }
  0xe4   : > { %v700_v39 = vld [vmem:[#allocation5 + $0x6c0] sm:$0xff]  ;;  %v6479_v43 = vcombine.high %v572_v37, %v576_v38  ;;  %2947 = vmatprep.subr.bf16.mxu1 %v6615_v36  ;;  %v6478_v49 = vcombine.low %v572_v37, %v576_v38  ;;  %v476_v36 = vld [vmem:[%s8360_s27 + $0x68] sm:$0xff] }
  0xe5   : > { %v704_v40 = vld [vmem:[#allocation5 + $0x6e0] sm:$0xff]  ;;  %2948 = vmatpush2.bf16.msra.mxu1 %v6614_v42  ;;  %v533_v38 = vld [vmem:[#allocation5 + $0x188] sm:$0xff] }
  0xe6   : > { %v6607_v44 = vcombine.high %v700_v39, %v704_v40  ;;  %v564_v45 = vld [vmem:[#allocation5 + $0x280] sm:$0xff]  ;;  %2906 = vmatprep.subr.bf16.mxu0 %v6479_v43  ;;  %v6606_v50 = vcombine.low %v700_v39, %v704_v40  ;;  %v537_v39 = vld [vmem:[#allocation5 + $0x1a8] sm:$0xff] }
  0xe7   : > { %v568_v46 = vld [vmem:[#allocation5 + $0x2a0] sm:$0xff]  ;;  %2907 = vmatpush2.bf16.msra.mxu0 %v6478_v49 }
  0xe8   : > { %v692_v47 = vld [vmem:[#allocation5 + $0x680] sm:$0xff]  ;;  %v6471_v51 = vcombine.high %v564_v45, %v568_v46  ;;  %2949 = vmatprep.subr.bf16.mxu1 %v6607_v44  ;;  %v6470_v57 = vcombine.low %v564_v45, %v568_v46  ;;  %v6448_v45 = vcombine.low %v541_v22, %v545_v23 }
  0xe9   : > { %v696_v48 = vld [vmem:[#allocation5 + $0x6a0] sm:$0xff]  ;;  %2950 = vmatpush2.bf16.msra.mxu1 %v6606_v50  ;;  %v6441_v50 = vcombine.high %v533_v38, %v537_v39 }
  0xea   : > { %v6599_v52 = vcombine.high %v692_v47, %v696_v48  ;;  %v556_v53 = vld [vmem:[#allocation5 + $0x240] sm:$0xff]  ;;  %2908 = vmatprep.subr.bf16.mxu0 %v6471_v51  ;;  %v6598_v58 = vcombine.low %v692_v47, %v696_v48  ;;  %v525_v47 = vld [vmem:[#allocation5 + $0x148] sm:$0xff] }
  0xeb   : > { %v560_v54 = vld [vmem:[#allocation5 + $0x260] sm:$0xff]  ;;  %2909 = vmatpush2.bf16.msra.mxu0 %v6470_v57  ;;  %v529_v48 = vld [vmem:[#allocation5 + $0x168] sm:$0xff] }
  0xec   : > { %v684_v55 = vld [vmem:[#allocation5 + $0x640] sm:$0xff]  ;;  %v6463_v60 = vcombine.high %v556_v53, %v560_v54  ;;  %2951 = vmatprep.subr.bf16.mxu1 %v6599_v52  ;;  %v6462_v3 = vcombine.low %v556_v53, %v560_v54  ;;  %v6440_v53 = vcombine.low %v533_v38, %v537_v39 }
  0xed   : > { %v688_v56 = vld [vmem:[#allocation5 + $0x660] sm:$0xff]  ;;  %2952 = vmatpush2.bf16.msra.mxu1 %v6598_v58  ;;  %v6433_v58 = vcombine.high %v525_v47, %v529_v48 }
  0xee   : > { %v6591_v61 = vcombine.high %v684_v55, %v688_v56  ;;  %v548_v62 = vld [vmem:[#allocation5 + $0x200] sm:$0xff]  ;;  %2910 = vmatprep.subr.bf16.mxu0 %v6463_v60  ;;  %v6590_v4 = vcombine.low %v684_v55, %v688_v56  ;;  %v517_v55 = vld [vmem:[#allocation5 + $0x108] sm:$0xff] }
  0xef   : > { %v552_v63 = vld [vmem:[#allocation5 + $0x220] sm:$0xff]  ;;  %2911 = vmatpush2.bf16.msra.mxu0 %v6462_v3  ;;  %v521_v56 = vld [vmem:[#allocation5 + $0x128] sm:$0xff] }
  0xf0   : > { %v676_v1 = vld [vmem:[#allocation5 + $0x600] sm:$0xff]  ;;  %v6455_v5 = vcombine.high %v548_v62, %v552_v63  ;;  %2953 = vmatprep.subr.bf16.mxu1 %v6591_v61  ;;  %v6454_v11 = vcombine.low %v548_v62, %v552_v63  ;;  %v6432_v62 = vcombine.low %v525_v47, %v529_v48  ;;  %v601_v47 = vld [vmem:[#allocation5 + $0x3a8] sm:$0xff] }
  0xf1   : > { %v680_v2 = vld [vmem:[#allocation5 + $0x620] sm:$0xff]  ;;  %2954 = vmatpush2.bf16.msra.mxu1 %v6590_v4  ;;  %v6425_v4 = vcombine.high %v517_v55, %v521_v56 }
  0xf2   : > { %v6583_v6 = vcombine.high %v676_v1, %v680_v2  ;;  %v796_v7 = vld [vmem:[#allocation5 + $0x9c0] sm:$0xff]  ;;  %2912 = vmatprep.subr.bf16.mxu0 %v6455_v5  ;;  %v6582_v14 = vcombine.low %v676_v1, %v680_v2  ;;  %v509_v1 = vld [vmem:[#allocation5 + $0xc8] sm:$0xff] }
  0xf3   : > { %v800_v8 = vld [vmem:[#allocation5 + $0x9e0] sm:$0xff]  ;;  %2913 = vmatpush2.bf16.msra.mxu0 %v6454_v11  ;;  %v513_v2 = vld [vmem:[#allocation5 + $0xe8] sm:$0xff] }
  0xf4   : > { %v868_v9 = vld [vmem:[#allocation5 + $0xc00] sm:$0xff]  ;;  %v6703_v17 = vcombine.high %v796_v7, %v800_v8  ;;  %2955 = vmatprep.subr.bf16.mxu1 %v6583_v6  ;;  %v6702_v25 = vcombine.low %v796_v7, %v800_v8  ;;  %v6424_v7 = vcombine.low %v517_v55, %v521_v56  ;;  %v593_v55 = vld [vmem:[#allocation5 + $0x368] sm:$0xff] }
  0xf5   : > { %v872_v10 = vld [vmem:[#allocation5 + $0xc20] sm:$0xff]  ;;  %2956 = vmatpush2.bf16.msra.mxu1 %v6582_v14 }
  0xf6   : > { %v463_v12 = vld [vmem:[%s8360_s27] sm:$0xff]  ;;  %v465_v15 = vld [vmem:[%s8360_s27 + $0x10] sm:$0xff]  ;;  %v6775_v18 = vcombine.high %v868_v9, %v872_v10  ;;  %2968 = vmatprep.subr.bf16.mxu0 %v6703_v17  ;;  %v6774_v28 = vcombine.low %v868_v9, %v872_v10  ;;  %v501_v9 = vld [vmem:[#allocation5 + $0x88] sm:$0xff] }
  0xf7   : > { %v788_v19 = vld [vmem:[#allocation5 + $0x980] sm:$0xff]  ;;  %v8396_v21 = vpack.c.bf16 %v470_v13, %v463_v12  ;;  %v8398_v24 = vpack.c.bf16 %v472_v16, %v465_v15  ;;  %v505_v10 = vld [vmem:[#allocation5 + $0xa8] sm:$0xff]  ;;  %v6417_v12 = vcombine.high %v509_v1, %v513_v2  ;;  %v6416_v15 = vcombine.low %v509_v1, %v513_v2 }
  0xf8   : > { %v792_v20 = vld [vmem:[#allocation5 + $0x9a0] sm:$0xff]  ;;  %3025 = vmatprep.subr.bf16.mxu1 %v6775_v18  ;;  %v493_v17 = vld [vmem:[#allocation5 + $0x48] sm:$0xff] }
  0xf9   : > { %v475_v27 = vld [vmem:[%s8360_s27 + $0x60] sm:$0xff]  ;;  %v6695_v29 = vcombine.high %v788_v19, %v792_v20  ;;  %2915 = vmatmul.mubr.bf16.vlgmr.msra.gmra.mxu0 %v8396_v21  ;;  %2958 = vmatmul.mubr.bf16.vlgmr.msra.gmra.mxu1 %v8398_v24  ;;  %v6694_v34 = vcombine.low %v788_v19, %v792_v20  ;;  %v469_v35 = vld [vmem:[%s8360_s27 + $0x30] sm:$0xff]  ;;  %v497_v18 = vld [vmem:[#allocation5 + $0x68] sm:$0xff]  ;;  %v6409_v20 = vcombine.high %v501_v9, %v505_v10 }
  0xfa   : > { %v780_v31 = vld [vmem:[#allocation5 + $0x940] sm:$0xff]  ;;  %v8403_v33 = vpack.c.bf16 %v475_v27, %v468_v26  ;;  %2969 = vmatpush1.bf16.msra.mxu0 %v6702_v25  ;;  %3026 = vmatpush1.bf16.msra.mxu1 %v6774_v28  ;;  %v8410_v44 = vpack.c.bf16 %v476_v36, %v469_v35  ;;  %v6408_v25 = vcombine.low %v501_v9, %v505_v10  ;;  %v485_v27 = vld [vmem:[#allocation5 + $0x8] sm:$0xff] }
  0xfb   : > { %v784_v32 = vld [vmem:[#allocation5 + $0x960] sm:$0xff]  ;;  %2970 = vmatprep.subr.bf16.mxu0 %v6695_v29  ;;  %3043 = vmatprep.mubr.bf16.mxu1 %v8136_v41  ;;  %v489_v28 = vld [vmem:[#allocation5 + $0x28] sm:$0xff] }
  0xfc   : > { %v6687_v37 = vcombine.high %v780_v31, %v784_v32  ;;  %v772_v40 = vld [vmem:[#allocation5 + $0x900] sm:$0xff]  ;;  %3054 = vmatprep.subr.bf16.mxu1 %v6449_v30  ;;  %3000 = vmatprep.mubr.bf16.mxu0 %v8403_v33  ;;  %v6686_v43 = vcombine.low %v780_v31, %v784_v32  ;;  %v6401_v30 = vcombine.high %v493_v17, %v497_v18  ;;  %v605_v36 = vld [vmem:[#allocation5 + $0x3c8] sm:$0xff] }
  0xfd   : > { %v776_v42 = vld [vmem:[#allocation5 + $0x920] sm:$0xff]  ;;  %v6393_v39 = vcombine.high %v485_v27, %v489_v28  ;;  %v585_v1 = vld [vmem:[#allocation5 + $0x328] sm:$0xff] }
  0xfe   : > { %2971 = vmatpush1.bf16.msra.mxu0 %v6694_v34  ;;  %v6679_v46 = vcombine.high %v772_v40, %v776_v42  ;;  %v764_v49 = vld [vmem:[#allocation5 + $0x8c0] sm:$0xff]  ;;  %v6678_v52 = vcombine.low %v772_v40, %v776_v42  ;;  %v6400_v34 = vcombine.low %v493_v17, %v497_v18  ;;  %v577_v9 = vld [vmem:[#allocation5 + $0x2e8] sm:$0xff] }
  0xff   : > { %2972 = vmatprep.subr.bf16.mxu0 %v6687_v37  ;;  %v768_v51 = vld [vmem:[#allocation5 + $0x8e0] sm:$0xff]  ;;  %v609_v37 = vld [vmem:[#allocation5 + $0x3e8] sm:$0xff] }
 0x100   : > { %v6671_v54 = vcombine.high %v764_v49, %v768_v51  ;;  %v756_v57 = vld [vmem:[#allocation5 + $0x880] sm:$0xff]  ;;  %v6670_v61 = vcombine.low %v764_v49, %v768_v51  ;;  %v6513_v49 = vcombine.high %v605_v36, %v609_v37  ;;  %v569_v17 = vld [vmem:[#allocation5 + $0x2a8] sm:$0xff] }
 0x101   : > { %6782 = vmatmul.mubr.msk.bf16.vlgmr.msra.gmra.mxu1 %vm2878_vm0, %v8410_v44  ;;  %v760_v60 = vld [vmem:[#allocation5 + $0x8a0] sm:$0xff] }
 0x102   : > { %2973 = vmatpush1.bf16.msra.mxu0 %v6686_v43  ;;  %3055 = vmatpush1.bf16.msra.mxu1 %v6448_v45  ;;  %v6663_v63 = vcombine.high %v756_v57, %v760_v60  ;;  %v748_v3 = vld [vmem:[#allocation5 + $0x840] sm:$0xff]  ;;  %v6662_v6 = vcombine.low %v756_v57, %v760_v60  ;;  %v6392_v43 = vcombine.low %v485_v27, %v489_v28  ;;  %v561_v27 = vld [vmem:[#allocation5 + $0x268] sm:$0xff] }
 0x103   : > { %2974 = vmatprep.subr.bf16.mxu0 %v6679_v46  ;;  %3056 = vmatprep.subr.bf16.mxu1 %v6441_v50  ;;  %v752_v5 = vld [vmem:[#allocation5 + $0x860] sm:$0xff]  ;;  %v597_v46 = vld [vmem:[#allocation5 + $0x388] sm:$0xff] }
 0x104   : > { %3086 = vmatprep.mubr.bf16.mxu1 %v8384_v59  ;;  %v6655_v8 = vcombine.high %v748_v3, %v752_v5  ;;  %v740_v11 = vld [vmem:[#allocation5 + $0x800] sm:$0xff]  ;;  %v6654_v14 = vcombine.low %v748_v3, %v752_v5  ;;  %v6505_v57 = vcombine.high %v597_v46, %v601_v47  ;;  %v669_v28 = vld [vmem:[#allocation5 + $0x5c8] sm:$0xff] }
 0x105   : > { %v744_v13 = vld [vmem:[#allocation5 + $0x820] sm:$0xff] }
 0x106   : > { %2975 = vmatpush1.bf16.msra.mxu0 %v6678_v52  ;;  %3057 = vmatpush1.bf16.msra.mxu1 %v6440_v53  ;;  %v6647_v16 = vcombine.high %v740_v11, %v744_v13  ;;  %v860_v19 = vld [vmem:[#allocation5 + $0xbc0] sm:$0xff]  ;;  %v6646_v23 = vcombine.low %v740_v11, %v744_v13  ;;  %v6512_v52 = vcombine.low %v605_v36, %v609_v37  ;;  %v549_v37 = vld [vmem:[#allocation5 + $0x208] sm:$0xff] }
 0x107   : > { %2976 = vmatprep.subr.bf16.mxu0 %v6671_v54  ;;  %3058 = vmatprep.subr.bf16.mxu1 %v6433_v58  ;;  %v864_v22 = vld [vmem:[#allocation5 + $0xbe0] sm:$0xff]  ;;  %v589_v54 = vld [vmem:[#allocation5 + $0x348] sm:$0xff] }
 0x108   : > { %v6767_v26 = vcombine.high %v860_v19, %v864_v22  ;;  %v852_v29 = vld [vmem:[#allocation5 + $0xb80] sm:$0xff]  ;;  %v6766_v32 = vcombine.low %v860_v19, %v864_v22  ;;  %v6497_v3 = vcombine.high %v589_v54, %v593_v55 }
 0x109   : > { %v856_v31 = vld [vmem:[#allocation5 + $0xba0] sm:$0xff] }
 0x10a   : > { %2977 = vmatpush1.bf16.msra.mxu0 %v6670_v61  ;;  %3059 = vmatpush1.bf16.msra.mxu1 %v6432_v62  ;;  %v6759_v35 = vcombine.high %v852_v29, %v856_v31  ;;  %v844_v38 = vld [vmem:[#allocation5 + $0xb40] sm:$0xff]  ;;  %v6758_v42 = vcombine.low %v852_v29, %v856_v31  ;;  %v6504_v61 = vcombine.low %v597_v46, %v601_v47  ;;  %v474_v31 = vld [vmem:[%s8360_s27 + $0x58] sm:$0xff] }
 0x10b   : > { %2978 = vmatprep.subr.bf16.mxu0 %v6663_v63  ;;  %3060 = vmatprep.subr.bf16.mxu1 %v6425_v4  ;;  %v848_v40 = vld [vmem:[#allocation5 + $0xb60] sm:$0xff]  ;;  %v581_v63 = vld [vmem:[#allocation5 + $0x308] sm:$0xff] }
 0x10c   : > { %v6751_v45 = vcombine.high %v844_v38, %v848_v40  ;;  %v836_v48 = vld [vmem:[#allocation5 + $0xb00] sm:$0xff]  ;;  %v6750_v51 = vcombine.low %v844_v38, %v848_v40  ;;  %v6489_v11 = vcombine.high %v581_v63, %v585_v1  ;;  %v553_v38 = vld [vmem:[#allocation5 + $0x228] sm:$0xff] }
 0x10d   : > { %v840_v50 = vld [vmem:[#allocation5 + $0xb20] sm:$0xff] }
 0x10e   : > { %2979 = vmatpush1.bf16.msra.mxu0 %v6662_v6  ;;  %3061 = vmatpush1.bf16.msra.mxu1 %v6424_v7  ;;  %v6743_v53 = vcombine.high %v836_v48, %v840_v50  ;;  %v828_v56 = vld [vmem:[#allocation5 + $0xac0] sm:$0xff]  ;;  %v6742_v60 = vcombine.low %v836_v48, %v840_v50  ;;  %v6496_v6 = vcombine.low %v589_v54, %v593_v55  ;;  %v797_v48 = vld [vmem:[#allocation5 + $0x9c8] sm:$0xff] }
 0x10f   : > { %2980 = vmatprep.subr.bf16.mxu0 %v6655_v8  ;;  %3062 = vmatprep.subr.bf16.mxu1 %v6417_v12  ;;  %v832_v58 = vld [vmem:[#allocation5 + $0xae0] sm:$0xff]  ;;  %v573_v8 = vld [vmem:[#allocation5 + $0x2c8] sm:$0xff]  ;;  %v6457_v50 = vcombine.high %v549_v37, %v553_v38  ;;  %v6456_v54 = vcombine.low %v549_v37, %v553_v38 }
 0x110   : > { %v6735_v62 = vcombine.high %v828_v56, %v832_v58  ;;  %v820_v2 = vld [vmem:[#allocation5 + $0xa80] sm:$0xff]  ;;  %v6734_v5 = vcombine.low %v828_v56, %v832_v58  ;;  %v6481_v19 = vcombine.high %v573_v8, %v577_v9  ;;  %v789_v56 = vld [vmem:[#allocation5 + $0x988] sm:$0xff] }
 0x111   : > { %v824_v4 = vld [vmem:[#allocation5 + $0xaa0] sm:$0xff]  ;;  %v645_v58 = vld [vmem:[#allocation5 + $0x508] sm:$0xff] }
 0x112   : > { %2981 = vmatpush1.bf16.msra.mxu0 %v6654_v14  ;;  %3063 = vmatpush1.bf16.msra.mxu1 %v6416_v15  ;;  %v6727_v7 = vcombine.high %v820_v2, %v824_v4  ;;  %v812_v10 = vld [vmem:[#allocation5 + $0xa40] sm:$0xff]  ;;  %v6726_v13 = vcombine.low %v820_v2, %v824_v4  ;;  %v6488_v14 = vcombine.low %v581_v63, %v585_v1  ;;  %v781_v2 = vld [vmem:[#allocation5 + $0x948] sm:$0xff] }
 0x113   : > { %2982 = vmatprep.subr.bf16.mxu0 %v6647_v16  ;;  %3064 = vmatprep.subr.bf16.mxu1 %v6409_v20  ;;  %v816_v12 = vld [vmem:[#allocation5 + $0xa60] sm:$0xff]  ;;  %v565_v16 = vld [vmem:[#allocation5 + $0x288] sm:$0xff] }
 0x114   : > { %v6719_v15 = vcombine.high %v812_v10, %v816_v12  ;;  %v804_v18 = vld [vmem:[#allocation5 + $0xa00] sm:$0xff]  ;;  %v6718_v22 = vcombine.low %v812_v10, %v816_v12  ;;  %v6473_v29 = vcombine.high %v565_v16, %v569_v17  ;;  %v637_v4 = vld [vmem:[#allocation5 + $0x4c8] sm:$0xff] }
 0x115   : > { %v808_v20 = vld [vmem:[#allocation5 + $0xa20] sm:$0xff]  ;;  %v773_v10 = vld [vmem:[#allocation5 + $0x908] sm:$0xff] }
 0x116   : > { %2983 = vmatpush1.bf16.msra.mxu0 %v6646_v23  ;;  %3065 = vmatpush1.bf16.msra.mxu1 %v6408_v25  ;;  %v6480_v23 = vcombine.low %v573_v8, %v577_v9  ;;  %v6711_v25 = vcombine.high %v804_v18, %v808_v20  ;;  %v629_v12 = vld [vmem:[#allocation5 + $0x488] sm:$0xff] }
 0x117   : > { %2984 = vmatprep.subr.bf16.mxu0 %v6767_v26  ;;  %3066 = vmatprep.subr.bf16.mxu1 %v6401_v30  ;;  %v557_v26 = vld [vmem:[#allocation5 + $0x248] sm:$0xff]  ;;  %v467_v30 = vld [vmem:[%s8360_s27 + $0x20] sm:$0xff] }
 0x118   : > { %v6465_v40 = vcombine.high %v557_v26, %v561_v27  ;;  %v6464_v46 = vcombine.low %v557_v26, %v561_v27  ;;  %v749_v37 = vld [vmem:[#allocation5 + $0x848] sm:$0xff] }
 0x119   : > { %v753_v38 = vld [vmem:[#allocation5 + $0x868] sm:$0xff] }
 0x11a   : > { %2985 = vmatpush2.bf16.msra.mxu0 %v6766_v32  ;;  %3067 = vmatpush1.bf16.msra.mxu1 %v6400_v34  ;;  %v673_v32 = vld [vmem:[#allocation5 + $0x5e8] sm:$0xff]  ;;  %v6710_v34 = vcombine.low %v804_v18, %v808_v20 }
 0x11b   : > { %2986 = vmatprep.subr.bf16.mxu0 %v6759_v35  ;;  %3068 = vmatprep.subr.bf16.mxu1 %v6393_v39  ;;  %v6472_v35 = vcombine.low %v565_v16, %v569_v17  ;;  %v6577_v36 = vcombine.high %v669_v28, %v673_v32  ;;  %v661_v39 = vld [vmem:[#allocation5 + $0x588] sm:$0xff] }
 0x11c   : > { %v765_v18 = vld [vmem:[#allocation5 + $0x8c8] sm:$0xff] }
 0x11d   : > { %v621_v20 = vld [vmem:[#allocation5 + $0x448] sm:$0xff] }
 0x11e   : > { %2987 = vmatpush2.bf16.msra.mxu0 %v6758_v42  ;;  %3069 = vmatpush1.bf16.msra.mxu1 %v6392_v43  ;;  %v665_v42 = vld [vmem:[#allocation5 + $0x5a8] sm:$0xff]  ;;  %v8417_v43 = vpack.c.bf16 %v474_v31, %v467_v30 }
 0x11f   : > { %2988 = vmatprep.subr.bf16.mxu0 %v6751_v45  ;;  %3070 = vmatprep.subr.bf16.mxu1 %v6513_v49  ;;  %v6576_v45 = vcombine.low %v669_v28, %v673_v32  ;;  %v6569_v47 = vcombine.high %v661_v39, %v665_v42  ;;  %v801_v49 = vld [vmem:[#allocation5 + $0x9e8] sm:$0xff] }
 0x120   : > { %v6704_v63 = vcombine.low %v797_v48, %v801_v49  ;;  %v757_v28 = vld [vmem:[#allocation5 + $0x888] sm:$0xff] }
 0x121   : > { %v613_v31 = vld [vmem:[#allocation5 + $0x408] sm:$0xff] }
 0x122   : > { %2989 = vmatpush2.bf16.msra.mxu0 %v6750_v51  ;;  %3071 = vmatpush2.bf16.msra.mxu1 %v6512_v52  ;;  %v653_v51 = vld [vmem:[#allocation5 + $0x548] sm:$0xff] }
 0x123   : > { %2990 = vmatprep.subr.bf16.mxu0 %v6743_v53  ;;  %3072 = vmatprep.subr.bf16.mxu1 %v6505_v57  ;;  %v657_v52 = vld [vmem:[#allocation5 + $0x568] sm:$0xff]  ;;  %v6568_v53 = vcombine.low %v661_v39, %v665_v42 }
 0x124   : > { %v6561_v55 = vcombine.high %v653_v51, %v657_v52  ;;  %v793_v57 = vld [vmem:[#allocation5 + $0x9a8] sm:$0xff] }
 0x125   : > { %v6696_v8 = vcombine.low %v789_v56, %v793_v57  ;;  %v617_v32 = vld [vmem:[#allocation5 + $0x428] sm:$0xff] }
 0x126   : > { %2991 = vmatpush2.bf16.msra.mxu0 %v6742_v60  ;;  %3073 = vmatpush2.bf16.msra.mxu1 %v6504_v61  ;;  %v6705_v60 = vcombine.high %v797_v48, %v801_v49  ;;  %v649_v61 = vld [vmem:[#allocation5 + $0x528] sm:$0xff] }
 0x127   : > { %2992 = vmatprep.subr.bf16.mxu0 %v6735_v62  ;;  %3074 = vmatprep.subr.bf16.mxu1 %v6497_v3  ;;  %v6560_v62 = vcombine.low %v653_v51, %v657_v52  ;;  %v6553_v1 = vcombine.high %v645_v58, %v649_v61  ;;  %v785_v3 = vld [vmem:[#allocation5 + $0x968] sm:$0xff] }
 0x128   : > { %v6688_v16 = vcombine.low %v781_v2, %v785_v3  ;;  %v737_v42 = vld [vmem:[#allocation5 + $0x7e8] sm:$0xff] }
 0x129   : > { %v741_v48 = vld [vmem:[#allocation5 + $0x808] sm:$0xff] }
 0x12a   : > { %2993 = vmatpush2.bf16.msra.mxu0 %v6734_v5  ;;  %3075 = vmatpush2.bf16.msra.mxu1 %v6496_v6  ;;  %v641_v5 = vld [vmem:[#allocation5 + $0x4e8] sm:$0xff]  ;;  %v6697_v6 = vcombine.high %v789_v56, %v793_v57 }
 0x12b   : > { %2994 = vmatprep.subr.bf16.mxu0 %v6727_v7  ;;  %3076 = vmatprep.subr.bf16.mxu1 %v6489_v11  ;;  %v6552_v7 = vcombine.low %v645_v58, %v649_v61  ;;  %v6545_v9 = vcombine.high %v637_v4, %v641_v5  ;;  %v777_v11 = vld [vmem:[#allocation5 + $0x928] sm:$0xff] }
 0x12c   : > { %v6680_v26 = vcombine.low %v773_v10, %v777_v11  ;;  %v745_v49 = vld [vmem:[#allocation5 + $0x828] sm:$0xff] }
 0x12d   : > { %v725_v51 = vld [vmem:[#allocation5 + $0x788] sm:$0xff]  ;;  %v6649_v58 = vcombine.high %v741_v48, %v745_v49 }
 0x12e   : > { %2995 = vmatpush2.bf16.msra.mxu0 %v6726_v13  ;;  %3077 = vmatpush2.bf16.msra.mxu1 %v6488_v14  ;;  %v633_v13 = vld [vmem:[#allocation5 + $0x4a8] sm:$0xff]  ;;  %v6689_v14 = vcombine.high %v781_v2, %v785_v3 }
 0x12f   : > { %2996 = vmatprep.subr.bf16.mxu0 %v6719_v15  ;;  %3078 = vmatprep.subr.bf16.mxu1 %v6481_v19  ;;  %v6544_v15 = vcombine.low %v637_v4, %v641_v5  ;;  %v6537_v17 = vcombine.high %v629_v12, %v633_v13  ;;  %v769_v19 = vld [vmem:[#allocation5 + $0x8e8] sm:$0xff] }
 0x130   : > { %v6673_v30 = vcombine.high %v765_v18, %v769_v19  ;;  %v729_v52 = vld [vmem:[#allocation5 + $0x7a8] sm:$0xff] }
 0x131   : > { %v861_v56 = vld [vmem:[#allocation5 + $0xbc8] sm:$0xff] }
 0x132   : > { %2997 = vmatpush2.bf16.msra.mxu0 %v6718_v22  ;;  %3079 = vmatpush2.bf16.msra.mxu1 %v6480_v23  ;;  %v625_v22 = vld [vmem:[#allocation5 + $0x468] sm:$0xff]  ;;  %v6681_v23 = vcombine.high %v773_v10, %v777_v11 }
 0x133   : > { %2998 = vmatprep.subr.bf16.mxu0 %v6711_v25  ;;  %3080 = vmatprep.subr.bf16.mxu1 %v6473_v29  ;;  %v6536_v25 = vcombine.low %v629_v12, %v633_v13  ;;  %v6529_v27 = vcombine.high %v621_v20, %v625_v22  ;;  %v761_v29 = vld [vmem:[#allocation5 + $0x8a8] sm:$0xff] }
 0x134   : > { %v6665_v39 = vcombine.high %v757_v28, %v761_v29  ;;  %v865_v57 = vld [vmem:[#allocation5 + $0xbe8] sm:$0xff] }
 0x135   : > { %v721_v61 = vld [vmem:[#allocation5 + $0x768] sm:$0xff]  ;;  %v6769_v4 = vcombine.high %v861_v56, %v865_v57 }
 0x136   : > { %2999 = vmatpush2.bf16.msra.mxu0 %v6710_v34  ;;  %3081 = vmatpush2.bf16.msra.mxu1 %v6472_v35  ;;  %v6528_v34 = vcombine.low %v621_v20, %v625_v22  ;;  %v6672_v35 = vcombine.low %v765_v18, %v769_v19  ;;  %v853_v2 = vld [vmem:[#allocation5 + $0xb88] sm:$0xff] }
 0x137   : > { %3097 = vmatprep.subr.bf16.mxu0 %v6577_v36  ;;  %3082 = vmatprep.subr.bf16.mxu1 %v6465_v40  ;;  %v6521_v36 = vcombine.high %v613_v31, %v617_v32  ;;  %v733_v40 = vld [vmem:[#allocation5 + $0x7c8] sm:$0xff] }
 0x138   : > { %v857_v3 = vld [vmem:[#allocation5 + $0xba8] sm:$0xff] }
 0x139   : > { %3001 = vmatmul.mubr.bf16.vlgmr.msra.gmra.mxu0 %v8417_v43  ;;  %v709_v5 = vld [vmem:[#allocation5 + $0x708] sm:$0xff]  ;;  %v6761_v12 = vcombine.high %v853_v2, %v857_v3 }
 0x13a   : > { %3098 = vmatpush1.bf16.msra.mxu0 %v6576_v45  ;;  %3129 = vmatprep.mubr.bf16.mxu0 %v8388_v0  ;;  %v6520_v45 = vcombine.low %v613_v31, %v617_v32  ;;  %v845_v10 = vld [vmem:[#allocation5 + $0xb48] sm:$0xff] }
 0x13b   : > { %3083 = vmatpush2.bf16.msra.mxu1 %v6464_v46  ;;  %3099 = vmatprep.subr.bf16.mxu0 %v6569_v47  ;;  %v6664_v46 = vcombine.low %v757_v28, %v761_v29  ;;  %v6641_v47 = vcombine.high %v733_v40, %v737_v42  ;;  %v849_v11 = vld [vmem:[#allocation5 + $0xb68] sm:$0xff] }
 0x13c   : > { %3084 = vmatprep.subr.bf16.mxu1 %v6457_v50  ;;  %v6657_v50 = vcombine.high %v749_v37, %v753_v38  ;;  %v701_v13 = vld [vmem:[#allocation5 + $0x6c8] sm:$0xff]  ;;  %v6753_v20 = vcombine.high %v845_v10, %v849_v11 }
 0x13d   : > { %v837_v18 = vld [vmem:[#allocation5 + $0xb08] sm:$0xff] }
 0x13e   : > { %3100 = vmatpush1.bf16.msra.mxu0 %v6568_v53  ;;  %v6640_v53 = vcombine.low %v733_v40, %v737_v42  ;;  %v841_v19 = vld [vmem:[#allocation5 + $0xb28] sm:$0xff] }
 0x13f   : > { %3085 = vmatpush2.bf16.msra.mxu1 %v6456_v54  ;;  %3101 = vmatprep.subr.bf16.mxu0 %v6561_v55  ;;  %v6656_v54 = vcombine.low %v749_v37, %v753_v38  ;;  %v6633_v55 = vcombine.high %v725_v51, %v729_v52  ;;  %v693_v22 = vld [vmem:[#allocation5 + $0x688] sm:$0xff] }
 0x140   : > { %3140 = vmatprep.subr.bf16.mxu1 %v6705_v60  ;;  %v717_v60 = vld [vmem:[#allocation5 + $0x748] sm:$0xff] }
 0x141   : > { %v829_v28 = vld [vmem:[#allocation5 + $0xac8] sm:$0xff] }
 0x142   : > { %3087 = vmatmul.mubr.bf16.vlgmr.msra.gmra.mxu1 %v8396_v21  ;;  %3102 = vmatpush1.bf16.msra.mxu0 %v6560_v62  ;;  %v6632_v62 = vcombine.low %v725_v51, %v729_v52  ;;  %v833_v29 = vld [vmem:[#allocation5 + $0xae8] sm:$0xff] }
 0x143   : > { %3141 = vmatpush1.bf16.msra.mxu1 %v6704_v63  ;;  %3103 = vmatprep.subr.bf16.mxu0 %v6553_v1  ;;  %v6648_v63 = vcombine.low %v741_v48, %v745_v49  ;;  %v6625_v1 = vcombine.high %v717_v60, %v721_v61  ;;  %v685_v31 = vld [vmem:[#allocation5 + $0x648] sm:$0xff] }
 0x144   : > { %3142 = vmatprep.subr.bf16.mxu1 %v6697_v6  ;;  %3172 = vmatprep.mubr.bf16.mxu1 %v8403_v33  ;;  %v713_v6 = vld [vmem:[#allocation5 + $0x728] sm:$0xff] }
 0x145   : > { %v689_v32 = vld [vmem:[#allocation5 + $0x668] sm:$0xff] }
 0x146   : > { %3104 = vmatpush1.bf16.msra.mxu0 %v6552_v7  ;;  %v6624_v7 = vcombine.low %v717_v60, %v721_v61  ;;  %v821_v37 = vld [vmem:[#allocation5 + $0xa88] sm:$0xff]  ;;  %v542_v60 = vld [vmem:[#allocation5 + $0x1d0] sm:$0xff] }
 0x147   : > { %3143 = vmatpush1.bf16.msra.mxu1 %v6696_v8  ;;  %3105 = vmatprep.subr.bf16.mxu0 %v6545_v9  ;;  %v6768_v8 = vcombine.low %v861_v56, %v865_v57  ;;  %v6617_v9 = vcombine.high %v709_v5, %v713_v6  ;;  %v825_v38 = vld [vmem:[#allocation5 + $0xaa8] sm:$0xff]  ;;  %v546_v61 = vld [vmem:[#allocation5 + $0x1f0] sm:$0xff] }
 0x148   : > { %3144 = vmatprep.subr.bf16.mxu1 %v6689_v14  ;;  %v705_v14 = vld [vmem:[#allocation5 + $0x6e8] sm:$0xff] }
 0x149   : > { %v677_v40 = vld [vmem:[#allocation5 + $0x608] sm:$0xff] }
 0x14a   : > { %3106 = vmatpush1.bf16.msra.mxu0 %v6544_v15  ;;  %v6616_v15 = vcombine.low %v709_v5, %v713_v6  ;;  %v681_v42 = vld [vmem:[#allocation5 + $0x628] sm:$0xff]  ;;  %v534_v6 = vld [vmem:[#allocation5 + $0x190] sm:$0xff] }
 0x14b   : > { %3145 = vmatpush1.bf16.msra.mxu1 %v6688_v16  ;;  %3107 = vmatprep.subr.bf16.mxu0 %v6537_v17  ;;  %v6760_v16 = vcombine.low %v853_v2, %v857_v3  ;;  %v6609_v17 = vcombine.high %v701_v13, %v705_v14  ;;  %v813_v48 = vld [vmem:[#allocation5 + $0xa48] sm:$0xff]  ;;  %v670_v3 = vld [vmem:[#allocation5 + $0x5d0] sm:$0xff] }
 0x14c   : > { %3146 = vmatprep.subr.bf16.mxu1 %v6681_v23  ;;  %v697_v23 = vld [vmem:[#allocation5 + $0x6a8] sm:$0xff] }
 0x14d   : > { %v817_v49 = vld [vmem:[#allocation5 + $0xa68] sm:$0xff] }
 0x14e   : > { %3108 = vmatpush1.bf16.msra.mxu0 %v6536_v25  ;;  %v6608_v25 = vcombine.low %v701_v13, %v705_v14  ;;  %v869_v51 = vld [vmem:[#allocation5 + $0xc08] sm:$0xff]  ;;  %v526_v14 = vld [vmem:[#allocation5 + $0x150] sm:$0xff] }
 0x14f   : > { %3147 = vmatpush1.bf16.msra.mxu1 %v6680_v26  ;;  %3109 = vmatprep.subr.bf16.mxu0 %v6529_v27  ;;  %v6752_v26 = vcombine.low %v845_v10, %v849_v11  ;;  %v6601_v27 = vcombine.high %v693_v22, %v697_v23  ;;  %v873_v52 = vld [vmem:[#allocation5 + $0xc28] sm:$0xff]  ;;  %v666_v10 = vld [vmem:[#allocation5 + $0x5b0] sm:$0xff]  ;;  %v6450_v11 = vcombine.low %v542_v60, %v546_v61 }
 0x150   : > { %3148 = vmatprep.subr.bf16.mxu1 %v6673_v30  ;;  %v6745_v30 = vcombine.high %v837_v18, %v841_v19  ;;  %v805_v56 = vld [vmem:[#allocation5 + $0xa08] sm:$0xff] }
 0x151   : > { %v809_v57 = vld [vmem:[#allocation5 + $0xa28] sm:$0xff] }
 0x152   : > { %3110 = vmatpush1.bf16.msra.mxu0 %v6528_v34  ;;  %v6600_v34 = vcombine.low %v693_v22, %v697_v23  ;;  %v6713_v2 = vcombine.high %v805_v56, %v809_v57  ;;  %v6712_v5 = vcombine.low %v805_v56, %v809_v57  ;;  %v518_v23 = vld [vmem:[#allocation5 + $0x110] sm:$0xff] }
 0x153   : > { %3149 = vmatpush1.bf16.msra.mxu1 %v6672_v35  ;;  %3111 = vmatprep.subr.bf16.mxu0 %v6521_v36  ;;  %v6744_v35 = vcombine.low %v837_v18, %v841_v19  ;;  %v6593_v36 = vcombine.high %v685_v31, %v689_v32  ;;  %v658_v18 = vld [vmem:[#allocation5 + $0x570] sm:$0xff] }
 0x154   : > { %3150 = vmatprep.subr.bf16.mxu1 %v6665_v39  ;;  %v6737_v39 = vcombine.high %v829_v28, %v833_v29  ;;  %v626_v56 = vld [vmem:[#allocation5 + $0x470] sm:$0xff] }
 0x156   : > { %3112 = vmatpush1.bf16.msra.mxu0 %v6520_v45  ;;  %v6592_v45 = vcombine.low %v685_v31, %v689_v32  ;;  %v510_v32 = vld [vmem:[#allocation5 + $0xd0] sm:$0xff] }
 0x157   : > { %3151 = vmatpush1.bf16.msra.mxu1 %v6664_v46  ;;  %3113 = vmatprep.subr.bf16.mxu0 %v6641_v47  ;;  %v6736_v46 = vcombine.low %v829_v28, %v833_v29  ;;  %v6585_v47 = vcombine.high %v677_v40, %v681_v42  ;;  %v650_v28 = vld [vmem:[#allocation5 + $0x530] sm:$0xff] }
 0x158   : > { %3152 = vmatprep.subr.bf16.mxu1 %v6657_v50  ;;  %v6729_v50 = vcombine.high %v821_v37, %v825_v38 }
 0x15a   : > { %3114 = vmatpush2.bf16.msra.mxu0 %v6640_v53  ;;  %v6584_v53 = vcombine.low %v677_v40, %v681_v42  ;;  %v502_v42 = vld [vmem:[#allocation5 + $0x90] sm:$0xff] }
 0x15b   : > { %3153 = vmatpush1.bf16.msra.mxu1 %v6656_v54  ;;  %3115 = vmatprep.subr.bf16.mxu0 %v6633_v55  ;;  %v6728_v54 = vcombine.low %v821_v37, %v825_v38  ;;  %v6777_v55 = vcombine.high %v869_v51, %v873_v52  ;;  %v642_v37 = vld [vmem:[#allocation5 + $0x4f0] sm:$0xff] }
 0x15c   : > { %3154 = vmatprep.subr.bf16.mxu1 %v6649_v58  ;;  %v6721_v58 = vcombine.high %v813_v48, %v817_v49 }
 0x15e   : > { %3116 = vmatpush2.bf16.msra.mxu0 %v6632_v62  ;;  %v6776_v62 = vcombine.low %v869_v51, %v873_v52  ;;  %v494_v52 = vld [vmem:[#allocation5 + $0x50] sm:$0xff] }
 0x15f   : > { %3155 = vmatpush1.bf16.msra.mxu1 %v6648_v63  ;;  %3117 = vmatprep.subr.bf16.mxu0 %v6625_v1  ;;  %v6720_v63 = vcombine.low %v813_v48, %v817_v49  ;;  %v6451_v1 = vcombine.high %v542_v60, %v546_v61  ;;  %v634_v48 = vld [vmem:[#allocation5 + $0x4b0] sm:$0xff] }
 0x160   : > { %3156 = vmatprep.subr.bf16.mxu1 %v6769_v4  ;;  %v674_v4 = vld [vmem:[#allocation5 + $0x5f0] sm:$0xff] }
 0x161   : > { %v486_v61 = vld [vmem:[#allocation5 + $0x10] sm:$0xff] }
 0x162   : > { %3118 = vmatpush2.bf16.msra.mxu0 %v6624_v7  ;;  %v538_v7 = vld [vmem:[#allocation5 + $0x1b0] sm:$0xff] }
 0x163   : > { %3157 = vmatpush2.bf16.msra.mxu1 %v6768_v8  ;;  %3119 = vmatprep.subr.bf16.mxu0 %v6617_v9  ;;  %v6579_v8 = vcombine.high %v670_v3, %v674_v4  ;;  %v662_v9 = vld [vmem:[#allocation5 + $0x590] sm:$0xff]  ;;  %v6443_v13 = vcombine.high %v534_v6, %v538_v7  ;;  %v6442_v19 = vcombine.low %v534_v6, %v538_v7 }
 0x164   : > { %3158 = vmatprep.subr.bf16.mxu1 %v6761_v12  ;;  %v6578_v12 = vcombine.low %v670_v3, %v674_v4  ;;  %v606_v6 = vld [vmem:[#allocation5 + $0x3d0] sm:$0xff] }
 0x165   : > { %v610_v7 = vld [vmem:[#allocation5 + $0x3f0] sm:$0xff] }
 0x166   : > { %3120 = vmatpush2.bf16.msra.mxu0 %v6616_v15  ;;  %v530_v15 = vld [vmem:[#allocation5 + $0x170] sm:$0xff] }
 0x167   : > { %3159 = vmatpush2.bf16.msra.mxu1 %v6760_v16  ;;  %3121 = vmatprep.subr.bf16.mxu0 %v6609_v17  ;;  %v6571_v16 = vcombine.high %v662_v9, %v666_v10  ;;  %v654_v17 = vld [vmem:[#allocation5 + $0x550] sm:$0xff]  ;;  %v6435_v22 = vcombine.high %v526_v14, %v530_v15  ;;  %v6434_v29 = vcombine.low %v526_v14, %v530_v15 }
 0x168   : > { %3160 = vmatprep.subr.bf16.mxu1 %v6753_v20  ;;  %v6570_v20 = vcombine.low %v662_v9, %v666_v10  ;;  %v734_v9 = vld [vmem:[#allocation5 + $0x7d0] sm:$0xff] }
 0x169   : > { %v738_v10 = vld [vmem:[#allocation5 + $0x7f0] sm:$0xff] }
 0x16a   : > { %3122 = vmatpush2.bf16.msra.mxu0 %v6608_v25  ;;  %v522_v25 = vld [vmem:[#allocation5 + $0x130] sm:$0xff]  ;;  %v6643_v14 = vcombine.high %v734_v9, %v738_v10 }
 0x16b   : > { %3161 = vmatpush2.bf16.msra.mxu1 %v6752_v26  ;;  %3123 = vmatprep.subr.bf16.mxu0 %v6601_v27  ;;  %v6563_v26 = vcombine.high %v654_v17, %v658_v18  ;;  %v646_v27 = vld [vmem:[#allocation5 + $0x510] sm:$0xff]  ;;  %v6427_v31 = vcombine.high %v518_v23, %v522_v25  ;;  %v6426_v38 = vcombine.low %v518_v23, %v522_v25 }
 0x16c   : > { %3162 = vmatprep.subr.bf16.mxu1 %v6745_v30  ;;  %v6562_v30 = vcombine.low %v654_v17, %v658_v18  ;;  %v598_v15 = vld [vmem:[#allocation5 + $0x390] sm:$0xff] }
 0x16d   : > { %v726_v17 = vld [vmem:[#allocation5 + $0x790] sm:$0xff] }
 0x16e   : > { %3124 = vmatpush2.bf16.msra.mxu0 %v6600_v34  ;;  %v514_v34 = vld [vmem:[#allocation5 + $0xf0] sm:$0xff] }
 0x16f   : > { %3163 = vmatpush2.bf16.msra.mxu1 %v6744_v35  ;;  %3125 = vmatprep.subr.bf16.mxu0 %v6593_v36  ;;  %v6555_v35 = vcombine.high %v646_v27, %v650_v28  ;;  %v638_v36 = vld [vmem:[#allocation5 + $0x4d0] sm:$0xff]  ;;  %v6419_v40 = vcombine.high %v510_v32, %v514_v34  ;;  %v6418_v49 = vcombine.low %v510_v32, %v514_v34 }
 0x170   : > { %3164 = vmatprep.subr.bf16.mxu1 %v6737_v39  ;;  %v6554_v39 = vcombine.low %v646_v27, %v650_v28  ;;  %v730_v18 = vld [vmem:[#allocation5 + $0x7b0] sm:$0xff] }
 0x171   : > { %v6635_v23 = vcombine.high %v726_v17, %v730_v18  ;;  %v590_v25 = vld [vmem:[#allocation5 + $0x350] sm:$0xff] }
 0x172   : > { %3126 = vmatpush2.bf16.msra.mxu0 %v6592_v45  ;;  %v506_v45 = vld [vmem:[#allocation5 + $0xb0] sm:$0xff] }
 0x173   : > { %3165 = vmatpush2.bf16.msra.mxu1 %v6736_v46  ;;  %3127 = vmatprep.subr.bf16.mxu0 %v6585_v47  ;;  %v6547_v46 = vcombine.high %v638_v36, %v642_v37  ;;  %v630_v47 = vld [vmem:[#allocation5 + $0x490] sm:$0xff]  ;;  %v6411_v51 = vcombine.high %v502_v42, %v506_v45  ;;  %v6410_v57 = vcombine.low %v502_v42, %v506_v45 }
 0x174   : > { %3166 = vmatprep.subr.bf16.mxu1 %v6729_v50  ;;  %v6546_v50 = vcombine.low %v638_v36, %v642_v37  ;;  %v718_v27 = vld [vmem:[#allocation5 + $0x750] sm:$0xff] }
 0x175   : > { %v722_v28 = vld [vmem:[#allocation5 + $0x770] sm:$0xff] }
 0x176   : > { %3128 = vmatpush2.bf16.msra.mxu0 %v6584_v53  ;;  %v498_v53 = vld [vmem:[#allocation5 + $0x70] sm:$0xff]  ;;  %v6627_v32 = vcombine.high %v718_v27, %v722_v28 }
 0x177   : > { %3167 = vmatpush2.bf16.msra.mxu1 %v6728_v54  ;;  %3197 = vmatprep.subr.bf16.mxu0 %v6777_v55  ;;  %v6539_v54 = vcombine.high %v630_v47, %v634_v48  ;;  %v622_v55 = vld [vmem:[#allocation5 + $0x450] sm:$0xff]  ;;  %v6403_v60 = vcombine.high %v494_v52, %v498_v53  ;;  %v6402_v3 = vcombine.low %v494_v52, %v498_v53 }
 0x178   : > { %3168 = vmatprep.subr.bf16.mxu1 %v6721_v58  ;;  %v6538_v58 = vcombine.low %v630_v47, %v634_v48  ;;  %v6530_v4 = vcombine.low %v622_v55, %v626_v56  ;;  %v582_v34 = vld [vmem:[#allocation5 + $0x310] sm:$0xff] }
 0x179   : > { %3130 = vmatmul.mubr.bf16.vlgmr.msra.gmra.mxu0 %v8398_v24  ;;  %v710_v36 = vld [vmem:[#allocation5 + $0x710] sm:$0xff] }
 0x17a   : > { %3198 = vmatpush1.bf16.msra.mxu0 %v6776_v62  ;;  %3215 = vmatprep.mubr.bf16.mxu0 %v8136_v41  ;;  %v490_v62 = vld [vmem:[#allocation5 + $0x30] sm:$0xff] }
 0x17b   : > { %3169 = vmatpush2.bf16.msra.mxu1 %v6720_v63  ;;  %3226 = vmatprep.subr.bf16.mxu0 %v6451_v1  ;;  %v6531_v63 = vcombine.high %v622_v55, %v626_v56  ;;  %v614_v1 = vld [vmem:[#allocation5 + $0x410] sm:$0xff] }
 0x17c   : > { %3170 = vmatprep.subr.bf16.mxu1 %v6713_v2  ;;  %v618_v2 = vld [vmem:[#allocation5 + $0x430] sm:$0xff] }
 0x17d   : > { %v714_v37 = vld [vmem:[#allocation5 + $0x730] sm:$0xff] }
 0x17e   : > { %v6619_v42 = vcombine.high %v710_v36, %v714_v37  ;;  %v574_v45 = vld [vmem:[#allocation5 + $0x2d0] sm:$0xff] }
 0x17f   : > { %3171 = vmatpush2.bf16.msra.mxu1 %v6712_v5  ;;  %v6395_v5 = vcombine.high %v486_v61, %v490_v62  ;;  %v702_v47 = vld [vmem:[#allocation5 + $0x6d0] sm:$0xff] }
 0x180   : > { %3269 = vmatprep.subr.bf16.mxu1 %v6579_v8  ;;  %v6523_v8 = vcombine.high %v614_v1, %v618_v2  ;;  %v706_v48 = vld [vmem:[#allocation5 + $0x6f0] sm:$0xff] }
 0x181   : > { %6783 = vmatmul.mubr.msk.bf16.vlgmr.msra.gmra.mxu0 %vm2878_vm0, %v8410_v44  ;;  %v6611_v53 = vcombine.high %v702_v47, %v706_v48  ;;  %v570_v55 = vld [vmem:[#allocation5 + $0x2b0] sm:$0xff] }
 0x182   : > { %3173 = vmatmul.mubr.bf16.vlgmr.msra.gmra.mxu1 %v8417_v43  ;;  %3227 = vmatpush1.bf16.msra.mxu0 %v6450_v11  ;;  %v6394_v11 = vcombine.low %v486_v61, %v490_v62  ;;  %v694_v56 = vld [vmem:[#allocation5 + $0x690] sm:$0xff]  ;;  %v6610_v61 = vcombine.low %v702_v47, %v706_v48 }
 0x183   : > { %3270 = vmatpush1.bf16.msra.mxu1 %v6578_v12  ;;  %3228 = vmatprep.subr.bf16.mxu0 %v6443_v13  ;;  %v6522_v12 = vcombine.low %v614_v1, %v618_v2  ;;  %v6515_v13 = vcombine.high %v606_v6, %v610_v7  ;;  %v558_v1 = vld [vmem:[#allocation5 + $0x250] sm:$0xff] }
 0x184   : > { %3271 = vmatprep.subr.bf16.mxu1 %v6571_v16  ;;  %3258 = vmatprep.mubr.bf16.mxu0 %v8384_v59  ;;  %v602_v16 = vld [vmem:[#allocation5 + $0x3b0] sm:$0xff] }
 0x185   : > { %3301 = vmatprep.mubr.bf16.mxu1 %v8388_v0  ;;  %v562_v2 = vld [vmem:[#allocation5 + $0x270] sm:$0xff] }
 0x186   : > { %3229 = vmatpush1.bf16.msra.mxu0 %v6442_v19  ;;  %v6514_v19 = vcombine.low %v606_v6, %v610_v7 }
 0x187   : > { %3272 = vmatpush1.bf16.msra.mxu1 %v6570_v20  ;;  %3230 = vmatprep.subr.bf16.mxu0 %v6435_v22  ;;  %v6642_v20 = vcombine.low %v734_v9, %v738_v10  ;;  %v6507_v22 = vcombine.high %v598_v15, %v602_v16  ;;  %v8435_v9 = vld [vmem:[#allocation7] sm:$0xff] }
 0x188   : > { %3273 = vmatprep.subr.bf16.mxu1 %v6563_v26  ;;  %v594_v26 = vld [vmem:[#allocation5 + $0x370] sm:$0xff] }
 0x18a   : > { %3231 = vmatpush1.bf16.msra.mxu0 %v6434_v29  ;;  %v6506_v29 = vcombine.low %v598_v15, %v602_v16  ;;  %v6466_v15 = vcombine.low %v558_v1, %v562_v2 }
 0x18b   : > { %3274 = vmatpush1.bf16.msra.mxu1 %v6562_v30  ;;  %3232 = vmatprep.subr.bf16.mxu0 %v6427_v31  ;;  %v6634_v30 = vcombine.low %v726_v17, %v730_v18  ;;  %v6499_v31 = vcombine.high %v590_v25, %v594_v26 }
 0x18c   : > { %3275 = vmatprep.subr.bf16.mxu1 %v6555_v35  ;;  %v586_v35 = vld [vmem:[#allocation5 + $0x330] sm:$0xff] }
 0x18e   : > { %3233 = vmatpush1.bf16.msra.mxu0 %v6426_v38  ;;  %v6498_v38 = vcombine.low %v590_v25, %v594_v26  ;;  %v870_v25 = vld [vmem:[#allocation5 + $0xc10] sm:$0xff] }
 0x18f   : > { %3276 = vmatpush1.bf16.msra.mxu1 %v6554_v39  ;;  %3234 = vmatprep.subr.bf16.mxu0 %v6419_v40  ;;  %v6626_v39 = vcombine.low %v718_v27, %v722_v28  ;;  %v6491_v40 = vcombine.high %v582_v34, %v586_v35  ;;  %v874_v26 = vld [vmem:[#allocation5 + $0xc30] sm:$0xff] }
 0x190   : > { %3277 = vmatprep.subr.bf16.mxu1 %v6547_v46  ;;  %v578_v46 = vld [vmem:[#allocation5 + $0x2f0] sm:$0xff]  ;;  %v6778_v48 = vcombine.low %v870_v25, %v874_v26 }
 0x191   : > { %v6483_v52 = vcombine.high %v574_v45, %v578_v46 }
 0x192   : > { %3235 = vmatpush1.bf16.msra.mxu0 %v6418_v49  ;;  %v6490_v49 = vcombine.low %v582_v34, %v586_v35 }
 0x193   : > { %3278 = vmatpush1.bf16.msra.mxu1 %v6546_v50  ;;  %3236 = vmatprep.subr.bf16.mxu0 %v6411_v51  ;;  %v878_v50 = vlaneseq  ;;  %v6618_v51 = vcombine.low %v710_v36, %v714_v37  ;;  %v6779_v36 = vcombine.high %v870_v25, %v874_v26  ;;  %v790_v37 = vld [vmem:[#allocation5 + $0x990] sm:$0xff]  ;;  %v511_v25 = vld [vmem:[#allocation5 + $0xd8] sm:$0xff] }
 0x194   : > { %3279 = vmatprep.subr.bf16.mxu1 %v6539_v54  ;;  %v566_v54 = vld [vmem:[#allocation5 + $0x290] sm:$0xff]  ;;  %v515_v26 = vld [vmem:[#allocation5 + $0xf8] sm:$0xff] }
 0x195   : > { %v6475_v62 = vcombine.high %v566_v54, %v570_v55 }
 0x196   : > { %3237 = vmatpush1.bf16.msra.mxu0 %v6410_v57  ;;  %v698_v57 = vld [vmem:[#allocation5 + $0x6b0] sm:$0xff] }
 0x197   : > { %3280 = vmatpush1.bf16.msra.mxu1 %v6538_v58  ;;  %3238 = vmatprep.subr.bf16.mxu0 %v6403_v60  ;;  %v6482_v58 = vcombine.low %v574_v45, %v578_v46  ;;  %v8430_v60 = vshrl.u32 %v878_v50, 7  ;;  %v6602_v7 = vcombine.low %v694_v56, %v698_v57 }
 0x198   : > { %3281 = vmatprep.subr.bf16.mxu1 %v6531_v63  ;;  %v6603_v63 = vcombine.high %v694_v56, %v698_v57  ;;  %v774_v56 = vld [vmem:[#allocation5 + $0x910] sm:$0xff] }
 0x199   : > { %v8433_v6 = vsub.s32 0, %v8430_v60  ;;  %v778_v57 = vld [vmem:[#allocation5 + $0x930] sm:$0xff] }
 0x19a   : > { %3239 = vmatpush1.bf16.msra.mxu0 %v6402_v3  ;;  %v686_v3 = vld [vmem:[#allocation5 + $0x650] sm:$0xff] }
 0x19b   : > { %3282 = vmatpush1.bf16.msra.mxu1 %v6530_v4  ;;  %3240 = vmatprep.subr.bf16.mxu0 %v6395_v5  ;;  %v690_v4 = vld [vmem:[#allocation5 + $0x670] sm:$0xff]  ;;  %v6474_v5 = vcombine.low %v566_v54, %v570_v55  ;;  %v881_v16 = vrot.slane %v8435_v9, %v8433_v6 }
 0x19c   : > { %3283 = vmatprep.subr.bf16.mxu1 %v6523_v8  ;;  %v6467_v8 = vcombine.high %v558_v1, %v562_v2  ;;  %v6595_v10 = vcombine.high %v686_v3, %v690_v4  ;;  %v6594_v17 = vcombine.low %v686_v3, %v690_v4  ;;  %v6683_v1 = vcombine.high %v774_v56, %v778_v57  ;;  %v766_v3 = vld [vmem:[#allocation5 + $0x8d0] sm:$0xff] }
 0x19d   : > { %v770_v4 = vld [vmem:[#allocation5 + $0x8f0] sm:$0xff] }
 0x19e   : > { %3241 = vmatpush1.bf16.msra.mxu0 %v6394_v11  ;;  %v550_v11 = vld [vmem:[#allocation5 + $0x210] sm:$0xff] }
 0x19f   : > { %3284 = vmatpush1.bf16.msra.mxu1 %v6522_v12  ;;  %3242 = vmatprep.subr.bf16.mxu0 %v6515_v13  ;;  %v554_v12 = vld [vmem:[#allocation5 + $0x230] sm:$0xff] }
 0x1a0   : > { %3285 = vmatprep.subr.bf16.mxu1 %v6643_v14  ;;  %v678_v13 = vld [vmem:[#allocation5 + $0x610] sm:$0xff]  ;;  %v6459_v18 = vcombine.high %v550_v11, %v554_v12 }
 0x1a1   : > { %v682_v14 = vld [vmem:[#allocation5 + $0x630] sm:$0xff] }
 0x1a2   : > { %3243 = vmatpush2.bf16.msra.mxu0 %v6514_v19  ;;  %v6587_v19 = vcombine.high %v678_v13, %v682_v14 }
 0x1a3   : > { %3286 = vmatpush2.bf16.msra.mxu1 %v6642_v20  ;;  %3244 = vmatprep.subr.bf16.mxu0 %v6507_v22  ;;  %v798_v20 = vld [vmem:[#allocation5 + $0x9d0] sm:$0xff] }
 0x1a4   : > { %3287 = vmatprep.subr.bf16.mxu1 %v6635_v23  ;;  %v802_v22 = vld [vmem:[#allocation5 + $0x9f0] sm:$0xff] }
 0x1a5   : > { %v6706_v46 = vcombine.low %v798_v20, %v802_v22 }
 0x1a6   : > { %3245 = vmatpush2.bf16.msra.mxu0 %v6506_v29  ;;  %v6458_v29 = vcombine.low %v550_v11, %v554_v12  ;;  %v6675_v11 = vcombine.high %v766_v3, %v770_v4 }
 0x1a7   : > { %3288 = vmatpush2.bf16.msra.mxu1 %v6634_v30  ;;  %3246 = vmatprep.subr.bf16.mxu0 %v6499_v31  ;;  %v6586_v31 = vcombine.low %v678_v13, %v682_v14  ;;  %v758_v13 = vld [vmem:[#allocation5 + $0x890] sm:$0xff] }
 0x1a8   : > { %3289 = vmatprep.subr.bf16.mxu1 %v6627_v32  ;;  %v6707_v32 = vcombine.high %v798_v20, %v802_v22  ;;  %v762_v14 = vld [vmem:[#allocation5 + $0x8b0] sm:$0xff] }
 0x1a9   : > { %v750_v22 = vld [vmem:[#allocation5 + $0x850] sm:$0xff] }
 0x1aa   : > { %3247 = vmatpush2.bf16.msra.mxu0 %v6498_v38  ;;  %v794_v38 = vld [vmem:[#allocation5 + $0x9b0] sm:$0xff] }
 0x1ab   : > { %3290 = vmatpush2.bf16.msra.mxu1 %v6626_v39  ;;  %3248 = vmatprep.subr.bf16.mxu0 %v6491_v40  ;;  %v543_v40 = vld [vmem:[#allocation5 + $0x1d8] sm:$0xff]  ;;  %v6698_v54 = vcombine.low %v790_v37, %v794_v38 }
 0x1ac   : > { %3291 = vmatprep.subr.bf16.mxu1 %v6619_v42  ;;  %v547_v42 = vld [vmem:[#allocation5 + $0x1f8] sm:$0xff] }
 0x1ae   : > { %3249 = vmatpush2.bf16.msra.mxu0 %v6490_v49  ;;  %v6699_v49 = vcombine.high %v790_v37, %v794_v38  ;;  %v507_v37 = vld [vmem:[#allocation5 + $0xb8] sm:$0xff] }
 0x1af   : > { %3292 = vmatpush2.bf16.msra.mxu1 %v6618_v51  ;;  %3250 = vmatprep.subr.bf16.mxu0 %v6483_v52  ;;  %v6453_v51 = vcombine.high %v543_v40, %v547_v42  ;;  %v782_v52 = vld [vmem:[#allocation5 + $0x950] sm:$0xff] }
 0x1b0   : > { %3293 = vmatprep.subr.bf16.mxu1 %v6611_v53  ;;  %v786_v53 = vld [vmem:[#allocation5 + $0x970] sm:$0xff] }
 0x1b1   : > { %v6691_v55 = vcombine.high %v782_v52, %v786_v53 }
 0x1b2   : > { %3251 = vmatpush2.bf16.msra.mxu0 %v6482_v58  ;;  %v535_v58 = vld [vmem:[#allocation5 + $0x198] sm:$0xff] }
 0x1b3   : > { %3294 = vmatpush2.bf16.msra.mxu1 %v6610_v61  ;;  %3252 = vmatprep.subr.bf16.mxu0 %v6475_v62  ;;  %v539_v61 = vld [vmem:[#allocation5 + $0x1b8] sm:$0xff]  ;;  %v6690_v62 = vcombine.low %v782_v52, %v786_v53 }
 0x1b4   : > { %3295 = vmatprep.subr.bf16.mxu1 %v6603_v63  ;;  %v6452_v63 = vcombine.low %v543_v40, %v547_v42  ;;  %v6445_v2 = vcombine.high %v535_v58, %v539_v61 }
 0x1b6   : > { %3253 = vmatpush2.bf16.msra.mxu0 %v6474_v5  ;;  %v527_v5 = vld [vmem:[#allocation5 + $0x158] sm:$0xff] }
 0x1b7   : > { %3296 = vmatpush2.bf16.msra.mxu1 %v6602_v7  ;;  %3254 = vmatprep.subr.bf16.mxu0 %v6467_v8  ;;  %v531_v7 = vld [vmem:[#allocation5 + $0x178] sm:$0xff]  ;;  %v6682_v8 = vcombine.low %v774_v56, %v778_v57 }
 0x1b8   : > { %3297 = vmatprep.subr.bf16.mxu1 %v6595_v10  ;;  %v6444_v10 = vcombine.low %v535_v58, %v539_v61  ;;  %v6437_v12 = vcombine.high %v527_v5, %v531_v7  ;;  %v487_v56 = vld [vmem:[#allocation5 + $0x18] sm:$0xff] }
 0x1b9   : > { %v2916_v23 = vpop.f32.mrf.mxu0  ;;  %v2959_v28 = vpop.f32.mrf.mxu1  ;;  %v491_v57 = vld [vmem:[#allocation5 + $0x38] sm:$0xff] }
 0x1ba   : > { %v2917_v27 = vadd.f32 %v2916_v23, %v881_v16  ;;  %3255 = vmatpush2.bf16.msra.mxu0 %v6466_v15  ;;  %v519_v15 = vld [vmem:[#allocation5 + $0x118] sm:$0xff]  ;;  %v754_v23 = vld [vmem:[#allocation5 + $0x870] sm:$0xff] }
 0x1bb   : > { %3298 = vmatpush2.bf16.msra.mxu1 %v6594_v17  ;;  %v8439_v30 = vpop.f32.mrf.mxu0  ;;  %3256 = vmatprep.subr.bf16.mxu0 %v6459_v18  ;;  %v8443_v35 = vpop.f32.mrf.mxu1  ;;  %v6674_v17 = vcombine.low %v766_v3, %v770_v4  ;;  %v6436_v18 = vcombine.low %v527_v5, %v531_v7  ;;  %v6658_v38 = vcombine.low %v750_v22, %v754_v23  ;;  %v607_v3 = vld [vmem:[#allocation5 + $0x3d8] sm:$0xff] }
 0x1bc   : > { %v8441_v34 = vadd.f32 %v2959_v28, %v2917_v27  ;;  %3299 = vmatprep.subr.bf16.mxu1 %v6587_v19  ;;  %v6667_v19 = vcombine.high %v758_v13, %v762_v14  ;;  %v6666_v27 = vcombine.low %v758_v13, %v762_v14  ;;  %v611_v4 = vld [vmem:[#allocation5 + $0x3f8] sm:$0xff]  ;;  %v6396_v7 = vcombine.low %v487_v56, %v491_v57 }
 0x1bd   : > { %v2920_v39 = vpop.f32.mrf.mxu0  ;;  %v2963_v47 = vpop.f32.mrf.mxu1  ;;  %v599_v13 = vld [vmem:[#allocation5 + $0x398] sm:$0xff] }
 0x1be   : > { %v2921_v45 = vadd.f32 %v2920_v39, %v881_v16  ;;  %3257 = vmatpush2.bf16.msra.mxu0 %v6458_v29  ;;  %v523_v16 = vld [vmem:[#allocation5 + $0x138] sm:$0xff]  ;;  %v6421_v29 = vcombine.high %v511_v25, %v515_v26  ;;  %v6420_v39 = vcombine.low %v511_v25, %v515_v26 }
 0x1bf   : > { %3300 = vmatpush2.bf16.msra.mxu1 %v6586_v31  ;;  %3312 = vmatprep.subr.bf16.mxu0 %v6707_v32  ;;  %v6429_v20 = vcombine.high %v519_v15, %v523_v16  ;;  %v6428_v28 = vcombine.low %v519_v15, %v523_v16  ;;  %v742_v31 = vld [vmem:[#allocation5 + $0x810] sm:$0xff]  ;;  %v603_v14 = vld [vmem:[#allocation5 + $0x3b8] sm:$0xff]  ;;  %v6516_v16 = vcombine.low %v607_v3, %v611_v4 }
 0x1c0   : > { %v8445_v50 = vadd.f32 %v2963_v47, %v2921_v45  ;;  %3369 = vmatprep.subr.bf16.mxu1 %v6779_v36  ;;  %v746_v32 = vld [vmem:[#allocation5 + $0x830] sm:$0xff]  ;;  %v503_v36 = vld [vmem:[#allocation5 + $0x98] sm:$0xff]  ;;  %v6508_v26 = vcombine.low %v599_v13, %v603_v14 }
 0x1c1   : > { %3259 = vmatmul.mubr.bf16.vlgmr.msra.gmra.mxu0 %v8396_v21  ;;  %v6651_v40 = vcombine.high %v742_v31, %v746_v32  ;;  %v6413_v42 = vcombine.high %v503_v36, %v507_v37  ;;  %v862_v45 = vld [vmem:[#allocation5 + $0xbd0] sm:$0xff]  ;;  %v495_v47 = vld [vmem:[#allocation5 + $0x58] sm:$0xff] }
 0x1c2   : > { %3302 = vmatmul.mubr.bf16.vlgmr.msra.gmra.mxu1 %v8398_v24  ;;  %3313 = vmatpush1.bf16.msra.mxu0 %v6706_v46  ;;  %v866_v46 = vld [vmem:[#allocation5 + $0xbf0] sm:$0xff] }
 0x1c3   : > { %3370 = vmatpush1.bf16.msra.mxu1 %v6778_v48  ;;  %3314 = vmatprep.subr.bf16.mxu0 %v6699_v49  ;;  %v499_v48 = vld [vmem:[#allocation5 + $0x78] sm:$0xff]  ;;  %v6650_v49 = vcombine.low %v742_v31, %v746_v32  ;;  %v6771_v52 = vcombine.high %v862_v45, %v866_v46  ;;  %v6770_v58 = vcombine.low %v862_v45, %v866_v46 }
 0x1c4   : > { %3387 = vmatprep.mubr.bf16.mxu1 %v8136_v41  ;;  %3398 = vmatprep.subr.bf16.mxu1 %v6453_v51  ;;  %v6412_v51 = vcombine.low %v503_v36, %v507_v37  ;;  %v6405_v53 = vcombine.high %v495_v47, %v499_v48  ;;  %v6404_v61 = vcombine.low %v495_v47, %v499_v48  ;;  %v583_v31 = vld [vmem:[#allocation5 + $0x318] sm:$0xff]  ;;  %v8454_v48 = vpop.f32.mrf.mxu1 }
 0x1c5   : > { %3344 = vmatprep.mubr.bf16.mxu0 %v8403_v33  ;;  %v587_v32 = vld [vmem:[#allocation5 + $0x338] sm:$0xff] }
 0x1c6   : > { %3315 = vmatpush1.bf16.msra.mxu0 %v6698_v54  ;;  %v854_v54 = vld [vmem:[#allocation5 + $0xb90] sm:$0xff]  ;;  %v575_v45 = vld [vmem:[#allocation5 + $0x2d8] sm:$0xff] }
 0x1c7   : > { %3316 = vmatprep.subr.bf16.mxu0 %v6691_v55  ;;  %v858_v55 = vld [vmem:[#allocation5 + $0xbb0] sm:$0xff]  ;;  %v579_v46 = vld [vmem:[#allocation5 + $0x2f8] sm:$0xff] }
 0x1c8   : > { %v6762_v5 = vcombine.low %v854_v54, %v858_v55 }
 0x1ca   : > { %6784 = vmatmul.mubr.msk.bf16.vlgmr.msra.gmra.mxu1 %vm2878_vm0, %v8410_v44  ;;  %3317 = vmatpush1.bf16.msra.mxu0 %v6690_v62  ;;  %v6763_v62 = vcombine.high %v854_v54, %v858_v55  ;;  %v810_v54 = vld [vmem:[#allocation5 + $0xa30] sm:$0xff]  ;;  %v567_v55 = vld [vmem:[#allocation5 + $0x298] sm:$0xff] }
 0x1cb   : > { %3399 = vmatpush1.bf16.msra.mxu1 %v6452_v63  ;;  %3318 = vmatprep.subr.bf16.mxu0 %v6683_v1  ;;  %v6397_v63 = vcombine.high %v487_v56, %v491_v57  ;;  %v846_v1 = vld [vmem:[#allocation5 + $0xb50] sm:$0xff]  ;;  %v571_v56 = vld [vmem:[#allocation5 + $0x2b8] sm:$0xff] }
 0x1cc   : > { %3400 = vmatprep.subr.bf16.mxu1 %v6445_v2  ;;  %3430 = vmatprep.mubr.bf16.mxu1 %v8384_v59  ;;  %v6659_v59 = vcombine.high %v750_v22, %v754_v23  ;;  %v850_v2 = vld [vmem:[#allocation5 + $0xb70] sm:$0xff]  ;;  %v591_v22 = vld [vmem:[#allocation5 + $0x358] sm:$0xff] }
 0x1cd   : > { %v6754_v15 = vcombine.low %v846_v1, %v850_v2  ;;  %v595_v23 = vld [vmem:[#allocation5 + $0x378] sm:$0xff] }
 0x1ce   : > { %3319 = vmatpush1.bf16.msra.mxu0 %v6682_v8  ;;  %v6755_v8 = vcombine.high %v846_v1, %v850_v2  ;;  %v6500_v37 = vcombine.low %v591_v22, %v595_v23  ;;  %v6477_v1 = vcombine.high %v567_v55, %v571_v56  ;;  %v671_v2 = vld [vmem:[#allocation5 + $0x5d8] sm:$0xff] }
 0x1cf   : > { %3401 = vmatpush1.bf16.msra.mxu1 %v6444_v10  ;;  %3320 = vmatprep.subr.bf16.mxu0 %v6675_v11  ;;  %v6517_v10 = vcombine.high %v607_v3, %v611_v4  ;;  %v838_v11 = vld [vmem:[#allocation5 + $0xb10] sm:$0xff]  ;;  %v675_v3 = vld [vmem:[#allocation5 + $0x5f8] sm:$0xff] }
 0x1d0   : > { %3402 = vmatprep.subr.bf16.mxu1 %v6437_v12  ;;  %v842_v12 = vld [vmem:[#allocation5 + $0xb30] sm:$0xff] }
 0x1d1   : > { %v6746_v25 = vcombine.low %v838_v11, %v842_v12 }
 0x1d2   : > { %3321 = vmatpush1.bf16.msra.mxu0 %v6674_v17  ;;  %v6747_v17 = vcombine.high %v838_v11, %v842_v12 }
 0x1d3   : > { %3403 = vmatpush1.bf16.msra.mxu1 %v6436_v18  ;;  %3322 = vmatprep.subr.bf16.mxu0 %v6667_v19  ;;  %v6509_v18 = vcombine.high %v599_v13, %v603_v14  ;;  %v830_v19 = vld [vmem:[#allocation5 + $0xad0] sm:$0xff]  ;;  %v6476_v13 = vcombine.low %v567_v55, %v571_v56  ;;  %v6581_v14 = vcombine.high %v671_v2, %v675_v3 }
 0x1d4   : > { %3404 = vmatprep.subr.bf16.mxu1 %v6429_v20  ;;  %v834_v20 = vld [vmem:[#allocation5 + $0xaf0] sm:$0xff] }
 0x1d5   : > { %v6738_v36 = vcombine.low %v830_v19, %v834_v20 }
 0x1d6   : > { %3323 = vmatpush1.bf16.msra.mxu0 %v6666_v27  ;;  %v6739_v27 = vcombine.high %v830_v19, %v834_v20  ;;  %v551_v20 = vld [vmem:[#allocation5 + $0x218] sm:$0xff] }
 0x1d7   : > { %3405 = vmatpush1.bf16.msra.mxu1 %v6428_v28  ;;  %3324 = vmatprep.subr.bf16.mxu0 %v6659_v59  ;;  %v6501_v28 = vcombine.high %v591_v22, %v595_v23  ;;  %v822_v59 = vld [vmem:[#allocation5 + $0xa90] sm:$0xff]  ;;  %v555_v22 = vld [vmem:[#allocation5 + $0x238] sm:$0xff]  ;;  %v6580_v23 = vcombine.low %v671_v2, %v675_v3 }
 0x1d8   : > { %3406 = vmatprep.subr.bf16.mxu1 %v6421_v29  ;;  %v826_v29 = vld [vmem:[#allocation5 + $0xab0] sm:$0xff] }
 0x1d9   : > { %v6730_v47 = vcombine.low %v822_v59, %v826_v29 }
 0x1da   : > { %3325 = vmatpush1.bf16.msra.mxu0 %v6658_v38  ;;  %v6731_v38 = vcombine.high %v822_v59, %v826_v29  ;;  %v6461_v29 = vcombine.high %v551_v20, %v555_v22 }
 0x1db   : > { %3407 = vmatpush1.bf16.msra.mxu1 %v6420_v39  ;;  %3326 = vmatprep.subr.bf16.mxu0 %v6651_v40  ;;  %v6493_v39 = vcombine.high %v583_v31, %v587_v32  ;;  %v814_v40 = vld [vmem:[#allocation5 + $0xa50] sm:$0xff] }
 0x1dc   : > { %3408 = vmatprep.subr.bf16.mxu1 %v6413_v42  ;;  %v818_v42 = vld [vmem:[#allocation5 + $0xa70] sm:$0xff] }
 0x1dd   : > { %v6722_v57 = vcombine.low %v814_v40, %v818_v42 }
 0x1de   : > { %3327 = vmatpush1.bf16.msra.mxu0 %v6650_v49  ;;  %v6492_v49 = vcombine.low %v583_v31, %v587_v32  ;;  %v655_v31 = vld [vmem:[#allocation5 + $0x558] sm:$0xff] }
 0x1df   : > { %3409 = vmatpush1.bf16.msra.mxu1 %v6412_v51  ;;  %3328 = vmatprep.subr.bf16.mxu0 %v6771_v52  ;;  %v6723_v51 = vcombine.high %v814_v40, %v818_v42  ;;  %v6485_v52 = vcombine.high %v575_v45, %v579_v46  ;;  %v659_v32 = vld [vmem:[#allocation5 + $0x578] sm:$0xff] }
 0x1e0   : > { %3410 = vmatprep.subr.bf16.mxu1 %v6405_v53  ;;  %v806_v53 = vld [vmem:[#allocation5 + $0xa10] sm:$0xff]  ;;  %v6565_v40 = vcombine.high %v655_v31, %v659_v32 }
 0x1e2   : > { %3329 = vmatpush2.bf16.msra.mxu0 %v6770_v58  ;;  %v8456_v58 = vpop.f32.mrf.mxu0 }
 0x1e3   : > { %3411 = vmatpush1.bf16.msra.mxu1 %v6404_v61  ;;  %3330 = vmatprep.subr.bf16.mxu0 %v6763_v62  ;;  %v3045_v61 = vpop.f32.mrf.mxu1  ;;  %v6484_v62 = vcombine.low %v575_v45, %v579_v46 }
 0x1e4   : > { %3412 = vmatprep.subr.bf16.mxu1 %v6397_v63  ;;  %v6715_v63 = vcombine.high %v806_v53, %v810_v54 }
 0x1e5   : > { %v8459_v11 = vpop.f32.mrf.mxu1 }
 0x1e6   : > { %3331 = vmatpush2.bf16.msra.mxu0 %v6762_v5  ;;  %v559_v5 = vld [vmem:[#allocation5 + $0x258] sm:$0xff] }
 0x1e7   : > { %3413 = vmatpush1.bf16.msra.mxu1 %v6396_v7  ;;  %3332 = vmatprep.subr.bf16.mxu0 %v6755_v8  ;;  %v563_v7 = vld [vmem:[#allocation5 + $0x278] sm:$0xff] }
 0x1e8   : > { %3414 = vmatprep.subr.bf16.mxu1 %v6517_v10  ;;  %v6714_v10 = vcombine.low %v806_v53, %v810_v54  ;;  %v6564_v54 = vcombine.low %v655_v31, %v659_v32  ;;  %v735_v32 = vld [vmem:[#allocation5 + $0x7d8] sm:$0xff] }
 0x1ea   : > { %3333 = vmatpush2.bf16.msra.mxu0 %v6754_v15 }
 0x1eb   : > { %3415 = vmatpush2.bf16.msra.mxu1 %v6516_v16  ;;  %3334 = vmatprep.subr.bf16.mxu0 %v6747_v17  ;;  %v6469_v16 = vcombine.high %v559_v5, %v563_v7  ;;  %v663_v17 = vld [vmem:[#allocation5 + $0x598] sm:$0xff] }
 0x1ec   : > { %3416 = vmatprep.subr.bf16.mxu1 %v6509_v18  ;;  %v667_v18 = vld [vmem:[#allocation5 + $0x5b8] sm:$0xff] }
 0x1ee   : > { %3335 = vmatpush2.bf16.msra.mxu0 %v6746_v25  ;;  %v3049_v25 = vpop.f32.mrf.mxu1 }
 0x1ef   : > { %3417 = vmatpush2.bf16.msra.mxu1 %v6508_v26  ;;  %3336 = vmatprep.subr.bf16.mxu0 %v6739_v27  ;;  %v6468_v26 = vcombine.low %v559_v5, %v563_v7  ;;  %v6573_v27 = vcombine.high %v663_v17, %v667_v18  ;;  %v631_v5 = vld [vmem:[#allocation5 + $0x498] sm:$0xff] }
 0x1f0   : > { %3418 = vmatprep.subr.bf16.mxu1 %v6501_v28  ;;  %v635_v7 = vld [vmem:[#allocation5 + $0x4b8] sm:$0xff] }
 0x1f2   : > { %3337 = vmatpush2.bf16.msra.mxu0 %v6738_v36  ;;  %v799_v36 = vld [vmem:[#allocation5 + $0x9d8] sm:$0xff] }
 0x1f3   : > { %3419 = vmatpush2.bf16.msra.mxu1 %v6500_v37  ;;  %3338 = vmatprep.subr.bf16.mxu0 %v6731_v38  ;;  %v803_v37 = vld [vmem:[#allocation5 + $0x9f8] sm:$0xff] }
 0x1f4   : > { %3420 = vmatprep.subr.bf16.mxu1 %v6493_v39  ;;  %v6460_v39 = vcombine.low %v551_v20, %v555_v22  ;;  %v6709_v46 = vcombine.high %v799_v36, %v803_v37  ;;  %v6708_v55 = vcombine.low %v799_v36, %v803_v37  ;;  %v6540_v20 = vcombine.low %v631_v5, %v635_v7  ;;  %v739_v36 = vld [vmem:[#allocation5 + $0x7f8] sm:$0xff] }
 0x1f5   : > { %v751_v37 = vld [vmem:[#allocation5 + $0x858] sm:$0xff] }
 0x1f6   : > { %3339 = vmatpush2.bf16.msra.mxu0 %v6730_v47  ;;  %v647_v47 = vld [vmem:[#allocation5 + $0x518] sm:$0xff] }
 0x1f7   : > { %3421 = vmatpush2.bf16.msra.mxu1 %v6492_v49  ;;  %3340 = vmatprep.subr.bf16.mxu0 %v6723_v51  ;;  %v651_v49 = vld [vmem:[#allocation5 + $0x538] sm:$0xff] }
 0x1f8   : > { %3422 = vmatprep.subr.bf16.mxu1 %v6485_v52  ;;  %v791_v51 = vld [vmem:[#allocation5 + $0x998] sm:$0xff] }
 0x1f9   : > { %v3002_v4 = vpop.f32.mrf.mxu0  ;;  %v795_v52 = vld [vmem:[#allocation5 + $0x9b8] sm:$0xff] }
 0x1fa   : > { %v3003_v8 = vadd.f32 %v3002_v4, %v8441_v34  ;;  %3341 = vmatpush2.bf16.msra.mxu0 %v6722_v57  ;;  %v6701_v56 = vcombine.high %v791_v51, %v795_v52  ;;  %v639_v57 = vld [vmem:[#allocation5 + $0x4d8] sm:$0xff]  ;;  %v6700_v2 = vcombine.low %v791_v51, %v795_v52  ;;  %v6644_v51 = vcombine.low %v735_v32, %v739_v36 }
 0x1fb   : > { %3423 = vmatpush2.bf16.msra.mxu1 %v6484_v62  ;;  %v8461_v12 = vpop.f32.mrf.mxu0  ;;  %3342 = vmatprep.subr.bf16.mxu0 %v6715_v63  ;;  %v783_v62 = vld [vmem:[#allocation5 + $0x958] sm:$0xff] }
 0x1fc   : > { %v3046_v15 = vadd.f32 %v3045_v61, %v3003_v8  ;;  %3424 = vmatprep.subr.bf16.mxu1 %v6477_v1  ;;  %v643_v61 = vld [vmem:[#allocation5 + $0x4f8] sm:$0xff]  ;;  %v6556_v1 = vcombine.low %v647_v47, %v651_v49 }
 0x1fd   : > { %v3006_v19 = vpop.f32.mrf.mxu0  ;;  %v787_v63 = vld [vmem:[#allocation5 + $0x978] sm:$0xff]  ;;  %v6549_v3 = vcombine.high %v639_v57, %v643_v61 }
 0x1fe   : > { %v3007_v34 = vadd.f32 %v3006_v19, %v8445_v50  ;;  %3343 = vmatpush2.bf16.msra.mxu0 %v6714_v10  ;;  %v3570_v28 = vmul.f32 0.2, %v3046_v15  ;;  %v6572_v50 = vcombine.low %v663_v17, %v667_v18  ;;  %v6693_v4 = vcombine.high %v783_v62, %v787_v63  ;;  %v775_v8 = vld [vmem:[#allocation5 + $0x918] sm:$0xff] }
 0x1ff   : > { %3425 = vmatpush2.bf16.msra.mxu1 %v6476_v13  ;;  %3441 = vmatprep.subr.bf16.mxu0 %v6581_v14  ;;  %v779_v10 = vld [vmem:[#allocation5 + $0x938] sm:$0xff]  ;;  %v6548_v13 = vcombine.low %v639_v57, %v643_v61  ;;  %v6692_v14 = vcombine.low %v783_v62, %v787_v63 }
 0x200   : > { %v3050_v59 = vadd.f32 %v3049_v25, %v3007_v34  ;;  %3426 = vmatprep.subr.bf16.mxu1 %v6469_v16  ;;  %v3586_v42 = vmax.f32 %v3046_v15, %v3570_v28  ;;  %v6685_v15 = vcombine.high %v775_v8, %v779_v10  ;;  %v623_v16 = vld [vmem:[#allocation5 + $0x458] sm:$0xff]  ;;  %v6684_v22 = vcombine.low %v775_v8, %v779_v10 }
 0x201   : > { %3345 = vmatmul.mubr.bf16.vlgmr.msra.gmra.mxu0 %v8417_v43  ;;  %v627_v17 = vld [vmem:[#allocation5 + $0x478] sm:$0xff] }
 0x202   : > { %v3578_v38 = vmul.f32 0.2, %v3050_v59  ;;  %3442 = vmatpush1.bf16.msra.mxu0 %v6580_v23  ;;  %3473 = vmatprep.mubr.bf16.mxu0 %v8388_v0  ;;  %v6557_v0 = vcombine.high %v647_v47, %v651_v49  ;;  %v767_v18 = vld [vmem:[#allocation5 + $0x8d8] sm:$0xff]  ;;  %v6532_v28 = vcombine.low %v623_v16, %v627_v17 }
 0x203   : > { %3427 = vmatpush2.bf16.msra.mxu1 %v6468_v26  ;;  %3443 = vmatprep.subr.bf16.mxu0 %v6573_v27  ;;  %v771_v19 = vld [vmem:[#allocation5 + $0x8f8] sm:$0xff] }
 0x204   : > { %v3594_v45 = vmax.f32 %v3050_v59, %v3578_v38  ;;  %3428 = vmatprep.subr.bf16.mxu1 %v6461_v29  ;;  %v6677_v34 = vcombine.high %v767_v18, %v771_v19  ;;  %v615_v23 = vld [vmem:[#allocation5 + $0x418] sm:$0xff]  ;;  %v6676_v59 = vcombine.low %v767_v18, %v771_v19 }
 0x205   : > { %v619_v25 = vld [vmem:[#allocation5 + $0x438] sm:$0xff] }
 0x206   : > { %v8466_v53 = vpack.c.bf16 %v3594_v45, %v3586_v42  ;;  %3444 = vmatpush1.bf16.msra.mxu0 %v6572_v50  ;;  %v759_v26 = vld [vmem:[#allocation5 + $0x898] sm:$0xff]  ;;  %v6525_v29 = vcombine.high %v615_v23, %v619_v25  ;;  %v6524_v50 = vcombine.low %v615_v23, %v619_v25  ;;  %v8471_v23 = vsub.s32 1, %v8430_v60 }
 0x207   : > { %3429 = vmatpush2.bf16.msra.mxu1 %v6460_v39  ;;  %3445 = vmatprep.subr.bf16.mxu0 %v6565_v40  ;;  %v763_v27 = vld [vmem:[#allocation5 + $0x8b8] sm:$0xff]  ;;  %v6645_v40 = vcombine.high %v735_v32, %v739_v36 }
 0x208   : > { %3484 = vmatprep.subr.bf16.mxu1 %v6709_v46  ;;  %v6669_v31 = vcombine.high %v759_v26, %v763_v27  ;;  %v755_v38 = vld [vmem:[#allocation5 + $0x878] sm:$0xff]  ;;  %v6668_v39 = vcombine.low %v759_v26, %v763_v27 }
 0x209   : > { %v6661_v42 = vcombine.high %v751_v37, %v755_v38  ;;  %v727_v45 = vld [vmem:[#allocation5 + $0x798] sm:$0xff]  ;;  %v6660_v52 = vcombine.low %v751_v37, %v755_v38  ;;  %v885_v37 = vrot.slane %v8435_v9, %v8471_v23 }
 0x20a   : > { %3431 = vmatmul.mubr.bf16.vlgmr.msra.gmra.mxu1 %v8396_v21  ;;  %3446 = vmatpush1.bf16.msra.mxu0 %v6564_v54  ;;  %v6541_v21 = vcombine.high %v631_v5, %v635_v7  ;;  %v731_v46 = vld [vmem:[#allocation5 + $0x7b8] sm:$0xff] }
 0x20b   : > { %3485 = vmatpush1.bf16.msra.mxu1 %v6708_v55  ;;  %3447 = vmatprep.subr.bf16.mxu0 %v6557_v0  ;;  %v743_v47 = vld [vmem:[#allocation5 + $0x818] sm:$0xff]  ;;  %v6637_v54 = vcombine.high %v727_v45, %v731_v46  ;;  %v6636_v62 = vcombine.low %v727_v45, %v731_v46 }
 0x20c   : > { %3486 = vmatprep.subr.bf16.mxu1 %v6701_v56  ;;  %3516 = vmatprep.mubr.bf16.mxu1 %v8403_v33  ;;  %v6533_v33 = vcombine.high %v623_v16, %v627_v17  ;;  %v747_v49 = vld [vmem:[#allocation5 + $0x838] sm:$0xff] }
 0x20d   : > { %v6653_v55 = vcombine.high %v743_v47, %v747_v49  ;;  %v719_v0 = vld [vmem:[#allocation5 + $0x758] sm:$0xff]  ;;  %v6652_v63 = vcombine.low %v743_v47, %v747_v49 }
 0x20e   : > { %3448 = vmatpush1.bf16.msra.mxu0 %v6556_v1  ;;  %v723_v56 = vld [vmem:[#allocation5 + $0x778] sm:$0xff] }
 0x20f   : > { %3487 = vmatpush1.bf16.msra.mxu1 %v6700_v2  ;;  %3449 = vmatprep.subr.bf16.mxu0 %v6549_v3  ;;  %v863_v57 = vld [vmem:[#allocation5 + $0xbd8] sm:$0xff]  ;;  %v6629_v1 = vcombine.high %v719_v0, %v723_v56  ;;  %v6628_v8 = vcombine.low %v719_v0, %v723_v56 }
 0x210   : > { %3488 = vmatprep.subr.bf16.mxu1 %v6693_v4  ;;  %v867_v61 = vld [vmem:[#allocation5 + $0xbf8] sm:$0xff] }
 0x211   : > { %v6773_v2 = vcombine.high %v863_v57, %v867_v61  ;;  %v711_v3 = vld [vmem:[#allocation5 + $0x718] sm:$0xff]  ;;  %v6772_v10 = vcombine.low %v863_v57, %v867_v61  ;;  %v3008_v57 = vpop.f32.mrf.mxu0 }
 0x212   : > { %3450 = vmatpush1.bf16.msra.mxu0 %v6548_v13  ;;  %v715_v4 = vld [vmem:[#allocation5 + $0x738] sm:$0xff] }
 0x213   : > { %3489 = vmatpush1.bf16.msra.mxu1 %v6692_v14  ;;  %3451 = vmatprep.subr.bf16.mxu0 %v6541_v21  ;;  %v855_v5 = vld [vmem:[#allocation5 + $0xb98] sm:$0xff]  ;;  %v6621_v13 = vcombine.high %v711_v3, %v715_v4  ;;  %v6620_v18 = vcombine.low %v711_v3, %v715_v4 }
 0x214   : > { %3490 = vmatprep.subr.bf16.mxu1 %v6685_v15  ;;  %v859_v7 = vld [vmem:[#allocation5 + $0xbb8] sm:$0xff] }
 0x215   : > { %v6765_v14 = vcombine.high %v855_v5, %v859_v7  ;;  %v703_v21 = vld [vmem:[#allocation5 + $0x6d8] sm:$0xff]  ;;  %v6764_v19 = vcombine.low %v855_v5, %v859_v7 }
 0x216   : > { %3452 = vmatpush1.bf16.msra.mxu0 %v6540_v20  ;;  %v707_v15 = vld [vmem:[#allocation5 + $0x6f8] sm:$0xff] }
 0x217   : > { %3491 = vmatpush1.bf16.msra.mxu1 %v6684_v22  ;;  %3453 = vmatprep.subr.bf16.mxu0 %v6533_v33  ;;  %v847_v16 = vld [vmem:[#allocation5 + $0xb58] sm:$0xff]  ;;  %v6613_v20 = vcombine.high %v703_v21, %v707_v15  ;;  %v6612_v27 = vcombine.low %v703_v21, %v707_v15 }
 0x218   : > { %3492 = vmatprep.subr.bf16.mxu1 %v6677_v34  ;;  %v851_v17 = vld [vmem:[#allocation5 + $0xb78] sm:$0xff] }
 0x219   : > { %v6757_v22 = vcombine.high %v847_v16, %v851_v17  ;;  %v695_v33 = vld [vmem:[#allocation5 + $0x698] sm:$0xff] }
 0x21a   : > { %3454 = vmatpush1.bf16.msra.mxu0 %v6532_v28  ;;  %v699_v34 = vld [vmem:[#allocation5 + $0x6b8] sm:$0xff]  ;;  %v6756_v28 = vcombine.low %v847_v16, %v851_v17 }
 0x21b   : > { %3493 = vmatpush1.bf16.msra.mxu1 %v6676_v59  ;;  %3455 = vmatprep.subr.bf16.mxu0 %v6525_v29  ;;  %v839_v25 = vld [vmem:[#allocation5 + $0xb18] sm:$0xff]  ;;  %v6605_v59 = vcombine.high %v695_v33, %v699_v34  ;;  %v888_v29 = vsub.s32 2, %v8430_v60 }
 0x21c   : > { %3494 = vmatprep.subr.bf16.mxu1 %v6669_v31  ;;  %v843_v26 = vld [vmem:[#allocation5 + $0xb38] sm:$0xff] }
 0x21d   : > { %v6749_v31 = vcombine.high %v839_v25, %v843_v26  ;;  %v687_v32 = vld [vmem:[#allocation5 + $0x658] sm:$0xff]  ;;  %v6748_v45 = vcombine.low %v839_v25, %v843_v26  ;;  %v8480_v47 = vrot.slane %v8435_v9, %v888_v29 }
 0x21e   : > { %3456 = vmatpush1.bf16.msra.mxu0 %v6524_v50  ;;  %v691_v36 = vld [vmem:[#allocation5 + $0x678] sm:$0xff] }
 0x21f   : > { %3495 = vmatpush1.bf16.msra.mxu1 %v6668_v39  ;;  %3457 = vmatprep.subr.bf16.mxu0 %v6645_v40  ;;  %v831_v38 = vld [vmem:[#allocation5 + $0xad8] sm:$0xff]  ;;  %v3051_v39 = vpop.f32.mrf.mxu1  ;;  %v6604_v40 = vcombine.low %v695_v33, %v699_v34  ;;  %v6597_v46 = vcombine.high %v687_v32, %v691_v36 }
 0x220   : > { %3496 = vmatprep.subr.bf16.mxu1 %v6661_v42  ;;  %v835_v50 = vld [vmem:[#allocation5 + $0xaf8] sm:$0xff]  ;;  %v2923_v42 = vadd.f32 %v8456_v58, %v885_v37  ;;  %v6596_v58 = vcombine.low %v687_v32, %v691_v36 }
 0x221   : > { %v3088_v49 = vpop.f32.mrf.mxu1  ;;  %v823_v0 = vld [vmem:[#allocation5 + $0xa98] sm:$0xff] }
 0x222   : > { %3458 = vmatpush2.bf16.msra.mxu0 %v6644_v51  ;;  %v6741_v51 = vcombine.high %v831_v38, %v835_v50  ;;  %v827_v56 = vld [vmem:[#allocation5 + $0xab8] sm:$0xff]  ;;  %v2966_v61 = vadd.f32 %v8454_v48, %v2923_v42 }
 0x223   : > { %3497 = vmatpush1.bf16.msra.mxu1 %v6660_v52  ;;  %3459 = vmatprep.subr.bf16.mxu0 %v6637_v54  ;;  %v679_v52 = vld [vmem:[#allocation5 + $0x618] sm:$0xff]  ;;  %v6733_v3 = vcombine.high %v823_v0, %v827_v56  ;;  %v6732_v17 = vcombine.low %v823_v0, %v827_v56 }
 0x224   : > { %3498 = vmatprep.subr.bf16.mxu1 %v6653_v55  ;;  %v683_v54 = vld [vmem:[#allocation5 + $0x638] sm:$0xff]  ;;  %v2919_v55 = vadd.f32 %v8439_v30, %v885_v37  ;;  %v3009_v7 = vadd.f32 %v3008_v57, %v2966_v61 }
 0x225   : > { %v871_v4 = vld [vmem:[#allocation5 + $0xc18] sm:$0xff]  ;;  %v6588_v21 = vcombine.low %v679_v52, %v683_v54 }
 0x226   : > { %3460 = vmatpush2.bf16.msra.mxu0 %v6636_v62  ;;  %v6740_v62 = vcombine.low %v831_v38, %v835_v50  ;;  %v875_v5 = vld [vmem:[#allocation5 + $0xc38] sm:$0xff]  ;;  %v2962_v30 = vadd.f32 %v8443_v35, %v2919_v55 }
 0x227   : > { %3499 = vmatpush1.bf16.msra.mxu1 %v6652_v63  ;;  %3461 = vmatprep.subr.bf16.mxu0 %v6629_v1  ;;  %v6589_v63 = vcombine.high %v679_v52, %v683_v54  ;;  %v3089_v1 = vadd.f32 %v3088_v49, %v8480_v47  ;;  %v807_v34 = vld [vmem:[#allocation5 + $0xa18] sm:$0xff] }
 0x228   : > { %3500 = vmatprep.subr.bf16.mxu1 %v6773_v2  ;;  %v3090_v2 = vpop.f32.mrf.mxu1  ;;  %v3005_v15 = vadd.f32 %v8461_v12, %v2962_v30  ;;  %v811_v25 = vld [vmem:[#allocation5 + $0xa38] sm:$0xff]  ;;  %v6780_v12 = vcombine.low %v871_v4, %v875_v5 }
 0x229   : > { %v6717_v32 = vcombine.high %v807_v34, %v811_v25  ;;  %v7307_v54 = vld [vmem:[#allocation8 + $0xe0] ss:$16 sps:$4 sm:$0xff]   ;;  %v7315_v61 = vld [vmem:[#allocation8 + $0xc4] ss:$16 sps:$4 sm:$0xff]  }
 0x22a   : > { %3462 = vmatpush2.bf16.msra.mxu0 %v6628_v8  ;;  %v892_v8 = vsub.s32 3, %v8430_v60  ;;  %v3048_v26 = vadd.f32 %v8459_v11, %v3005_v15  ;;  %v7310_v56 = vld [vmem:[#allocation8 + $0x2e0] ss:$16 sps:$4 sm:$0xff]   ;;  %v7321_v30 = vld [vmem:[#allocation8 + $0xa4] ss:$16 sps:$4 sm:$0xff]  }
 0x22b   : > { %3501 = vmatpush2.bf16.msra.mxu1 %v6772_v10  ;;  %3463 = vmatprep.subr.bf16.mxu0 %v6621_v13  ;;  %v815_v13 = vld [vmem:[#allocation5 + $0xa58] sm:$0xff] }
 0x22c   : > { %3502 = vmatprep.subr.bf16.mxu1 %v6765_v14  ;;  %v819_v14 = vld [vmem:[#allocation5 + $0xa78] sm:$0xff]  ;;  %v3571_v11 = vmul.f32 0.2, %v3048_v26 }
 0x22d   : > { %v6725_v35 = vcombine.high %v815_v13, %v819_v14  ;;  %v7330_v15 = vld [vmem:[#allocation8 + $0x284] ss:$16 sps:$4 sm:$0xff]  }
 0x22e   : > { %3464 = vmatpush2.bf16.msra.mxu0 %v6620_v18  ;;  %v6781_v18 = vcombine.high %v871_v4, %v875_v5  ;;  %v3587_v55 = vmax.f32 %v3048_v26, %v3571_v11  ;;  %v7316_v5 = vld [vmem:[#allocation8 + $0x2c0] ss:$16 sps:$4 sm:$0xff]  }
 0x22f   : > { %3503 = vmatpush2.bf16.msra.mxu1 %v6764_v19  ;;  %3465 = vmatprep.subr.bf16.mxu0 %v6613_v20  ;;  %v8490_v19 = vpop.f32.mrf.mxu1  ;;  %v3052_v20 = vadd.f32 %v3051_v39, %v3009_v7  ;;  %v7324_v7 = vld [vmem:[#allocation8 + $0x2a4] ss:$16 sps:$4 sm:$0xff]   ;;  %v7337_v26 = vld [vmem:[#allocation8 + $0x40] ss:$16 sps:$4 sm:$0xff]  }
 0x230   : > { %3504 = vmatprep.subr.bf16.mxu1 %v6757_v22  ;;  %v893_v22 = vrot.slane %v8435_v9, %v892_v8  ;;  %v7349_v11 = vld [vmem:[#allocation8] ss:$16 sps:$4 sm:$0xff]  }
 0x231   : > { %v3579_v36 = vmul.f32 0.2, %v3052_v20 }
 0x232   : > { %3466 = vmatpush2.bf16.msra.mxu0 %v6612_v27  ;;  %v3091_v37 = vadd.f32 %v3090_v2, %v893_v22  ;;  %v7313_v2 = vld [vmem:[#allocation8 + $0xc0] ss:$16 sps:$4 sm:$0xff]  }
 0x233   : > { %3505 = vmatpush2.bf16.msra.mxu1 %v6756_v28  ;;  %3467 = vmatprep.subr.bf16.mxu0 %v6605_v59  ;;  %v6724_v28 = vcombine.low %v815_v13, %v819_v14  ;;  %v7309_v59 = vld [vmem:[#allocation8 + $0xe4] ss:$16 sps:$4 sm:$0xff]   ;;  %v7319_v13 = vld [vmem:[#allocation8 + $0xa0] ss:$16 sps:$4 sm:$0xff]  }
 0x234   : > { %3506 = vmatprep.subr.bf16.mxu1 %v6749_v31  ;;  %v3094_v31 = vpop.f32.mrf.mxu1 }
 0x235   : > { %v3095_v49 = vadd.f32 %v3094_v31, %v893_v22  ;;  %v7331_v22 = vld [vmem:[#allocation8 + $0x60] ss:$16 sps:$4 sm:$0xff]  }
 0x236   : > { %3468 = vmatpush2.bf16.msra.mxu0 %v6604_v40  ;;  %v6716_v40 = vcombine.low %v807_v34, %v811_v25  ;;  %v7334_v34 = vld [vmem:[#allocation8 + $0x260] ss:$16 sps:$4 sm:$0xff]   ;;  %v7339_v25 = vld [vmem:[#allocation8 + $0x44] ss:$16 sps:$4 sm:$0xff]  }
 0x237   : > { %3507 = vmatpush2.bf16.msra.mxu1 %v6748_v45  ;;  %3469 = vmatprep.subr.bf16.mxu0 %v6597_v46  ;;  %v7312_v45 = vld [vmem:[#allocation8 + $0x2e4] ss:$16 sps:$4 sm:$0xff]   ;;  %v3595_v46 = vmax.f32 %v3052_v20, %v3579_v36  ;;  %v7343_v31 = vld [vmem:[#allocation8 + $0x20] ss:$16 sps:$4 sm:$0xff]  }
 0x238   : > { %3508 = vmatprep.subr.bf16.mxu1 %v6741_v51  ;;  %v7336_v20 = vld [vmem:[#allocation8 + $0x264] ss:$16 sps:$4 sm:$0xff]  }
 0x239   : > { %v3131_v10 = vpop.f32.mrf.mxu0  ;;  %v7351_v36 = vld [vmem:[#allocation8 + $0x4] ss:$16 sps:$4 sm:$0xff]  }
 0x23a   : > { %v8487_v48 = vadd.f32 %v3131_v10, %v3089_v1  ;;  %3470 = vmatpush2.bf16.msra.mxu0 %v6596_v58  ;;  %v8510_v1 = vpack.c.bf16 %v3595_v46, %v3587_v55  ;;  %v7363_v46 = vld [vmem:[#allocation8 + $0x1c4] ss:$16 sps:$4 sm:$0xff]  }
 0x23b   : > { %3509 = vmatpush2.bf16.msra.mxu1 %v6740_v62  ;;  %v3133_v16 = vpop.f32.mrf.mxu0  ;;  %3471 = vmatprep.subr.bf16.mxu0 %v6589_v63  ;;  %v7318_v62 = vld [vmem:[#allocation8 + $0x2c4] ss:$16 sps:$4 sm:$0xff]  }
 0x23c   : > { %3510 = vmatprep.subr.bf16.mxu1 %v6733_v3  ;;  %v3134_v50 = vadd.f32 %v3133_v16, %v3091_v37  ;;  %v7354_v37 = vld [vmem:[#allocation8 + $0x204] ss:$16 sps:$4 sm:$0xff]  }
 0x23d   : > { %v8495_v33 = vpop.f32.mrf.mxu0  ;;  %v7369_v55 = vld [vmem:[#allocation8 + $0x1a4] ss:$16 sps:$4 sm:$0xff]  }
 0x23e   : > { %3472 = vmatpush2.bf16.msra.mxu0 %v6588_v21  ;;  %v7327_v21 = vld [vmem:[#allocation8 + $0x84] ss:$16 sps:$4 sm:$0xff]  }
 0x23f   : > { %3511 = vmatpush2.bf16.msra.mxu1 %v6732_v17  ;;  %v3137_v27 = vpop.f32.mrf.mxu0  ;;  %3541 = vmatprep.subr.bf16.mxu0 %v6781_v18  ;;  %v7325_v17 = vld [vmem:[#allocation8 + $0x80] ss:$16 sps:$4 sm:$0xff]  }
 0x240   : > { %3512 = vmatprep.subr.bf16.mxu1 %v6725_v35  ;;  %v3138_v0 = vadd.f32 %v3137_v27, %v3095_v49  ;;  %v7328_v18 = vld [vmem:[#allocation8 + $0x280] ss:$16 sps:$4 sm:$0xff]   ;;  %v7333_v35 = vld [vmem:[#allocation8 + $0x64] ss:$16 sps:$4 sm:$0xff]  }
 0x241   : > { %3474 = vmatmul.mubr.bf16.vlgmr.msra.gmra.mxu0 %v8398_v24  ;;  %v8499_v9 = vpop.f32.mrf.mxu0  ;;  %v7340_v27 = vld [vmem:[#allocation8 + $0x240] ss:$16 sps:$4 sm:$0xff]   ;;  %v7366_v49 = vld [vmem:[#allocation8 + $0x3c4] ss:$16 sps:$4 sm:$0xff]  }
 0x242   : > { %v8501_v38 = vpop.f32.mrf.mxu1  ;;  %3542 = vmatpush1.bf16.msra.mxu0 %v6780_v12  ;;  %3559 = vmatprep.mubr.bf16.mxu0 %v8136_v41  ;;  %v7342_v12 = vld [vmem:[#allocation8 + $0x244] ss:$16 sps:$4 sm:$0xff]  }
 0x243   : > { %3513 = vmatpush2.bf16.msra.mxu1 %v6724_v28  ;;  %v3219_v39 = vpop.f32.mrf.mxu0  ;;  %5168 = vmatprep.subr.bf16.mxu0 %v7309_v59  ;;  %v7345_v28 = vld [vmem:[#allocation8 + $0x24] ss:$16 sps:$4 sm:$0xff]  }
 0x244   : > { %v3176_v42 = vpop.f32.mrf.mxu1  ;;  %3514 = vmatprep.subr.bf16.mxu1 %v6717_v32  ;;  %v7348_v59 = vld [vmem:[#allocation8 + $0x224] ss:$16 sps:$4 sm:$0xff]   ;;  %v7346_v32 = vld [vmem:[#allocation8 + $0x220] ss:$16 sps:$4 sm:$0xff]  }
 0x245   : > { %v3177_v51 = vadd.f32 %v3176_v42, %v3134_v50  ;;  %v8504_v24 = vpop.f32.mrf.mxu0  ;;  %v7352_v50 = vld [vmem:[#allocation8 + $0x200] ss:$16 sps:$4 sm:$0xff]  }
 0x246   : > { %v8506_v52 = vpop.f32.mrf.mxu1  ;;  %v7355_v42 = vld [vmem:[#allocation8 + $0x1e0] ss:$16 sps:$4 sm:$0xff]  }
 0x247   : > { %v3220_v41 = vadd.f32 %v3219_v39, %v3177_v51  ;;  %3515 = vmatpush2.bf16.msra.mxu1 %v6716_v40  ;;  %v3223_v58 = vpop.f32.mrf.mxu0  ;;  %v7357_v39 = vld [vmem:[#allocation8 + $0x1e4] ss:$16 sps:$4 sm:$0xff]   ;;  %v7361_v51 = vld [vmem:[#allocation8 + $0x1c0] ss:$16 sps:$4 sm:$0xff]  }
 0x248   : > { %v3180_v57 = vpop.f32.mrf.mxu1  ;;  %5211 = vmatprep.subr.bf16.mxu1 %v7312_v45  ;;  %v7360_v40 = vld [vmem:[#allocation8 + $0x3e4] ss:$16 sps:$4 sm:$0xff]   ;;  %v7358_v45 = vld [vmem:[#allocation8 + $0x3e0] ss:$16 sps:$4 sm:$0xff]  }
 0x249   : > { %v3181_v63 = vadd.f32 %v3180_v57, %v3138_v0  ;;  %6785 = vmatmul.mubr.msk.bf16.vlgmr.msra.gmra.mxu0 %vm2878_vm0, %v8410_v44  ;;  %v3573_v3 = vmul.f32 0.2, %v3220_v41  ;;  %v7372_v0 = vld [vmem:[#allocation8 + $0x3a4] ss:$16 sps:$4 sm:$0xff]  }
 0x24a   : > { %3517 = vmatmul.mubr.bf16.vlgmr.msra.gmra.mxu1 %v8417_v43  ;;  %5169 = vmatpush1.bf16.msra.mxu0 %v7307_v54  ;;  %v7322_v43 = vld [vmem:[#allocation8 + $0x2a0] ss:$16 sps:$4 sm:$0xff]   ;;  %v7375_v57 = vld [vmem:[#allocation8 + $0x184] ss:$16 sps:$4 sm:$0xff]  }
 0x24b   : > { %v3224_v4 = vadd.f32 %v3223_v58, %v3181_v63  ;;  %5212 = vmatpush1.bf16.msra.mxu1 %v7310_v56  ;;  %5200 = vmatprep.mubr.bf16.mxu0 %v8510_v1  ;;  %v3589_v44 = vmax.f32 %v3220_v41, %v3573_v3  ;;  %v7364_v54 = vld [vmem:[#allocation8 + $0x3c0] ss:$16 sps:$4 sm:$0xff]   ;;  %v7378_v58 = vld [vmem:[#allocation8 + $0x384] ss:$16 sps:$4 sm:$0xff]  }
 0x24c   : > { %5170 = vmatprep.subr.bf16.mxu0 %v7315_v61  ;;  %5213 = vmatprep.subr.bf16.mxu1 %v7318_v62  ;;  %v7367_v41 = vld [vmem:[#allocation8 + $0x1a0] ss:$16 sps:$4 sm:$0xff]   ;;  %v7381_v63 = vld [vmem:[#allocation8 + $0x164] ss:$16 sps:$4 sm:$0xff]  }
 0x24d   : > { %v3581_v10 = vmul.f32 0.2, %v3224_v4  ;;  %v7370_v56 = vld [vmem:[#allocation8 + $0x3a0] ss:$16 sps:$4 sm:$0xff]   ;;  %v7384_v3 = vld [vmem:[#allocation8 + $0x364] ss:$16 sps:$4 sm:$0xff]  }
 0x24e   : > { %5171 = vmatpush1.bf16.msra.mxu0 %v7313_v2  ;;  %v7373_v61 = vld [vmem:[#allocation8 + $0x180] ss:$16 sps:$4 sm:$0xff]   ;;  %v3093_v2 = vadd.f32 %v8490_v19, %v8480_v47  ;;  %v7393_v19 = vld [vmem:[#allocation8 + $0x124] ss:$16 sps:$4 sm:$0xff]  }
 0x24f   : > { %v3597_v14 = vmax.f32 %v3224_v4, %v3581_v10  ;;  %5214 = vmatpush1.bf16.msra.mxu1 %v7316_v5  ;;  %5172 = vmatprep.subr.bf16.mxu0 %v7321_v30  ;;  %v7376_v62 = vld [vmem:[#allocation8 + $0x380] ss:$16 sps:$4 sm:$0xff]  }
 0x250   : > { %5215 = vmatprep.subr.bf16.mxu1 %v7324_v7  ;;  %v3136_v4 = vadd.f32 %v8495_v33, %v3093_v2  ;;  %v7379_v5 = vld [vmem:[#allocation8 + $0x160] ss:$16 sps:$4 sm:$0xff]   ;;  %v7387_v7 = vld [vmem:[#allocation8 + $0x144] ss:$16 sps:$4 sm:$0xff]  }
 0x251   : > { %v8514_v16 = vpack.c.bf16 %v3597_v14, %v3589_v44  ;;  %v7382_v30 = vld [vmem:[#allocation8 + $0x360] ss:$16 sps:$4 sm:$0xff]   ;;  %v3175_v44 = vadd.f32 %v8501_v38, %v8487_v48  ;;  %v7402_v48 = vld [vmem:[#allocation8 + $0x304] ss:$16 sps:$4 sm:$0xff]  }
 0x252   : > { %5173 = vmatpush1.bf16.msra.mxu0 %v7319_v13  ;;  %v3179_v10 = vadd.f32 %v8506_v52, %v3136_v4  ;;  %v7390_v13 = vld [vmem:[#allocation8 + $0x344] ss:$16 sps:$4 sm:$0xff]   ;;  %v7385_v14 = vld [vmem:[#allocation8 + $0x140] ss:$16 sps:$4 sm:$0xff]  }
 0x253   : > { %5216 = vmatpush1.bf16.msra.mxu1 %v7322_v43  ;;  %5243 = vmatprep.mubr.bf16.mxu1 %v8514_v16  ;;  %v7388_v47 = vld [vmem:[#allocation8 + $0x340] ss:$16 sps:$4 sm:$0xff]   ;;  %v7396_v43 = vld [vmem:[#allocation8 + $0x324] ss:$16 sps:$4 sm:$0xff]  }
 0x254   : > { %5174 = vmatprep.subr.bf16.mxu0 %v7327_v21  ;;  %5217 = vmatprep.subr.bf16.mxu1 %v7330_v15  ;;  %v3222_v33 = vadd.f32 %v8504_v24, %v3179_v10  ;;  %v3218_v21 = vadd.f32 %v8499_v9, %v3175_v44  ;;  %v7391_v15 = vld [vmem:[#allocation8 + $0x120] ss:$16 sps:$4 sm:$0xff]   ;;  %v7405_v24 = vld [vmem:[#allocation8 + $0x4e4] ss:$16 sps:$4 sm:$0xff]  }
 0x255   : > { %v7394_v52 = vld [vmem:[#allocation8 + $0x320] ss:$16 sps:$4 sm:$0xff]  }
 0x256   : > { %5175 = vmatpush1.bf16.msra.mxu0 %v7325_v17  ;;  %v7399_v17 = vld [vmem:[#allocation8 + $0x104] ss:$16 sps:$4 sm:$0xff]   ;;  %v3572_v38 = vmul.f32 0.2, %v3218_v21  ;;  %v7424_v2 = vld [vmem:[#allocation8 + $0x400] ss:$16 sps:$4 sm:$0xff]  }
 0x257   : > { %5218 = vmatpush1.bf16.msra.mxu1 %v7328_v18  ;;  %5176 = vmatprep.subr.bf16.mxu0 %v7333_v35  ;;  %v3580_v18 = vmul.f32 0.2, %v3222_v33  ;;  %v7397_v35 = vld [vmem:[#allocation8 + $0x100] ss:$16 sps:$4 sm:$0xff]  }
 0x258   : > { %5219 = vmatprep.subr.bf16.mxu1 %v7336_v20  ;;  %v7400_v20 = vld [vmem:[#allocation8 + $0x300] ss:$16 sps:$4 sm:$0xff]   ;;  %v3588_v9 = vmax.f32 %v3218_v21, %v3572_v38  ;;  %v7438_v21 = vld [vmem:[#allocation8 + $0x584] ss:$16 sps:$4 sm:$0xff]  }
 0x259   : > { %v7499_v4 = vld [vmem:[#allocation8 + $0x600] ss:$16 sps:$4 sm:$0xff]   ;;  %v7441_v38 = vld [vmem:[#allocation8 + $0x564] ss:$16 sps:$4 sm:$0xff]  }
 0x25a   : > { %5177 = vmatpush1.bf16.msra.mxu0 %v7331_v22  ;;  %v3596_v22 = vmax.f32 %v3222_v33, %v3580_v18  ;;  %v7505_v10 = vld [vmem:[#allocation8 + $0x7e0] ss:$16 sps:$4 sm:$0xff]  }
 0x25b   : > { %5220 = vmatpush1.bf16.msra.mxu1 %v7334_v34  ;;  %5178 = vmatprep.subr.bf16.mxu0 %v7339_v25  ;;  %v7459_v34 = vld [vmem:[#allocation8 + $0x6e4] ss:$16 sps:$4 sm:$0xff]   ;;  %v7403_v25 = vld [vmem:[#allocation8 + $0x4e0] ss:$16 sps:$4 sm:$0xff]  }
 0x25c   : > { %5221 = vmatprep.subr.bf16.mxu1 %v7342_v12  ;;  %v7408_v12 = vld [vmem:[#allocation8 + $0x4c4] ss:$16 sps:$4 sm:$0xff]   ;;  %v7430_v44 = vld [vmem:[#allocation8 + $0x5c0] ss:$16 sps:$4 sm:$0xff]  }
 0x25d   : > { %v7436_v18 = vld [vmem:[#allocation8 + $0x580] ss:$16 sps:$4 sm:$0xff]  }
 0x25e   : > { %5179 = vmatpush1.bf16.msra.mxu0 %v7337_v26  ;;  %v7457_v26 = vld [vmem:[#allocation8 + $0x6e0] ss:$16 sps:$4 sm:$0xff]  }
 0x25f   : > { %5222 = vmatpush1.bf16.msra.mxu1 %v7340_v27  ;;  %5180 = vmatprep.subr.bf16.mxu0 %v7345_v28  ;;  %v8525_v27 = vpack.c.bf16 %v3596_v22, %v3588_v9  ;;  %v7465_v28 = vld [vmem:[#allocation8 + $0x6c4] ss:$16 sps:$4 sm:$0xff]   ;;  %v7439_v9 = vld [vmem:[#allocation8 + $0x560] ss:$16 sps:$4 sm:$0xff]  }
 0x260   : > { %5223 = vmatprep.subr.bf16.mxu1 %v7348_v59  ;;  %v7406_v59 = vld [vmem:[#allocation8 + $0x4c0] ss:$16 sps:$4 sm:$0xff]  }
 0x262   : > { %5181 = vmatpush1.bf16.msra.mxu0 %v7343_v31  ;;  %v7411_v31 = vld [vmem:[#allocation8 + $0x4a4] ss:$16 sps:$4 sm:$0xff]  }
 0x263   : > { %5224 = vmatpush1.bf16.msra.mxu1 %v7346_v32  ;;  %5182 = vmatprep.subr.bf16.mxu0 %v7351_v36  ;;  %v7463_v32 = vld [vmem:[#allocation8 + $0x6c0] ss:$16 sps:$4 sm:$0xff]   ;;  %v7471_v36 = vld [vmem:[#allocation8 + $0x6a4] ss:$16 sps:$4 sm:$0xff]  }
 0x264   : > { %5225 = vmatprep.subr.bf16.mxu1 %v7354_v37  ;;  %v7409_v37 = vld [vmem:[#allocation8 + $0x4a0] ss:$16 sps:$4 sm:$0xff]  }
 0x266   : > { %5183 = vmatpush1.bf16.msra.mxu0 %v7349_v11  ;;  %v7414_v11 = vld [vmem:[#allocation8 + $0x484] ss:$16 sps:$4 sm:$0xff]  }
 0x267   : > { %5226 = vmatpush1.bf16.msra.mxu1 %v7352_v50  ;;  %5184 = vmatprep.subr.bf16.mxu0 %v7357_v39  ;;  %v7469_v50 = vld [vmem:[#allocation8 + $0x6a0] ss:$16 sps:$4 sm:$0xff]   ;;  %v7477_v39 = vld [vmem:[#allocation8 + $0x684] ss:$16 sps:$4 sm:$0xff]  }
 0x268   : > { %5227 = vmatprep.subr.bf16.mxu1 %v7360_v40  ;;  %v7412_v40 = vld [vmem:[#allocation8 + $0x480] ss:$16 sps:$4 sm:$0xff]  }
 0x26a   : > { %5185 = vmatpush2.bf16.msra.mxu0 %v7355_v42  ;;  %v7417_v42 = vld [vmem:[#allocation8 + $0x464] ss:$16 sps:$4 sm:$0xff]  }
 0x26b   : > { %5228 = vmatpush2.bf16.msra.mxu1 %v7358_v45  ;;  %5186 = vmatprep.subr.bf16.mxu0 %v7363_v46  ;;  %v7475_v45 = vld [vmem:[#allocation8 + $0x680] ss:$16 sps:$4 sm:$0xff]   ;;  %v7483_v46 = vld [vmem:[#allocation8 + $0x664] ss:$16 sps:$4 sm:$0xff]  }
 0x26c   : > { %5229 = vmatprep.subr.bf16.mxu1 %v7366_v49  ;;  %v7415_v49 = vld [vmem:[#allocation8 + $0x460] ss:$16 sps:$4 sm:$0xff]  }
 0x26e   : > { %5187 = vmatpush2.bf16.msra.mxu0 %v7361_v51  ;;  %v7420_v51 = vld [vmem:[#allocation8 + $0x444] ss:$16 sps:$4 sm:$0xff]  }
 0x26f   : > { %5230 = vmatpush2.bf16.msra.mxu1 %v7364_v54  ;;  %5188 = vmatprep.subr.bf16.mxu0 %v7369_v55  ;;  %v7481_v54 = vld [vmem:[#allocation8 + $0x660] ss:$16 sps:$4 sm:$0xff]   ;;  %v7489_v55 = vld [vmem:[#allocation8 + $0x644] ss:$16 sps:$4 sm:$0xff]  }
 0x270   : > { %5231 = vmatprep.subr.bf16.mxu1 %v7372_v0  ;;  %v7418_v0 = vld [vmem:[#allocation8 + $0x440] ss:$16 sps:$4 sm:$0xff]  }
 0x272   : > { %5189 = vmatpush2.bf16.msra.mxu0 %v7367_v41  ;;  %v7423_v41 = vld [vmem:[#allocation8 + $0x424] ss:$16 sps:$4 sm:$0xff]  }
 0x273   : > { %5232 = vmatpush2.bf16.msra.mxu1 %v7370_v56  ;;  %5190 = vmatprep.subr.bf16.mxu0 %v7375_v57  ;;  %v7487_v56 = vld [vmem:[#allocation8 + $0x640] ss:$16 sps:$4 sm:$0xff]   ;;  %v7495_v57 = vld [vmem:[#allocation8 + $0x624] ss:$16 sps:$4 sm:$0xff]  }
 0x274   : > { %5233 = vmatprep.subr.bf16.mxu1 %v7378_v58  ;;  %v7421_v58 = vld [vmem:[#allocation8 + $0x420] ss:$16 sps:$4 sm:$0xff]  }
 0x276   : > { %5191 = vmatpush2.bf16.msra.mxu0 %v7373_v61  ;;  %v7426_v61 = vld [vmem:[#allocation8 + $0x404] ss:$16 sps:$4 sm:$0xff]  }
 0x277   : > { %5234 = vmatpush2.bf16.msra.mxu1 %v7376_v62  ;;  %5192 = vmatprep.subr.bf16.mxu0 %v7381_v63  ;;  %v7493_v62 = vld [vmem:[#allocation8 + $0x620] ss:$16 sps:$4 sm:$0xff]   ;;  %v7501_v63 = vld [vmem:[#allocation8 + $0x604] ss:$16 sps:$4 sm:$0xff]  }
 0x278   : > { %5235 = vmatprep.subr.bf16.mxu1 %v7384_v3  ;;  %v7429_v3 = vld [vmem:[#allocation8 + $0x5e4] ss:$16 sps:$4 sm:$0xff]  }
 0x27a   : > { %5193 = vmatpush2.bf16.msra.mxu0 %v7379_v5  ;;  %v7507_v5 = vld [vmem:[#allocation8 + $0x7e4] ss:$16 sps:$4 sm:$0xff]  }
 0x27b   : > { %5236 = vmatpush2.bf16.msra.mxu1 %v7382_v30  ;;  %5194 = vmatprep.subr.bf16.mxu0 %v7387_v7  ;;  %v7427_v30 = vld [vmem:[#allocation8 + $0x5e0] ss:$16 sps:$4 sm:$0xff]   ;;  %v7432_v7 = vld [vmem:[#allocation8 + $0x5c4] ss:$16 sps:$4 sm:$0xff]  }
 0x27c   : > { %5237 = vmatprep.subr.bf16.mxu1 %v7390_v13  ;;  %v7513_v13 = vld [vmem:[#allocation8 + $0x7c4] ss:$16 sps:$4 sm:$0xff]  }
 0x27e   : > { %5195 = vmatpush2.bf16.msra.mxu0 %v7385_v14  ;;  %v7435_v14 = vld [vmem:[#allocation8 + $0x5a4] ss:$16 sps:$4 sm:$0xff]  }
 0x27f   : > { %5238 = vmatpush2.bf16.msra.mxu1 %v7388_v47  ;;  %5196 = vmatprep.subr.bf16.mxu0 %v7393_v19  ;;  %v7511_v47 = vld [vmem:[#allocation8 + $0x7c0] ss:$16 sps:$4 sm:$0xff]   ;;  %v7519_v19 = vld [vmem:[#allocation8 + $0x7a4] ss:$16 sps:$4 sm:$0xff]  }
 0x280   : > { %5239 = vmatprep.subr.bf16.mxu1 %v7396_v43  ;;  %v7433_v43 = vld [vmem:[#allocation8 + $0x5a0] ss:$16 sps:$4 sm:$0xff]  }
 0x282   : > { %5197 = vmatpush2.bf16.msra.mxu0 %v7391_v15  ;;  %v3303_v33 = vpop.f32.mrf.mxu1  ;;  %v7517_v15 = vld [vmem:[#allocation8 + $0x7a0] ss:$16 sps:$4 sm:$0xff]  }
 0x283   : > { %5240 = vmatpush2.bf16.msra.mxu1 %v7394_v52  ;;  %5198 = vmatprep.subr.bf16.mxu0 %v7399_v17  ;;  %v7525_v52 = vld [vmem:[#allocation8 + $0x784] ss:$16 sps:$4 sm:$0xff]  }
 0x284   : > { %5241 = vmatprep.subr.bf16.mxu1 %v7402_v48  ;;  %v3305_v17 = vpop.f32.mrf.mxu1  ;;  %v3260_v48 = vpop.f32.mrf.mxu0 }
 0x286   : > { %5199 = vmatpush2.bf16.msra.mxu0 %v7397_v35  ;;  %v7523_v35 = vld [vmem:[#allocation8 + $0x780] ss:$16 sps:$4 sm:$0xff]   ;;  %v3307_v22 = vpop.f32.mrf.mxu1 }
 0x287   : > { %5242 = vmatpush2.bf16.msra.mxu1 %v7400_v20  ;;  %5254 = vmatprep.subr.bf16.mxu0 %v7405_v24  ;;  %v7531_v20 = vld [vmem:[#allocation8 + $0x764] ss:$16 sps:$4 sm:$0xff]   ;;  %v896_v24 = vsub.s32 4, %v8430_v60 }
 0x288   : > { %5297 = vmatprep.subr.bf16.mxu1 %v7459_v34  ;;  %v900_v34 = vsub.s32 5, %v8430_v60 }
 0x289   : > { %5201 = vmatmul.mubr.bf16.vlgmr.msra.gmra.mxu0 %v8466_v53 }
 0x28a   : > { %5244 = vmatmul.mubr.bf16.vlgmr.msra.gmra.mxu1 %v8525_v27  ;;  %5255 = vmatpush1.bf16.msra.mxu0 %v7403_v25  ;;  %v3262_v25 = vpop.f32.mrf.mxu0 }
 0x28b   : > { %5256 = vmatprep.subr.bf16.mxu0 %v7408_v12  ;;  %5298 = vmatpush1.bf16.msra.mxu1 %v7457_v26  ;;  %v7444_v12 = vld [vmem:[#allocation8 + $0x544] ss:$16 sps:$4 sm:$0xff]   ;;  %v7529_v26 = vld [vmem:[#allocation8 + $0x760] ss:$16 sps:$4 sm:$0xff]  }
 0x28c   : > { %5299 = vmatprep.subr.bf16.mxu1 %v7465_v28  ;;  %v7537_v28 = vld [vmem:[#allocation8 + $0x744] ss:$16 sps:$4 sm:$0xff]  }
 0x28e   : > { %5257 = vmatpush1.bf16.msra.mxu0 %v7406_v59  ;;  %v8531_v59 = vld [vmem:[#allocation7] sm:$0xff] }
 0x28f   : > { %5258 = vmatprep.subr.bf16.mxu0 %v7411_v31  ;;  %5300 = vmatpush1.bf16.msra.mxu1 %v7463_v32  ;;  %v897_v31 = vrot.slane %v8531_v59, %v896_v24  ;;  %v3309_v32 = vpop.f32.mrf.mxu1 }
 0x290   : > { %5301 = vmatprep.subr.bf16.mxu1 %v7471_v36  ;;  %v901_v36 = vrot.slane %v8531_v59, %v900_v34 }
 0x292   : > { %5259 = vmatpush1.bf16.msra.mxu0 %v7409_v37  ;;  %v7442_v37 = vld [vmem:[#allocation8 + $0x540] ss:$16 sps:$4 sm:$0xff]  }
 0x293   : > { %5260 = vmatprep.subr.bf16.mxu0 %v7414_v11  ;;  %5302 = vmatpush1.bf16.msra.mxu1 %v7469_v50  ;;  %v3264_v11 = vpop.f32.mrf.mxu0  ;;  %v7447_v50 = vld [vmem:[#allocation8 + $0x524] ss:$16 sps:$4 sm:$0xff]  }
 0x294   : > { %5303 = vmatprep.subr.bf16.mxu1 %v7477_v39  ;;  %v7535_v39 = vld [vmem:[#allocation8 + $0x740] ss:$16 sps:$4 sm:$0xff]  }
 0x296   : > { %5261 = vmatpush1.bf16.msra.mxu0 %v7412_v40  ;;  %v7543_v40 = vld [vmem:[#allocation8 + $0x724] ss:$16 sps:$4 sm:$0xff]  }
 0x297   : > { %5262 = vmatprep.subr.bf16.mxu0 %v7417_v42  ;;  %5304 = vmatpush1.bf16.msra.mxu1 %v7475_v45  ;;  %v3261_v42 = vadd.f32 %v3260_v48, %v897_v31  ;;  %v3389_v45 = vpop.f32.mrf.mxu1 }
 0x298   : > { %5305 = vmatprep.subr.bf16.mxu1 %v7483_v46  ;;  %v3263_v46 = vadd.f32 %v3262_v25, %v901_v36  ;;  %v7451_v25 = vld [vmem:[#allocation8 + $0xe8] ss:$16 sps:$4 sm:$0xff]  }
 0x29a   : > { %5263 = vmatpush1.bf16.msra.mxu0 %v7415_v49  ;;  %v7445_v49 = vld [vmem:[#allocation8 + $0x520] ss:$16 sps:$4 sm:$0xff]  }
 0x29b   : > { %5264 = vmatprep.subr.bf16.mxu0 %v7420_v51  ;;  %5306 = vmatpush1.bf16.msra.mxu1 %v7481_v54  ;;  %v3266_v51 = vpop.f32.mrf.mxu0  ;;  %v7450_v54 = vld [vmem:[#allocation8 + $0x504] ss:$16 sps:$4 sm:$0xff]  }
 0x29c   : > { %5307 = vmatprep.subr.bf16.mxu1 %v7489_v55  ;;  %v7541_v55 = vld [vmem:[#allocation8 + $0x720] ss:$16 sps:$4 sm:$0xff]  }
 0x29e   : > { %5265 = vmatpush1.bf16.msra.mxu0 %v7418_v0  ;;  %v3265_v0 = vadd.f32 %v3264_v11, %v897_v31  ;;  %v7462_v31 = vld [vmem:[#allocation8 + $0xac] ss:$16 sps:$4 sm:$0xff]  }
 0x29f   : > { %5266 = vmatprep.subr.bf16.mxu0 %v7423_v41  ;;  %5308 = vmatpush1.bf16.msra.mxu1 %v7487_v56  ;;  %v7549_v41 = vld [vmem:[#allocation8 + $0x704] ss:$16 sps:$4 sm:$0xff]   ;;  %v3304_v56 = vadd.f32 %v3303_v33, %v3261_v42  ;;  %v7474_v11 = vld [vmem:[#allocation8 + $0x6c] ss:$16 sps:$4 sm:$0xff]  }
 0x2a0   : > { %5309 = vmatprep.subr.bf16.mxu1 %v7495_v57  ;;  %v3391_v57 = vpop.f32.mrf.mxu1  ;;  %v7486_v42 = vld [vmem:[#allocation8 + $0x2c] ss:$16 sps:$4 sm:$0xff]  }
 0x2a2   : > { %5267 = vmatpush1.bf16.msra.mxu0 %v7421_v58 }
 0x2a3   : > { %5268 = vmatprep.subr.bf16.mxu0 %v7426_v61  ;;  %5310 = vmatpush1.bf16.msra.mxu1 %v7493_v62  ;;  %v3306_v61 = vadd.f32 %v3305_v17, %v3263_v46  ;;  %v3267_v62 = vadd.f32 %v3266_v51, %v901_v36  ;;  %v7468_v36 = vld [vmem:[#allocation8 + $0x8c] ss:$16 sps:$4 sm:$0xff]   ;;  %v7490_v46 = vld [vmem:[#allocation8 + $0x8] ss:$16 sps:$4 sm:$0xff]  }
 0x2a4   : > { %5311 = vmatprep.subr.bf16.mxu1 %v7501_v63  ;;  %v7448_v63 = vld [vmem:[#allocation8 + $0x500] ss:$16 sps:$4 sm:$0xff]   ;;  %v7496_v51 = vld [vmem:[#allocation8 + $0x1e8] ss:$16 sps:$4 sm:$0xff]  }
 0x2a6   : > { %5269 = vmatpush1.bf16.msra.mxu0 %v7424_v2 }
 0x2a7   : > { %5270 = vmatprep.subr.bf16.mxu0 %v7429_v3  ;;  %5312 = vmatpush1.bf16.msra.mxu1 %v7499_v4  ;;  %v7453_v4 = vld [vmem:[#allocation8 + $0xec] ss:$16 sps:$4 sm:$0xff]  }
 0x2a8   : > { %5313 = vmatprep.subr.bf16.mxu1 %v7507_v5  ;;  %v7547_v5 = vld [vmem:[#allocation8 + $0x700] ss:$16 sps:$4 sm:$0xff]  }
 0x2aa   : > { %5271 = vmatpush2.bf16.msra.mxu0 %v7427_v30  ;;  %v3308_v30 = vadd.f32 %v3307_v22, %v3265_v0  ;;  %v7510_v0 = vld [vmem:[#allocation8 + $0x1ac] ss:$16 sps:$4 sm:$0xff]  }
 0x2ab   : > { %5272 = vmatprep.subr.bf16.mxu0 %v7432_v7  ;;  %5314 = vmatpush2.bf16.msra.mxu1 %v7505_v10  ;;  %v7555_v10 = vld [vmem:[#allocation8 + $0x2ec] ss:$16 sps:$4 sm:$0xff]  }
 0x2ac   : > { %5315 = vmatprep.subr.bf16.mxu1 %v7513_v13  ;;  %v3393_v13 = vpop.f32.mrf.mxu1 }
 0x2ae   : > { %5273 = vmatpush2.bf16.msra.mxu0 %v7430_v44 }
 0x2af   : > { %5274 = vmatprep.subr.bf16.mxu0 %v7435_v14  ;;  %5316 = vmatpush2.bf16.msra.mxu1 %v7511_v47  ;;  %v3310_v14 = vadd.f32 %v3309_v32, %v3267_v62  ;;  %v7460_v32 = vld [vmem:[#allocation8 + $0xa8] ss:$16 sps:$4 sm:$0xff]   ;;  %v904_v62 = vsub.s32 6, %v8430_v60 }
 0x2b0   : > { %5317 = vmatprep.subr.bf16.mxu1 %v7519_v19 }
 0x2b2   : > { %5275 = vmatpush2.bf16.msra.mxu0 %v7433_v43 }
 0x2b3   : > { %5276 = vmatprep.subr.bf16.mxu0 %v7438_v21  ;;  %5318 = vmatpush2.bf16.msra.mxu1 %v7517_v15 }
 0x2b4   : > { %5319 = vmatprep.subr.bf16.mxu1 %v7525_v52  ;;  %v3395_v52 = vpop.f32.mrf.mxu1 }
 0x2b6   : > { %5277 = vmatpush2.bf16.msra.mxu0 %v7436_v18 }
 0x2b7   : > { %5278 = vmatprep.subr.bf16.mxu0 %v7441_v38  ;;  %5320 = vmatpush2.bf16.msra.mxu1 %v7523_v35 }
 0x2b8   : > { %5321 = vmatprep.subr.bf16.mxu1 %v7531_v20 }
 0x2ba   : > { %5279 = vmatpush2.bf16.msra.mxu0 %v7439_v9 }
 0x2bb   : > { %5280 = vmatprep.subr.bf16.mxu0 %v7444_v12  ;;  %5322 = vmatpush2.bf16.msra.mxu1 %v7529_v26  ;;  %v7456_v26 = vld [vmem:[#allocation8 + $0xcc] ss:$16 sps:$4 sm:$0xff]  }
 0x2bc   : > { %5323 = vmatprep.subr.bf16.mxu1 %v7537_v28  ;;  %v7454_v28 = vld [vmem:[#allocation8 + $0xc8] ss:$16 sps:$4 sm:$0xff]  }
 0x2be   : > { %5281 = vmatpush2.bf16.msra.mxu0 %v7442_v37  ;;  %v7466_v37 = vld [vmem:[#allocation8 + $0x88] ss:$16 sps:$4 sm:$0xff]  }
 0x2bf   : > { %5282 = vmatprep.subr.bf16.mxu0 %v7447_v50  ;;  %5324 = vmatpush2.bf16.msra.mxu1 %v7535_v39  ;;  %v7472_v50 = vld [vmem:[#allocation8 + $0x68] ss:$16 sps:$4 sm:$0xff]   ;;  %v7480_v39 = vld [vmem:[#allocation8 + $0x4c] ss:$16 sps:$4 sm:$0xff]  }
 0x2c0   : > { %5325 = vmatprep.subr.bf16.mxu1 %v7543_v40  ;;  %v7478_v40 = vld [vmem:[#allocation8 + $0x48] ss:$16 sps:$4 sm:$0xff]  }
 0x2c1   : > { %v3346_v58 = vpop.f32.mrf.mxu0 }
 0x2c2   : > { %5283 = vmatpush2.bf16.msra.mxu0 %v7445_v49  ;;  %v3347_v2 = vadd.f32 %v3346_v58, %v3304_v56  ;;  %v7498_v49 = vld [vmem:[#allocation8 + $0x1ec] ss:$16 sps:$4 sm:$0xff]   ;;  %v7514_v58 = vld [vmem:[#allocation8 + $0x188] ss:$16 sps:$4 sm:$0xff]  }
 0x2c3   : > { %v3348_v3 = vpop.f32.mrf.mxu0  ;;  %5284 = vmatprep.subr.bf16.mxu0 %v7450_v54  ;;  %5326 = vmatpush2.bf16.msra.mxu1 %v7541_v55  ;;  %v7504_v54 = vld [vmem:[#allocation8 + $0x1cc] ss:$16 sps:$4 sm:$0xff]   ;;  %v7502_v55 = vld [vmem:[#allocation8 + $0x1c8] ss:$16 sps:$4 sm:$0xff]  }
 0x2c4   : > { %v3349_v7 = vadd.f32 %v3348_v3, %v3306_v61  ;;  %5327 = vmatprep.subr.bf16.mxu1 %v7549_v41  ;;  %v3390_v33 = vadd.f32 %v3389_v45, %v3347_v2  ;;  %v7492_v45 = vld [vmem:[#allocation8 + $0xc] ss:$16 sps:$4 sm:$0xff]   ;;  %v7508_v41 = vld [vmem:[#allocation8 + $0x1a8] ss:$16 sps:$4 sm:$0xff]   ;;  %v908_v3 = vsub.s32 7, %v8430_v60 }
 0x2c5   : > { %v3350_v44 = vpop.f32.mrf.mxu0  ;;  %v7516_v56 = vld [vmem:[#allocation8 + $0x18c] ss:$16 sps:$4 sm:$0xff]   ;;  %v7520_v2 = vld [vmem:[#allocation8 + $0x168] ss:$16 sps:$4 sm:$0xff]  }
 0x2c6   : > { %v3392_v47 = vadd.f32 %v3391_v57, %v3349_v7  ;;  %v3351_v19 = vadd.f32 %v3350_v44, %v3308_v30  ;;  %5285 = vmatpush2.bf16.msra.mxu0 %v7448_v63  ;;  %v3574_v38 = vmul.f32 0.2, %v3390_v33  ;;  %v7522_v61 = vld [vmem:[#allocation8 + $0x16c] ss:$16 sps:$4 sm:$0xff]   ;;  %v905_v7 = vrot.slane %v8531_v59, %v904_v62 }
 0x2c7   : > { %v3352_v43 = vpop.f32.mrf.mxu0  ;;  %5340 = vmatprep.subr.bf16.mxu0 %v7453_v4  ;;  %5328 = vmatpush2.bf16.msra.mxu1 %v7547_v5  ;;  %v7528_v5 = vld [vmem:[#allocation8 + $0x14c] ss:$16 sps:$4 sm:$0xff]   ;;  %v909_v44 = vrot.slane %v8531_v59, %v908_v3  ;;  %v7538_v59 = vld [vmem:[#allocation8 + $0x108] ss:$16 sps:$4 sm:$0xff]  }
 0x2c8   : > { %v3394_v21 = vadd.f32 %v3393_v13, %v3351_v19  ;;  %v3353_v15 = vadd.f32 %v3352_v43, %v3310_v14  ;;  %5383 = vmatprep.subr.bf16.mxu1 %v7555_v10  ;;  %v3575_v17 = vmul.f32 0.2, %v3392_v47  ;;  %v3590_v34 = vmax.f32 %v3390_v33, %v3574_v38  ;;  %v7526_v13 = vld [vmem:[#allocation8 + $0x148] ss:$16 sps:$4 sm:$0xff]  }
 0x2c9   : > { %v7553_v3 = vld [vmem:[#allocation8 + $0x2e8] ss:$16 sps:$4 sm:$0xff]  }
 0x2ca   : > { %v3582_v18 = vmul.f32 0.2, %v3394_v21  ;;  %v3396_v48 = vadd.f32 %v3395_v52, %v3353_v15  ;;  %v3591_v24 = vmax.f32 %v3392_v47, %v3575_v17  ;;  %v3432_v57 = vpop.f32.mrf.mxu1  ;;  %v7534_v47 = vld [vmem:[#allocation8 + $0x12c] ss:$16 sps:$4 sm:$0xff]  }
 0x2cb   : > { %v3433_v33 = vadd.f32 %v3432_v57, %v905_v7  ;;  %v7540_v17 = vld [vmem:[#allocation8 + $0x10c] ss:$16 sps:$4 sm:$0xff]  }
 0x2cc   : > { %v3583_v35 = vmul.f32 0.2, %v3396_v48  ;;  %v3598_v20 = vmax.f32 %v3394_v21, %v3582_v18  ;;  %v3434_v63 = vpop.f32.mrf.mxu1  ;;  %v7532_v21 = vld [vmem:[#allocation8 + $0x128] ss:$16 sps:$4 sm:$0xff]  }
 0x2cd   : > { %v3435_v15 = vadd.f32 %v3434_v63, %v909_v44  ;;  %v7556_v63 = vld [vmem:[#allocation8 + $0x4a8] ss:$16 sps:$4 sm:$0xff]  }
 0x2ce   : > { %v3599_v22 = vmax.f32 %v3396_v48, %v3583_v35  ;;  %v8537_v12 = vpack.c.bf16 %v3598_v20, %v3590_v34  ;;  %v3436_v10 = vpop.f32.mrf.mxu1 }
 0x2cf   : > { %v3437_v38 = vadd.f32 %v3436_v10, %v905_v7  ;;  %v7570_v7 = vld [vmem:[#allocation8 + $0x46c] ss:$16 sps:$4 sm:$0xff]  }
 0x2d0   : > { %v8535_v9 = vpack.c.bf16 %v3599_v22, %v3591_v24  ;;  %v3438_v43 = vpop.f32.mrf.mxu1  ;;  %v7567_v10 = vld [vmem:[#allocation8 + $0x2ac] ss:$16 sps:$4 sm:$0xff]  }
 0x2d1   : > { %v3439_v34 = vadd.f32 %v3438_v43, %v909_v44  ;;  %v7565_v44 = vld [vmem:[#allocation8 + $0x2a8] ss:$16 sps:$4 sm:$0xff]   ;;  %v7582_v43 = vld [vmem:[#allocation8 + $0x42c] ss:$16 sps:$4 sm:$0xff]  }
 0x2d2   : > { %5286 = vmatprep.mubr.bf16.mxu0 %v8535_v9 }
 0x2d3   : > { %5287 = vmatmul.mubr.bf16.vlgmr.msra.gmra.mxu0 %v8537_v12 }
 0x2d4   : > { %5341 = vmatpush1.bf16.msra.mxu0 %v7451_v25  ;;  %5372 = vmatprep.mubr.bf16.mxu0 %v8510_v1  ;;  %v7484_v1 = vld [vmem:[#allocation8 + $0x28] ss:$16 sps:$4 sm:$0xff]  }
 0x2d5   : > { %5342 = vmatprep.subr.bf16.mxu0 %v7456_v26 }
 0x2d8   : > { %5343 = vmatpush1.bf16.msra.mxu0 %v7454_v28 }
 0x2d9   : > { %5344 = vmatprep.subr.bf16.mxu0 %v7462_v31  ;;  %v7546_v31 = vld [vmem:[#allocation8 + $0x4ec] ss:$16 sps:$4 sm:$0xff]  }
 0x2dc   : > { %5345 = vmatpush1.bf16.msra.mxu0 %v7460_v32 }
 0x2dd   : > { %5346 = vmatprep.subr.bf16.mxu0 %v7468_v36 }
 0x2e0   : > { %5347 = vmatpush1.bf16.msra.mxu0 %v7466_v37 }
 0x2e1   : > { %5348 = vmatprep.subr.bf16.mxu0 %v7474_v11 }
 0x2e4   : > { %5349 = vmatpush1.bf16.msra.mxu0 %v7472_v50 }
 0x2e5   : > { %5350 = vmatprep.subr.bf16.mxu0 %v7480_v39 }
 0x2e8   : > { %5351 = vmatpush1.bf16.msra.mxu0 %v7478_v40 }
 0x2e9   : > { %5352 = vmatprep.subr.bf16.mxu0 %v7486_v42  ;;  %v7544_v42 = vld [vmem:[#allocation8 + $0x4e8] ss:$16 sps:$4 sm:$0xff]  }
 0x2ec   : > { %5353 = vmatpush1.bf16.msra.mxu0 %v7484_v1 }
 0x2ed   : > { %5354 = vmatprep.subr.bf16.mxu0 %v7492_v45 }
 0x2f0   : > { %5355 = vmatpush1.bf16.msra.mxu0 %v7490_v46  ;;  %v7552_v46 = vld [vmem:[#allocation8 + $0x4cc] ss:$16 sps:$4 sm:$0xff]  }
 0x2f1   : > { %5356 = vmatprep.subr.bf16.mxu0 %v7498_v49 }
 0x2f4   : > { %5357 = vmatpush2.bf16.msra.mxu0 %v7496_v51 }
 0x2f5   : > { %5358 = vmatprep.subr.bf16.mxu0 %v7504_v54 }
 0x2f8   : > { %5359 = vmatpush2.bf16.msra.mxu0 %v7502_v55 }
 0x2f9   : > { %5360 = vmatprep.subr.bf16.mxu0 %v7510_v0  ;;  %v7550_v0 = vld [vmem:[#allocation8 + $0x4c8] ss:$16 sps:$4 sm:$0xff]  }
 0x2fc   : > { %5361 = vmatpush2.bf16.msra.mxu0 %v7508_v41 }
 0x2fd   : > { %5362 = vmatprep.subr.bf16.mxu0 %v7516_v56  ;;  %v7558_v56 = vld [vmem:[#allocation8 + $0x4ac] ss:$16 sps:$4 sm:$0xff]  }
 0x300   : > { %5363 = vmatpush2.bf16.msra.mxu0 %v7514_v58 }
 0x301   : > { %v3475_v4 = vpop.f32.mrf.mxu0  ;;  %5364 = vmatprep.subr.bf16.mxu0 %v7522_v61 }
 0x302   : > { %v3476_v18 = vadd.f32 %v3475_v4, %v3433_v33  ;;  %v7571_v33 = vld [vmem:[#allocation8 + $0x288] ss:$16 sps:$4 sm:$0xff]  }
 0x303   : > { %v3477_v30 = vpop.f32.mrf.mxu0 }
 0x304   : > { %5365 = vmatpush2.bf16.msra.mxu0 %v7520_v2  ;;  %v3478_v35 = vadd.f32 %v3477_v30, %v3435_v15  ;;  %v7559_v30 = vld [vmem:[#allocation8 + $0x2c8] ss:$16 sps:$4 sm:$0xff]  }
 0x305   : > { %v3479_v14 = vpop.f32.mrf.mxu0  ;;  %5366 = vmatprep.subr.bf16.mxu0 %v7528_v5  ;;  %v7564_v5 = vld [vmem:[#allocation8 + $0x48c] ss:$16 sps:$4 sm:$0xff]   ;;  %v7577_v15 = vld [vmem:[#allocation8 + $0x268] ss:$16 sps:$4 sm:$0xff]  }
 0x306   : > { %v3480_v25 = vadd.f32 %v3479_v14, %v3437_v38  ;;  %v7576_v14 = vld [vmem:[#allocation8 + $0x44c] ss:$16 sps:$4 sm:$0xff]  }
 0x307   : > { %v3481_v19 = vpop.f32.mrf.mxu0  ;;  %v7594_v38 = vld [vmem:[#allocation8 + $0x5ec] ss:$16 sps:$4 sm:$0xff]  }
 0x308   : > { %5367 = vmatpush2.bf16.msra.mxu0 %v7526_v13  ;;  %v3482_v36 = vadd.f32 %v3481_v19, %v3439_v34  ;;  %v7568_v13 = vld [vmem:[#allocation8 + $0x468] ss:$16 sps:$4 sm:$0xff]  }
 0x309   : > { %v3561_v52 = vpop.f32.mrf.mxu0  ;;  %5368 = vmatprep.subr.bf16.mxu0 %v7534_v47  ;;  %v7573_v47 = vld [vmem:[#allocation8 + $0x28c] ss:$16 sps:$4 sm:$0xff]   ;;  %v7574_v19 = vld [vmem:[#allocation8 + $0x448] ss:$16 sps:$4 sm:$0xff]  }
 0x30a   : > { %v3518_v48 = vpop.f32.mrf.mxu1  ;;  %v7598_v34 = vld [vmem:[#allocation8 + $0x5c8] ss:$16 sps:$4 sm:$0xff]  }
 0x30b   : > { %v3563_v20 = vpop.f32.mrf.mxu0  ;;  %v3519_v24 = vadd.f32 %v3518_v48, %v3476_v18  ;;  %v7586_v18 = vld [vmem:[#allocation8 + $0x408] ss:$16 sps:$4 sm:$0xff]  }
 0x30c   : > { %v3520_v22 = vpop.f32.mrf.mxu1  ;;  %5369 = vmatpush2.bf16.msra.mxu0 %v7532_v21  ;;  %v7580_v21 = vld [vmem:[#allocation8 + $0x428] ss:$16 sps:$4 sm:$0xff]  }
 0x30d   : > { %v3521_v26 = vadd.f32 %v3520_v22, %v3478_v35  ;;  %v3565_v28 = vpop.f32.mrf.mxu0  ;;  %5370 = vmatprep.subr.bf16.mxu0 %v7540_v17  ;;  %v3562_v50 = vadd.f32 %v3561_v52, %v3519_v24  ;;  %v7588_v52 = vld [vmem:[#allocation8 + $0x40c] ss:$16 sps:$4 sm:$0xff]   ;;  %v7583_v48 = vld [vmem:[#allocation8 + $0x248] ss:$16 sps:$4 sm:$0xff]  }
 0x30e   : > { %v3522_v32 = vpop.f32.mrf.mxu1  ;;  %v7585_v17 = vld [vmem:[#allocation8 + $0x24c] ss:$16 sps:$4 sm:$0xff]   ;;  %v7589_v24 = vld [vmem:[#allocation8 + $0x228] ss:$16 sps:$4 sm:$0xff]  }
 0x30f   : > { %v3564_v37 = vadd.f32 %v3563_v20, %v3521_v26  ;;  %v3523_v11 = vadd.f32 %v3522_v32, %v3480_v25  ;;  %v3567_v40 = vpop.f32.mrf.mxu0  ;;  %v3576_v55 = vmul.f32 0.2, %v3562_v50  ;;  %v7591_v35 = vld [vmem:[#allocation8 + $0x22c] ss:$16 sps:$4 sm:$0xff]   ;;  %v7592_v20 = vld [vmem:[#allocation8 + $0x5e8] ss:$16 sps:$4 sm:$0xff]  }
 0x310   : > { %v3524_v39 = vpop.f32.mrf.mxu1  ;;  %5371 = vmatpush2.bf16.msra.mxu0 %v7538_v59  ;;  %v7600_v22 = vld [vmem:[#allocation8 + $0x5cc] ss:$16 sps:$4 sm:$0xff]   ;;  %v7595_v25 = vld [vmem:[#allocation8 + $0x208] ss:$16 sps:$4 sm:$0xff]  }
 0x311   : > { %v3566_v1 = vadd.f32 %v3565_v28, %v3523_v11  ;;  %v3525_v45 = vadd.f32 %v3524_v39, %v3482_v36  ;;  %5426 = vmatprep.subr.bf16.mxu0 %v7546_v31  ;;  %v3577_v49 = vmul.f32 0.2, %v3564_v37  ;;  %v3592_v62 = vmax.f32 %v3562_v50, %v3576_v55  ;;  %v7597_v59 = vld [vmem:[#allocation8 + $0x20c] ss:$16 sps:$4 sm:$0xff]   ;;  %v7604_v31 = vld [vmem:[#allocation8 + $0x5a8] ss:$16 sps:$4 sm:$0xff]  }
 0x312   : > { %v7606_v26 = vld [vmem:[#allocation8 + $0x5ac] ss:$16 sps:$4 sm:$0xff]   ;;  %v7601_v32 = vld [vmem:[#allocation8 + $0x3e8] ss:$16 sps:$4 sm:$0xff]  }
 0x313   : > { %v3584_v51 = vmul.f32 0.2, %v3566_v1  ;;  %v3568_v54 = vadd.f32 %v3567_v40, %v3525_v45  ;;  %5373 = vmatmul.mubr.bf16.vlgmr.msra.gmra.mxu0 %v8466_v53  ;;  %v3593_v58 = vmax.f32 %v3564_v37, %v3577_v49  ;;  %v7561_v53 = vld [vmem:[#allocation8 + $0x2cc] ss:$16 sps:$4 sm:$0xff]   ;;  %v7610_v11 = vld [vmem:[#allocation8 + $0x588] ss:$16 sps:$4 sm:$0xff]  }
 0x314   : > { %5427 = vmatpush1.bf16.msra.mxu0 %v7544_v42  ;;  %5458 = vmatprep.mubr.bf16.mxu0 %v8535_v9  ;;  %v7562_v9 = vld [vmem:[#allocation8 + $0x488] ss:$16 sps:$4 sm:$0xff]   ;;  %v7603_v28 = vld [vmem:[#allocation8 + $0x3ec] ss:$16 sps:$4 sm:$0xff]  }
 0x315   : > { %v3585_v41 = vmul.f32 0.2, %v3568_v54  ;;  %5428 = vmatprep.subr.bf16.mxu0 %v7552_v46  ;;  %v3600_v57 = vmax.f32 %v3566_v1, %v3584_v51  ;;  %v7612_v36 = vld [vmem:[#allocation8 + $0x58c] ss:$16 sps:$4 sm:$0xff]   ;;  %v7607_v50 = vld [vmem:[#allocation8 + $0x3c8] ss:$16 sps:$4 sm:$0xff]  }
 0x316   : > { %v7609_v37 = vld [vmem:[#allocation8 + $0x3cc] ss:$16 sps:$4 sm:$0xff]   ;;  %v7616_v42 = vld [vmem:[#allocation8 + $0x568] ss:$16 sps:$4 sm:$0xff]  }
 0x317   : > { %v3601_v61 = vmax.f32 %v3568_v54, %v3585_v41  ;;  %v8550_v4 = vpack.c.bf16 %v3600_v57, %v3592_v62  ;;  %v7618_v39 = vld [vmem:[#allocation8 + $0x56c] ss:$16 sps:$4 sm:$0xff]   ;;  %v7613_v1 = vld [vmem:[#allocation8 + $0x3a8] ss:$16 sps:$4 sm:$0xff]  }
 0x318   : > { %5429 = vmatpush1.bf16.msra.mxu0 %v7550_v0  ;;  %v7615_v40 = vld [vmem:[#allocation8 + $0x3ac] ss:$16 sps:$4 sm:$0xff]   ;;  %v7622_v49 = vld [vmem:[#allocation8 + $0x548] ss:$16 sps:$4 sm:$0xff]  }
 0x319   : > { %v8548_v2 = vpack.c.bf16 %v3601_v61, %v3593_v58  ;;  %5430 = vmatprep.subr.bf16.mxu0 %v7558_v56  ;;  %v7624_v45 = vld [vmem:[#allocation8 + $0x54c] ss:$16 sps:$4 sm:$0xff]   ;;  %v7619_v51 = vld [vmem:[#allocation8 + $0x388] ss:$16 sps:$4 sm:$0xff]  }
 0x31a   : > { %v7621_v46 = vld [vmem:[#allocation8 + $0x38c] ss:$16 sps:$4 sm:$0xff]   ;;  %v7628_v0 = vld [vmem:[#allocation8 + $0x528] ss:$16 sps:$4 sm:$0xff]  }
 0x31b   : > { %5329 = vmatprep.mubr.bf16.mxu1 %v8548_v2  ;;  %v7630_v54 = vld [vmem:[#allocation8 + $0x52c] ss:$16 sps:$4 sm:$0xff]   ;;  %v7625_v41 = vld [vmem:[#allocation8 + $0x368] ss:$16 sps:$4 sm:$0xff]  }
 0x31c   : > { %5330 = vmatmul.mubr.bf16.vlgmr.msra.gmra.mxu1 %v8550_v4  ;;  %5431 = vmatpush1.bf16.msra.mxu0 %v7556_v63  ;;  %v7627_v55 = vld [vmem:[#allocation8 + $0x36c] ss:$16 sps:$4 sm:$0xff]   ;;  %v7634_v58 = vld [vmem:[#allocation8 + $0x508] ss:$16 sps:$4 sm:$0xff]  }
 0x31d   : > { %5384 = vmatpush1.bf16.msra.mxu1 %v7553_v3  ;;  %5415 = vmatprep.mubr.bf16.mxu1 %v8514_v16  ;;  %v7579_v16 = vld [vmem:[#allocation8 + $0x26c] ss:$16 sps:$4 sm:$0xff]   ;;  %v7631_v61 = vld [vmem:[#allocation8 + $0x348] ss:$16 sps:$4 sm:$0xff]  }
 0x31e   : > { %5385 = vmatprep.subr.bf16.mxu1 %v7561_v53  ;;  %5432 = vmatprep.subr.bf16.mxu0 %v7564_v5  ;;  %v7636_v56 = vld [vmem:[#allocation8 + $0x50c] ss:$16 sps:$4 sm:$0xff]   ;;  %v7693_v62 = vld [vmem:[#allocation11 + $0x74] ss:$8 sps:$4 sm:$0xff]   ;;  %v7696_v5 = vld [vmem:[#allocation11 + $0x64] ss:$8 sps:$4 sm:$0xff]  }
 0x31f   : > { %v7633_v57 = vld [vmem:[#allocation8 + $0x34c] ss:$16 sps:$4 sm:$0xff]   ;;  %v7637_v53 = vld [vmem:[#allocation8 + $0x328] ss:$16 sps:$4 sm:$0xff]  }
 0x320   : > { %5433 = vmatpush1.bf16.msra.mxu0 %v7562_v9  ;;  %v7639_v63 = vld [vmem:[#allocation8 + $0x32c] ss:$16 sps:$4 sm:$0xff]  }
 0x321   : > { %5386 = vmatpush1.bf16.msra.mxu1 %v7559_v30  ;;  %5434 = vmatprep.subr.bf16.mxu0 %v7570_v7  ;;  %v7691_v3 = vld [vmem:[#allocation11 + $0x70] ss:$8 sps:$4 sm:$0xff]   ;;  %v7694_v30 = vld [vmem:[#allocation11 + $0x60] ss:$8 sps:$4 sm:$0xff]   ;;  %v7640_v7 = vld [vmem:[#allocation8 + $0x308] ss:$16 sps:$4 sm:$0xff]  }
 0x322   : > { %5387 = vmatprep.subr.bf16.mxu1 %v7567_v10  ;;  %v7642_v9 = vld [vmem:[#allocation8 + $0x30c] ss:$16 sps:$4 sm:$0xff]   ;;  %v7699_v10 = vld [vmem:[#allocation11 + $0x54] ss:$8 sps:$4 sm:$0xff]  }
 0x324   : > { %5435 = vmatpush1.bf16.msra.mxu0 %v7568_v13  ;;  %v7645_v13 = vld [vmem:[#allocation8 + $0x6ec] ss:$16 sps:$4 sm:$0xff]  }
 0x325   : > { %5388 = vmatpush1.bf16.msra.mxu1 %v7565_v44  ;;  %5436 = vmatprep.subr.bf16.mxu0 %v7576_v14  ;;  %v7697_v44 = vld [vmem:[#allocation11 + $0x50] ss:$8 sps:$4 sm:$0xff]   ;;  %v7643_v14 = vld [vmem:[#allocation8 + $0x6e8] ss:$16 sps:$4 sm:$0xff]  }
 0x326   : > { %5389 = vmatprep.subr.bf16.mxu1 %v7573_v47  ;;  %v7648_v47 = vld [vmem:[#allocation8 + $0x6cc] ss:$16 sps:$4 sm:$0xff]  }
 0x328   : > { %5437 = vmatpush1.bf16.msra.mxu0 %v7574_v19  ;;  %v7702_v19 = vld [vmem:[#allocation11 + $0x44] ss:$8 sps:$4 sm:$0xff]  }
 0x329   : > { %5390 = vmatpush1.bf16.msra.mxu1 %v7571_v33  ;;  %5438 = vmatprep.subr.bf16.mxu0 %v7582_v43  ;;  %v7646_v33 = vld [vmem:[#allocation8 + $0x6c8] ss:$16 sps:$4 sm:$0xff]  }
 0x32a   : > { %5391 = vmatprep.subr.bf16.mxu1 %v7579_v16  ;;  %v7705_v43 = vld [vmem:[#allocation11 + $0x34] ss:$8 sps:$4 sm:$0xff]   ;;  %v7651_v16 = vld [vmem:[#allocation8 + $0x6ac] ss:$16 sps:$4 sm:$0xff]  }
 0x32c   : > { %5439 = vmatpush1.bf16.msra.mxu0 %v7580_v21  ;;  %v7703_v21 = vld [vmem:[#allocation11 + $0x30] ss:$8 sps:$4 sm:$0xff]  }
 0x32d   : > { %5392 = vmatpush1.bf16.msra.mxu1 %v7577_v15  ;;  %5440 = vmatprep.subr.bf16.mxu0 %v7588_v52  ;;  %v7649_v15 = vld [vmem:[#allocation8 + $0x6a8] ss:$16 sps:$4 sm:$0xff]  }
 0x32e   : > { %5393 = vmatprep.subr.bf16.mxu1 %v7585_v17  ;;  %v7708_v52 = vld [vmem:[#allocation11 + $0x24] ss:$8 sps:$4 sm:$0xff]   ;;  %v7654_v17 = vld [vmem:[#allocation8 + $0x68c] ss:$16 sps:$4 sm:$0xff]  }
 0x330   : > { %5441 = vmatpush1.bf16.msra.mxu0 %v7586_v18  ;;  %v7652_v18 = vld [vmem:[#allocation8 + $0x688] ss:$16 sps:$4 sm:$0xff]  }
 0x331   : > { %5394 = vmatpush1.bf16.msra.mxu1 %v7583_v48  ;;  %5442 = vmatprep.subr.bf16.mxu0 %v7594_v38  ;;  %v7711_v48 = vld [vmem:[#allocation11 + $0x14] ss:$8 sps:$4 sm:$0xff]   ;;  %v7709_v38 = vld [vmem:[#allocation11 + $0x10] ss:$8 sps:$4 sm:$0xff]  }
 0x332   : > { %5395 = vmatprep.subr.bf16.mxu1 %v7591_v35  ;;  %v7655_v35 = vld [vmem:[#allocation8 + $0x668] ss:$16 sps:$4 sm:$0xff]  }
 0x334   : > { %5443 = vmatpush2.bf16.msra.mxu0 %v7592_v20  ;;  %v7714_v20 = vld [vmem:[#allocation11 + $0x4] ss:$8 sps:$4 sm:$0xff]  }
 0x335   : > { %5396 = vmatpush1.bf16.msra.mxu1 %v7589_v24  ;;  %5444 = vmatprep.subr.bf16.mxu0 %v7600_v22  ;;  %v7660_v24 = vld [vmem:[#allocation8 + $0x64c] ss:$16 sps:$4 sm:$0xff]  }
 0x336   : > { %5397 = vmatprep.subr.bf16.mxu1 %v7597_v59  ;;  %v7712_v22 = vld [vmem:[#allocation11] ss:$8 sps:$4 sm:$0xff]   ;;  %v7658_v59 = vld [vmem:[#allocation8 + $0x648] ss:$16 sps:$4 sm:$0xff]  }
 0x338   : > { %5445 = vmatpush2.bf16.msra.mxu0 %v7598_v34  ;;  %v7717_v34 = vld [vmem:[#allocation11 + $0xf4] ss:$8 sps:$4 sm:$0xff]  }
 0x339   : > { %5398 = vmatpush1.bf16.msra.mxu1 %v7595_v25  ;;  %5446 = vmatprep.subr.bf16.mxu0 %v7606_v26  ;;  %v7663_v25 = vld [vmem:[#allocation8 + $0x62c] ss:$16 sps:$4 sm:$0xff]  }
 0x33a   : > { %5399 = vmatprep.subr.bf16.mxu1 %v7603_v28  ;;  %v7715_v26 = vld [vmem:[#allocation11 + $0xf0] ss:$8 sps:$4 sm:$0xff]   ;;  %v7661_v28 = vld [vmem:[#allocation8 + $0x628] ss:$16 sps:$4 sm:$0xff]  }
 0x33c   : > { %5447 = vmatpush2.bf16.msra.mxu0 %v7604_v31  ;;  %v7720_v31 = vld [vmem:[#allocation11 + $0xe4] ss:$8 sps:$4 sm:$0xff]  }
 0x33d   : > { %5400 = vmatpush2.bf16.msra.mxu1 %v7601_v32  ;;  %5448 = vmatprep.subr.bf16.mxu0 %v7612_v36  ;;  %v7666_v32 = vld [vmem:[#allocation8 + $0x60c] ss:$16 sps:$4 sm:$0xff]  }
 0x33e   : > { %5401 = vmatprep.subr.bf16.mxu1 %v7609_v37  ;;  %v7718_v36 = vld [vmem:[#allocation11 + $0xe0] ss:$8 sps:$4 sm:$0xff]   ;;  %v7664_v37 = vld [vmem:[#allocation8 + $0x608] ss:$16 sps:$4 sm:$0xff]  }
 0x340   : > { %5449 = vmatpush2.bf16.msra.mxu0 %v7610_v11  ;;  %v7723_v11 = vld [vmem:[#allocation11 + $0xd4] ss:$8 sps:$4 sm:$0xff]  }
 0x341   : > { %5402 = vmatpush2.bf16.msra.mxu1 %v7607_v50  ;;  %5450 = vmatprep.subr.bf16.mxu0 %v7618_v39  ;;  %v7669_v50 = vld [vmem:[#allocation8 + $0x7ec] ss:$16 sps:$4 sm:$0xff]  }
 0x342   : > { %5403 = vmatprep.subr.bf16.mxu1 %v7615_v40  ;;  %v7721_v39 = vld [vmem:[#allocation11 + $0xd0] ss:$8 sps:$4 sm:$0xff]   ;;  %v7667_v40 = vld [vmem:[#allocation8 + $0x7e8] ss:$16 sps:$4 sm:$0xff]  }
 0x344   : > { %5451 = vmatpush2.bf16.msra.mxu0 %v7616_v42  ;;  %v7726_v42 = vld [vmem:[#allocation11 + $0xc4] ss:$8 sps:$4 sm:$0xff]  }
 0x345   : > { %5404 = vmatpush2.bf16.msra.mxu1 %v7613_v1  ;;  %5452 = vmatprep.subr.bf16.mxu0 %v7624_v45  ;;  %v7672_v1 = vld [vmem:[#allocation8 + $0x7cc] ss:$16 sps:$4 sm:$0xff]  }
 0x346   : > { %5405 = vmatprep.subr.bf16.mxu1 %v7621_v46  ;;  %v7724_v45 = vld [vmem:[#allocation11 + $0xc0] ss:$8 sps:$4 sm:$0xff]   ;;  %v7670_v46 = vld [vmem:[#allocation8 + $0x7c8] ss:$16 sps:$4 sm:$0xff]  }
 0x348   : > { %5453 = vmatpush2.bf16.msra.mxu0 %v7622_v49  ;;  %v7729_v49 = vld [vmem:[#allocation11 + $0xb4] ss:$8 sps:$4 sm:$0xff]  }
 0x349   : > { %5406 = vmatpush2.bf16.msra.mxu1 %v7619_v51  ;;  %5454 = vmatprep.subr.bf16.mxu0 %v7630_v54  ;;  %v7675_v51 = vld [vmem:[#allocation8 + $0x7ac] ss:$16 sps:$4 sm:$0xff]  }
 0x34a   : > { %5407 = vmatprep.subr.bf16.mxu1 %v7627_v55  ;;  %v7727_v54 = vld [vmem:[#allocation11 + $0xb0] ss:$8 sps:$4 sm:$0xff]   ;;  %v7673_v55 = vld [vmem:[#allocation8 + $0x7a8] ss:$16 sps:$4 sm:$0xff]  }
 0x34c   : > { %5455 = vmatpush2.bf16.msra.mxu0 %v7628_v0  ;;  %v7732_v0 = vld [vmem:[#allocation11 + $0xa4] ss:$8 sps:$4 sm:$0xff]  }
 0x34d   : > { %5408 = vmatpush2.bf16.msra.mxu1 %v7625_v41  ;;  %5456 = vmatprep.subr.bf16.mxu0 %v7636_v56  ;;  %v7678_v41 = vld [vmem:[#allocation8 + $0x78c] ss:$16 sps:$4 sm:$0xff]  }
 0x34e   : > { %5409 = vmatprep.subr.bf16.mxu1 %v7633_v57  ;;  %v7730_v56 = vld [vmem:[#allocation11 + $0xa0] ss:$8 sps:$4 sm:$0xff]   ;;  %v7676_v57 = vld [vmem:[#allocation8 + $0x788] ss:$16 sps:$4 sm:$0xff]  }
 0x350   : > { %5457 = vmatpush2.bf16.msra.mxu0 %v7634_v58  ;;  %v7735_v58 = vld [vmem:[#allocation11 + $0x94] ss:$8 sps:$4 sm:$0xff]  }
 0x351   : > { %5410 = vmatpush2.bf16.msra.mxu1 %v7631_v61  ;;  %5928 = vmatprep.subr.bf16.mxu0 %v7693_v62  ;;  %v7681_v61 = vld [vmem:[#allocation8 + $0x76c] ss:$16 sps:$4 sm:$0xff]  }
 0x352   : > { %5411 = vmatprep.subr.bf16.mxu1 %v7639_v63  ;;  %v7733_v62 = vld [vmem:[#allocation11 + $0x90] ss:$8 sps:$4 sm:$0xff]   ;;  %v7679_v63 = vld [vmem:[#allocation8 + $0x768] ss:$16 sps:$4 sm:$0xff]  }
 0x353   : > { %5459 = vmatmul.mubr.bf16.vlgmr.msra.gmra.mxu0 %v8537_v12  ;;  %v7700_v12 = vld [vmem:[#allocation11 + $0x40] ss:$8 sps:$4 sm:$0xff]  }
 0x354   : > { %5929 = vmatpush1.bf16.msra.mxu0 %v7691_v3  ;;  %v7738_v3 = vld [vmem:[#allocation11 + $0x84] ss:$8 sps:$4 sm:$0xff]  }
 0x355   : > { %5412 = vmatpush2.bf16.msra.mxu1 %v7637_v53  ;;  %5930 = vmatprep.subr.bf16.mxu0 %v7696_v5  ;;  %v7684_v53 = vld [vmem:[#allocation8 + $0x74c] ss:$16 sps:$4 sm:$0xff]  }
 0x356   : > { %5413 = vmatprep.subr.bf16.mxu1 %v7642_v9  ;;  %v7736_v5 = vld [vmem:[#allocation11 + $0x80] ss:$8 sps:$4 sm:$0xff]   ;;  %v7682_v9 = vld [vmem:[#allocation8 + $0x748] ss:$16 sps:$4 sm:$0xff]  }
 0x358   : > { %5931 = vmatpush1.bf16.msra.mxu0 %v7694_v30  ;;  %v7687_v30 = vld [vmem:[#allocation8 + $0x72c] ss:$16 sps:$4 sm:$0xff]  }
 0x359   : > { %5414 = vmatpush2.bf16.msra.mxu1 %v7640_v7  ;;  %5932 = vmatprep.subr.bf16.mxu0 %v7699_v10  ;;  %v7685_v7 = vld [vmem:[#allocation8 + $0x728] ss:$16 sps:$4 sm:$0xff]   ;;  %v7690_v10 = vld [vmem:[#allocation8 + $0x70c] ss:$16 sps:$4 sm:$0xff]  }
 0x35a   : > { %5469 = vmatprep.subr.bf16.mxu1 %v7645_v13  ;;  %v7688_v13 = vld [vmem:[#allocation8 + $0x708] ss:$16 sps:$4 sm:$0xff]  }
 0x35c   : > { %5416 = vmatmul.mubr.bf16.vlgmr.msra.gmra.mxu1 %v8525_v27  ;;  %5933 = vmatpush1.bf16.msra.mxu0 %v7697_v44  ;;  %v7706_v27 = vld [vmem:[#allocation11 + $0x20] ss:$8 sps:$4 sm:$0xff]   ;;  %v7739_v44 = vld [vmem:[#allocation11 + $0x170] ss:$8 sps:$4 sm:$0xff]  }
 0x35d   : > { %5470 = vmatpush1.bf16.msra.mxu1 %v7643_v14  ;;  %5501 = vmatprep.mubr.bf16.mxu1 %v8548_v2  ;;  %v7657_v2 = vld [vmem:[#allocation8 + $0x66c] ss:$16 sps:$4 sm:$0xff]   ;;  %v7741_v14 = vld [vmem:[#allocation11 + $0x174] ss:$8 sps:$4 sm:$0xff]  }
 0x35e   : > { %5471 = vmatprep.subr.bf16.mxu1 %v7648_v47  ;;  %5934 = vmatprep.subr.bf16.mxu0 %v7702_v19  ;;  %v7744_v47 = vld [vmem:[#allocation11 + $0x164] ss:$8 sps:$4 sm:$0xff]   ;;  %v7742_v19 = vld [vmem:[#allocation11 + $0x160] ss:$8 sps:$4 sm:$0xff]  }
 0x360   : > { %5935 = vmatpush1.bf16.msra.mxu0 %v7700_v12  ;;  %v7747_v12 = vld [vmem:[#allocation11 + $0x154] ss:$8 sps:$4 sm:$0xff]  }
 0x361   : > { %5472 = vmatpush1.bf16.msra.mxu1 %v7646_v33  ;;  %5936 = vmatprep.subr.bf16.mxu0 %v7705_v43  ;;  %v7745_v33 = vld [vmem:[#allocation11 + $0x150] ss:$8 sps:$4 sm:$0xff]   ;;  %v7750_v43 = vld [vmem:[#allocation11 + $0x144] ss:$8 sps:$4 sm:$0xff]  }
 0x362   : > { %5473 = vmatprep.subr.bf16.mxu1 %v7651_v16  ;;  %v7748_v16 = vld [vmem:[#allocation11 + $0x140] ss:$8 sps:$4 sm:$0xff]  }
 0x364   : > { %5937 = vmatpush1.bf16.msra.mxu0 %v7703_v21  ;;  %v7753_v21 = vld [vmem:[#allocation11 + $0x134] ss:$8 sps:$4 sm:$0xff]  }
 0x365   : > { %5474 = vmatpush1.bf16.msra.mxu1 %v7649_v15  ;;  %5938 = vmatprep.subr.bf16.mxu0 %v7708_v52  ;;  %v7751_v15 = vld [vmem:[#allocation11 + $0x130] ss:$8 sps:$4 sm:$0xff]   ;;  %v7754_v52 = vld [vmem:[#allocation11 + $0x120] ss:$8 sps:$4 sm:$0xff]  }
 0x366   : > { %5475 = vmatprep.subr.bf16.mxu1 %v7654_v17  ;;  %v7759_v17 = vld [vmem:[#allocation11 + $0x114] ss:$8 sps:$4 sm:$0xff]  }
 0x368   : > { %5939 = vmatpush1.bf16.msra.mxu0 %v7706_v27  ;;  %v7757_v27 = vld [vmem:[#allocation11 + $0x110] ss:$8 sps:$4 sm:$0xff]  }
 0x369   : > { %5476 = vmatpush1.bf16.msra.mxu1 %v7652_v18  ;;  %5940 = vmatprep.subr.bf16.mxu0 %v7711_v48  ;;  %v7762_v18 = vld [vmem:[#allocation11 + $0x104] ss:$8 sps:$4 sm:$0xff]   ;;  %v7760_v48 = vld [vmem:[#allocation11 + $0x100] ss:$8 sps:$4 sm:$0xff]  }
 0x36a   : > { %5477 = vmatprep.subr.bf16.mxu1 %v7657_v2  ;;  %v7765_v2 = vld [vmem:[#allocation11 + $0x1f4] ss:$8 sps:$4 sm:$0xff]  }
 0x36c   : > { %5941 = vmatpush1.bf16.msra.mxu0 %v7709_v38  ;;  %v7763_v38 = vld [vmem:[#allocation11 + $0x1f0] ss:$8 sps:$4 sm:$0xff]  }
 0x36d   : > { %5478 = vmatpush1.bf16.msra.mxu1 %v7655_v35  ;;  %5942 = vmatprep.subr.bf16.mxu0 %v7714_v20  ;;  %v7768_v35 = vld [vmem:[#allocation11 + $0x1e4] ss:$8 sps:$4 sm:$0xff]   ;;  %v5202_v20 = vpop.f32.mrf.mxu0 }
 0x36e   : > { %5479 = vmatprep.subr.bf16.mxu1 %v7660_v24  ;;  %v7766_v24 = vld [vmem:[#allocation11 + $0x1e0] ss:$8 sps:$4 sm:$0xff]  }
 0x370   : > { %5943 = vmatpush1.bf16.msra.mxu0 %v7712_v22  ;;  %v7771_v22 = vld [vmem:[#allocation11 + $0x1d4] ss:$8 sps:$4 sm:$0xff]  }
 0x371   : > { %5480 = vmatpush1.bf16.msra.mxu1 %v7658_v59  ;;  %5944 = vmatprep.subr.bf16.mxu0 %v7717_v34  ;;  %v5204_v59 = vpop.f32.mrf.mxu0  ;;  %v7769_v34 = vld [vmem:[#allocation11 + $0x1d0] ss:$8 sps:$4 sm:$0xff]  }
 0x372   : > { %5481 = vmatprep.subr.bf16.mxu1 %v7663_v25  ;;  %v7774_v25 = vld [vmem:[#allocation11 + $0x1c4] ss:$8 sps:$4 sm:$0xff]  }
 0x374   : > { %5945 = vmatpush2.bf16.msra.mxu0 %v7715_v26  ;;  %v5206_v26 = vpop.f32.mrf.mxu0 }
 0x375   : > { %5482 = vmatpush1.bf16.msra.mxu1 %v7661_v28  ;;  %5946 = vmatprep.subr.bf16.mxu0 %v7720_v31  ;;  %v5245_v28 = vpop.f32.mrf.mxu1  ;;  %v7772_v31 = vld [vmem:[#allocation11 + $0x1c0] ss:$8 sps:$4 sm:$0xff]  }
 0x376   : > { %5483 = vmatprep.subr.bf16.mxu1 %v7666_v32  ;;  %v5208_v32 = vpop.f32.mrf.mxu0 }
 0x378   : > { %5947 = vmatpush2.bf16.msra.mxu0 %v7718_v36  ;;  %v8559_v36 = vld [vmem:[#allocation10] sm:$0xf] }
 0x379   : > { %5484 = vmatpush1.bf16.msra.mxu1 %v7664_v37  ;;  %5948 = vmatprep.subr.bf16.mxu0 %v7723_v11  ;;  %v5247_v37 = vpop.f32.mrf.mxu1 }
 0x37a   : > { %5485 = vmatprep.subr.bf16.mxu1 %v7669_v50  ;;  %v3875_v50 = vrot.slane %v8559_v36, %v8471_v23 }
 0x37c   : > { %5949 = vmatpush2.bf16.msra.mxu0 %v7721_v39  ;;  %v3871_v39 = vrot.slane %v8559_v36, %v8433_v6 }
 0x37d   : > { %5486 = vmatpush2.bf16.msra.mxu1 %v7667_v40  ;;  %5950 = vmatprep.subr.bf16.mxu0 %v7726_v42  ;;  %v5249_v40 = vpop.f32.mrf.mxu1 }
 0x37e   : > { %5487 = vmatprep.subr.bf16.mxu1 %v7672_v1  ;;  %v5205_v1 = vadd.f32 %v5204_v59, %v3875_v50 }
 0x380   : > { %5951 = vmatpush2.bf16.msra.mxu0 %v7724_v45  ;;  %v5203_v45 = vadd.f32 %v5202_v20, %v3871_v39 }
 0x381   : > { %5488 = vmatpush2.bf16.msra.mxu1 %v7670_v46  ;;  %5952 = vmatprep.subr.bf16.mxu0 %v7729_v49  ;;  %v5207_v46 = vadd.f32 %v5206_v26, %v3871_v39  ;;  %v5251_v49 = vpop.f32.mrf.mxu1  ;;  %v3879_v26 = vrot.slane %v8559_v36, %v888_v29 }
 0x382   : > { %5489 = vmatprep.subr.bf16.mxu1 %v7675_v51 }
 0x384   : > { %5953 = vmatpush2.bf16.msra.mxu0 %v7727_v54  ;;  %v7777_v54 = vld [vmem:[#allocation11 + $0x1b4] ss:$8 sps:$4 sm:$0xff]  }
 0x385   : > { %5490 = vmatpush2.bf16.msra.mxu1 %v7673_v55  ;;  %5954 = vmatprep.subr.bf16.mxu0 %v7732_v0  ;;  %v5248_v55 = vadd.f32 %v5247_v37, %v5205_v1  ;;  %v5209_v0 = vadd.f32 %v5208_v32, %v3875_v50 }
 0x386   : > { %5491 = vmatprep.subr.bf16.mxu1 %v7678_v41  ;;  %v7775_v41 = vld [vmem:[#allocation11 + $0x1b0] ss:$8 sps:$4 sm:$0xff]  }
 0x388   : > { %5955 = vmatpush2.bf16.msra.mxu0 %v7730_v56  ;;  %v5246_v56 = vadd.f32 %v5245_v28, %v5203_v45 }
 0x389   : > { %5492 = vmatpush2.bf16.msra.mxu1 %v7676_v57  ;;  %5956 = vmatprep.subr.bf16.mxu0 %v7735_v58  ;;  %v5250_v58 = vadd.f32 %v5249_v40, %v5207_v46 }
 0x38a   : > { %5493 = vmatprep.subr.bf16.mxu1 %v7681_v61 }
 0x38c   : > { %5957 = vmatpush2.bf16.msra.mxu0 %v7733_v62 }
 0x38d   : > { %5494 = vmatpush2.bf16.msra.mxu1 %v7679_v63  ;;  %5958 = vmatprep.subr.bf16.mxu0 %v7738_v3 }
 0x38e   : > { %5495 = vmatprep.subr.bf16.mxu1 %v7684_v53  ;;  %v7780_v53 = vld [vmem:[#allocation11 + $0x1a4] ss:$8 sps:$4 sm:$0xff]  }
 0x390   : > { %5959 = vmatpush2.bf16.msra.mxu0 %v7736_v5  ;;  %v5252_v5 = vadd.f32 %v5251_v49, %v5209_v0 }
 0x391   : > { %5496 = vmatpush2.bf16.msra.mxu1 %v7682_v9 }
 0x392   : > { %5497 = vmatprep.subr.bf16.mxu1 %v7687_v30 }
 0x393   : > { %v5288_v11 = vpop.f32.mrf.mxu0 }
 0x394   : > { %v5289_v62 = vadd.f32 %v5288_v11, %v5246_v56 }
 0x395   : > { %5498 = vmatpush2.bf16.msra.mxu1 %v7685_v7  ;;  %v5290_v42 = vpop.f32.mrf.mxu0  ;;  %v7778_v7 = vld [vmem:[#allocation11 + $0x1a0] ss:$8 sps:$4 sm:$0xff]  }
 0x396   : > { %5499 = vmatprep.subr.bf16.mxu1 %v7690_v10  ;;  %v5291_v61 = vadd.f32 %v5290_v42, %v5248_v55 }
 0x397   : > { %v5292_v51 = vpop.f32.mrf.mxu0 }
 0x398   : > { %v5293_v9 = vadd.f32 %v5292_v51, %v5250_v58 }
 0x399   : > { %5500 = vmatpush2.bf16.msra.mxu1 %v7688_v13  ;;  %v5294_v63 = vpop.f32.mrf.mxu0 }
 0x39a   : > { %5971 = vmatprep.subr.bf16.mxu1 %v7741_v14 }
 0x39c   : > { %5502 = vmatmul.mubr.bf16.vlgmr.msra.gmra.mxu1 %v8550_v4  ;;  %v7756_v4 = vld [vmem:[#allocation11 + $0x124] ss:$8 sps:$4 sm:$0xff]  }
 0x39d   : > { %5972 = vmatpush1.bf16.msra.mxu1 %v7739_v44  ;;  %v5295_v44 = vadd.f32 %v5294_v63, %v5252_v5 }
 0x39e   : > { %5973 = vmatprep.subr.bf16.mxu1 %v7744_v47 }
 0x3a1   : > { %5974 = vmatpush1.bf16.msra.mxu1 %v7742_v19  ;;  %v7783_v19 = vld [vmem:[#allocation11 + $0x194] ss:$8 sps:$4 sm:$0xff]  }
 0x3a2   : > { %5975 = vmatprep.subr.bf16.mxu1 %v7747_v12 }
 0x3a5   : > { %5976 = vmatpush1.bf16.msra.mxu1 %v7745_v33 }
 0x3a6   : > { %5977 = vmatprep.subr.bf16.mxu1 %v7750_v43 }
 0x3a9   : > { %5978 = vmatpush1.bf16.msra.mxu1 %v7748_v16  ;;  %v7781_v16 = vld [vmem:[#allocation11 + $0x190] ss:$8 sps:$4 sm:$0xff]  }
 0x3aa   : > { %5979 = vmatprep.subr.bf16.mxu1 %v7753_v21 }
 0x3ad   : > { %5980 = vmatpush1.bf16.msra.mxu1 %v7751_v15 }
 0x3ae   : > { %5981 = vmatprep.subr.bf16.mxu1 %v7756_v4 }
 0x3b1   : > { %5982 = vmatpush1.bf16.msra.mxu1 %v7754_v52  ;;  %v7786_v52 = vld [vmem:[#allocation11 + $0x184] ss:$8 sps:$4 sm:$0xff]  }
 0x3b2   : > { %5983 = vmatprep.subr.bf16.mxu1 %v7759_v17 }
 0x3b5   : > { %5984 = vmatpush1.bf16.msra.mxu1 %v7757_v27 }
 0x3b6   : > { %5985 = vmatprep.subr.bf16.mxu1 %v7762_v18  ;;  %v7784_v18 = vld [vmem:[#allocation11 + $0x180] ss:$8 sps:$4 sm:$0xff]  }
 0x3b9   : > { %5986 = vmatpush1.bf16.msra.mxu1 %v7760_v48 }
 0x3ba   : > { %5987 = vmatprep.subr.bf16.mxu1 %v7765_v2 }
 0x3bd   : > { %5988 = vmatpush2.bf16.msra.mxu1 %v7763_v38 }
 0x3be   : > { %5989 = vmatprep.subr.bf16.mxu1 %v7768_v35 }
 0x3c1   : > { %5990 = vmatpush2.bf16.msra.mxu1 %v7766_v24 }
 0x3c2   : > { %5991 = vmatprep.subr.bf16.mxu1 %v7771_v22 }
 0x3c5   : > { %5992 = vmatpush2.bf16.msra.mxu1 %v7769_v34 }
 0x3c6   : > { %5993 = vmatprep.subr.bf16.mxu1 %v7774_v25  ;;  %v3883_v25 = vrot.slane %v8559_v36, %v892_v8 }
 0x3c9   : > { %5994 = vmatpush2.bf16.msra.mxu1 %v7772_v31 }
 0x3ca   : > { %5995 = vmatprep.subr.bf16.mxu1 %v7777_v54 }
 0x3cd   : > { %5996 = vmatpush2.bf16.msra.mxu1 %v7775_v41 }
 0x3ce   : > { %5997 = vmatprep.subr.bf16.mxu1 %v7780_v53 }
 0x3d1   : > { %5998 = vmatpush2.bf16.msra.mxu1 %v7778_v7 }
 0x3d2   : > { %5999 = vmatprep.subr.bf16.mxu1 %v7783_v19 }
 0x3d3   : > { %v5374_v35 = vpop.f32.mrf.mxu0 }
 0x3d4   : > { %v5375_v37 = vadd.f32 %v5374_v35, %v3879_v26 }
 0x3d5   : > { %6000 = vmatpush2.bf16.msra.mxu1 %v7781_v16  ;;  %v5376_v20 = vpop.f32.mrf.mxu0 }
 0x3d6   : > { %6001 = vmatprep.subr.bf16.mxu1 %v7786_v52  ;;  %v5377_v32 = vadd.f32 %v5376_v20, %v3883_v25  ;;  %v6022_v52 = vld [vmem:[#allocation14] sm:$0x3] }
 0x3d7   : > { %v5378_v24 = vpop.f32.mrf.mxu0  ;;  %v6027_v35 = vrot.slane %v6022_v52, %v8433_v6 }
 0x3d8   : > { %v5379_v50 = vadd.f32 %v5378_v24, %v3879_v26 }
 0x3d9   : > { %6002 = vmatpush2.bf16.msra.mxu1 %v7784_v18  ;;  %v5380_v59 = vpop.f32.mrf.mxu0 }
 0x3da   : > { %v5381_v1 = vadd.f32 %v5380_v59, %v3883_v25  ;;  %v6031_v59 = vrot.slane %v6022_v52, %v8471_v23 }
 0x3dc   : > { %v5331_v57 = vpop.f32.mrf.mxu1 }
 0x3dd   : > { %v5332_v10 = vadd.f32 %v5331_v57, %v5289_v62 }
 0x3de   : > { %v5333_v3 = vpop.f32.mrf.mxu1 }
 0x3df   : > { %v5334_v30 = vadd.f32 %v5333_v3, %v5291_v61  ;;  %v5512_v21 = vmul.f32 0.2, %v5332_v10 }
 0x3e0   : > { %v5335_v13 = vpop.f32.mrf.mxu1 }
 0x3e1   : > { %v5336_v14 = vadd.f32 %v5335_v13, %v5293_v9  ;;  %v5513_v12 = vmul.f32 0.2, %v5334_v30  ;;  %v5520_v48 = vmax.f32 %v5332_v10, %v5512_v21 }
 0x3e2   : > { %v5337_v47 = vpop.f32.mrf.mxu1 }
 0x3e3   : > { %v5516_v33 = vmul.f32 0.2, %v5336_v14  ;;  %v5338_v43 = vadd.f32 %v5337_v47, %v5295_v44  ;;  %v5521_v17 = vmax.f32 %v5334_v30, %v5513_v12 }
 0x3e5   : > { %v5517_v15 = vmul.f32 0.2, %v5338_v43  ;;  %v5524_v4 = vmax.f32 %v5336_v14, %v5516_v33  ;;  %v5596_v14 = vld [vmem:[#allocation13] sm:$0x3] }
 0x3e6   : > { %v5601_v19 = vrot.slane %v5596_v14, %v8433_v6  ;;  %v5605_v12 = vrot.slane %v5596_v14, %v8471_v23  ;;  %v7106_v6 = vld [vmem:[#allocation2] ss:$0 sm:$0xff] }
 0x3e7   : > { %v5525_v27 = vmax.f32 %v5338_v43, %v5517_v15  ;;  %v5528_v38 = vpack.c.bf16 %v5524_v4, %v5520_v48 }
 0x3e9   : > { %v5529_v2 = vpack.c.bf16 %v5525_v27, %v5521_v17 }
 0x3eb   : > { %5960 = vmatprep.mubr.bf16.mxu0 %v5529_v2 }
 0x3ec   : > { %5961 = vmatmul.mubr.bf16.vlgmr.msra.gmra.mxu0 %v5528_v38 }
 0x413   : > { %v5460_v28 = vpop.f32.mrf.mxu0 }
 0x415   : > { %v5462_v11 = vpop.f32.mrf.mxu0 }
 0x417   : > { %v5464_v46 = vpop.f32.mrf.mxu0 }
 0x419   : > { %v5466_v29 = vpop.f32.mrf.mxu0 }
 0x41c   : > { %v5417_v22 = vpop.f32.mrf.mxu1 }
 0x41d   : > { %v5418_v40 = vadd.f32 %v5417_v22, %v5375_v37 }
 0x41e   : > { %v5419_v34 = vpop.f32.mrf.mxu1 }
 0x41f   : > { %v5420_v39 = vadd.f32 %v5419_v34, %v5377_v32  ;;  %v5461_v8 = vadd.f32 %v5460_v28, %v5418_v40 }
 0x420   : > { %v5421_v31 = vpop.f32.mrf.mxu1 }
 0x421   : > { %v5422_v45 = vadd.f32 %v5421_v31, %v5379_v50  ;;  %v5463_v54 = vadd.f32 %v5462_v11, %v5420_v39 }
 0x422   : > { %v5423_v42 = vpop.f32.mrf.mxu1 }
 0x423   : > { %v5424_v51 = vadd.f32 %v5423_v42, %v5381_v1  ;;  %v5465_v0 = vadd.f32 %v5464_v46, %v5422_v45 }
 0x425   : > { %v5467_v57 = vadd.f32 %v5466_v29, %v5424_v51 }
 0x45c   : > { %v5503_v49 = vpop.f32.mrf.mxu1 }
 0x45d   : > { %v5504_v36 = vadd.f32 %v5503_v49, %v5461_v8 }
 0x45e   : > { %v5505_v55 = vpop.f32.mrf.mxu1 }
 0x45f   : > { %v5506_v60 = vadd.f32 %v5505_v55, %v5463_v54  ;;  %v5514_v3 = vmul.f32 0.2, %v5504_v36 }
 0x460   : > { %v5507_v41 = vpop.f32.mrf.mxu1 }
 0x461   : > { %v5508_v56 = vadd.f32 %v5507_v41, %v5465_v0  ;;  %v5515_v61 = vmul.f32 0.2, %v5506_v60  ;;  %v5522_v7 = vmax.f32 %v5504_v36, %v5514_v3 }
 0x462   : > { %v5509_v58 = vpop.f32.mrf.mxu1 }
 0x463   : > { %v5518_v62 = vmul.f32 0.2, %v5508_v56  ;;  %v5510_v63 = vadd.f32 %v5509_v58, %v5467_v57  ;;  %v5523_v9 = vmax.f32 %v5506_v60, %v5515_v61 }
 0x465   : > { %v5519_v53 = vmul.f32 0.2, %v5510_v63  ;;  %v5526_v5 = vmax.f32 %v5508_v56, %v5518_v62 }
 0x467   : > { %v5527_v30 = vmax.f32 %v5510_v63, %v5519_v53  ;;  %v5530_v13 = vpack.c.bf16 %v5526_v5, %v5522_v7 }
 0x469   : > { %v5531_v10 = vpack.c.bf16 %v5527_v30, %v5523_v9 }
 0x46b   : > { %6003 = vmatprep.mubr.bf16.mxu1 %v5531_v10 }
 0x46c   : > { %6004 = vmatmul.mubr.bf16.vlgmr.msra.gmra.mxu1 %v5530_v13 }
 0x4ac   : > { %v5962_v44 = vpop.f32.mrf.mxu0 }
 0x4ad   : > { %v5963_v43 = vadd.f32 %v5962_v44, %v5601_v19 }
 0x4ae   : > { %v5964_v47 = vpop.f32.mrf.mxu0 }
 0x4af   : > { %v5965_v21 = vadd.f32 %v5964_v47, %v5605_v12 }
 0x4b0   : > { %v5966_v33 = vpop.f32.mrf.mxu0 }
 0x4b1   : > { %v5967_v27 = vadd.f32 %v5966_v33, %v5601_v19 }
 0x4b2   : > { %v5968_v15 = vpop.f32.mrf.mxu0 }
 0x4b3   : > { %v5969_v2 = vadd.f32 %v5968_v15, %v5605_v12 }
 0x52c   : > { %v6005_v16 = vpop.f32.mrf.mxu1 }
 0x52d   : > { %v6006_v4 = vadd.f32 %v6005_v16, %v5963_v43 }
 0x52e   : > { %v6007_v17 = vpop.f32.mrf.mxu1 }
 0x52f   : > { %v6014_v18 = vmul.f32 0.2, %v6006_v4  ;;  %v6008_v48 = vadd.f32 %v6007_v17, %v5965_v21 }
 0x530   : > { %v6009_v38 = vpop.f32.mrf.mxu1 }
 0x531   : > { %v6018_v20 = vmax.f32 %v6006_v4, %v6014_v18  ;;  %v6015_v24 = vmul.f32 0.2, %v6008_v48  ;;  %v6010_v22 = vadd.f32 %v6009_v38, %v5967_v27 }
 0x532   : > { %v6011_v34 = vpop.f32.mrf.mxu1 }
 0x533   : > { %v6019_v25 = vmax.f32 %v6008_v48, %v6015_v24  ;;  %v6016_v26 = vmul.f32 0.2, %v6010_v22  ;;  %v6012_v28 = vadd.f32 %v6011_v34, %v5969_v2  ;;  %v6034_v37 = vmul.f32 %v6027_v35, %v6018_v20 }
 0x535   : > { %v6020_v31 = vmax.f32 %v6010_v22, %v6016_v26  ;;  %v6017_v32 = vmul.f32 0.2, %v6012_v28  ;;  %v6035_v11 = vmul.f32 %v6031_v59, %v6019_v25 }
 0x537   : > { %v6021_v50 = vmax.f32 %v6012_v28, %v6017_v32  ;;  %v6038_v39 = vadd.f32 %v6035_v11, %v6034_v37  ;;  %v6036_v40 = vmul.f32 %v6027_v35, %v6020_v31 }
 0x539   : > { %6039 = vadd.xlane.f32.xlu0 %v6038_v39  ;;  %v6037_v42 = vmul.f32 %v6031_v59, %v6021_v50 }
 0x53b   : > { %v6041_v1 = vadd.f32 %v6037_v42, %v6036_v40 }
 0x53d   : > { %6042 = vadd.xlane.f32.xlu0 %v6041_v1 }
 0x5c2   : > { %v6040_v45 = vpop.xlane.xlu0 %6039 }
 0x5c3   : > { %v6051_v46 = vadd.f32 %v7106_v6, %v6040_v45 }
 0x5c5   : > { %v6053_v23 = vsub.f32 0.0, %v6051_v46 }
 0x5c6   : > { %v6043_v49 = vpop.xlane.xlu0 %6042 }
 0x5c7   : > { %v6055_v51 = vmul.f32 1.442695, %v6053_v23  ;;  %v6052_v54 = vadd.f32 %v7106_v6, %v6043_v49 }
 0x5c9   : > { %7787 = vpow2.f32 %v6055_v51  ;;  %v6054_v8 = vsub.f32 0.0, %v6052_v54 }
 0x5cb   : > { %v6057_v55 = vmul.f32 1.442695, %v6054_v8 }
 0x5cd   : > { %7789 = vpow2.f32 %v6057_v55 }
 0x5d6   : > { %v7788_v60 = vpop.eup %7787 }
 0x5d7   : > { %v6059_v0 = vadd.f32 1.0, %v7788_v60 }
 0x5d9   : > { %7791 = vrcp.f32 %v6059_v0 }
 0x5da   : > { %v7790_v29 = vpop.eup %7789 }
 0x5db   : > { %v6060_v36 = vadd.f32 1.0, %v7790_v29 }
 0x5dd   : > { %7793 = vrcp.f32 %v6060_v36 }
 0x5e6   : > { %v7792_v41 = vpop.eup %7791 }
 0x5e7   : > { %6064 = vst.msk [vmem:[%s8576_s22] sm:$0xff] %vm6063_vm1, %v7792_v41  ;;  %6072 = sbr.rel (!%p8655_p5) target bundleno = 1555 (0x613), region = 92 }
 0x5ea   : > { %v7794_v56 = vpop.eup %7793 }
 0x5eb   : > { %6065 = vst.msk [vmem:[%s8576_s22 + $0x8] sm:$0xff] %vm6063_vm1, %v7794_v56 }
 0x5ec   : > { %s8664_s10 = smov (!%p6075_p10, %s6074_s10), 2 }
 0x5ed   : > { %s7109_s26 = sshll.u32 %s8664_s10, 7 }
 0x5ee   : > { %p7112_p0 = scmp.eq.s32.totalorder %s7109_s26, 0 }
 0x5ef   : > { %s8593_s21 = sshrl.u32 (!%p7112_p0), %s8664_s10, 1 }
 0x5f0   : > { %6083 = sbr.rel (%p7112_p0) target bundleno = 1555 (0x613), region = 96  ;;  %p7113_p3 = scmp.le.s32.totalorder (!%p7112_p0), %s8593_s21, 0 }
 0x5f5   : > { %6254 = sbr.rel (%p7113_p3) target bundleno = 1538 (0x602), region = 178  ;;  %s8088_s8 = smov (!%p7113_p3), %s8587_s25  }
 0x5f6   : > { %s8092_s19 = smov (!%p7113_p3), %s8576_s22   ;;  %s8096_s18 = smov (!%p7113_p3), 0  }
 0x5f7   : > { %s8100_s29 = smov (!%p7113_p3), 0  }
 0x5fa LB: >> { %v6148_v57 = vld [vmem:[%s8094_s19] sm:$0xff]  ;;  %v6150_v58 = vld [vmem:[%s8094_s19 + $0x8] sm:$0xff]  ;;  %s6152_s11 = sadd.s32 1, %s8098_s18  ;;  %s6142_s29 = sadd.s32 1, %s8102_s29   ;;  %s8102_s29 = sphi %s8100_s29, %s6142_s29   ;;  %s8098_s18 = sphi %s8096_s18, %s8097_s18   ;;  %s8094_s19 = sphi %s8092_s19, %s6157_s19   ;;  %s8090_s8 = sphi %s8088_s8, %s6158_s8  }
 0x5fb   : >> { %6149 = vst [vmem:[%s8090_s8] sm:$0xff] %v6148_v57  ;;  %6151 = vst [vmem:[%s8090_s8 + $0x8] sm:$0xff] %v6150_v58  ;;  %p6153_p4 = scmp.ge.s32.totalorder %s6152_s11, %s8593_s21  ;;  %p6141_p8 = scmp.ge.s32.totalorder %s6142_s29, %s8593_s21 }
 0x5fd   : >> { %s8666_s11 = smov (%p6153_p4, %s6152_s11), 0  ;;  %6144 = sbr.rel (!%p6141_p8) target bundleno = 1530 (0x5fa), region = 184 }
 0x5fe   : >> { %s7114_s28 = sshll.u32 %s8666_s11, 4  ;;  %s8097_s18 = smov %s8666_s11  }
 0x5ff   : >> { %s6157_s19 = scalar_lea.vmem %s8576_s22, %s7114_s28 [#allocation16]   ;;  %s6158_s8 = scalar_lea.vmem %s8587_s25, %s7114_s28  }
 0x602 PF: > { %s8603_s16 = sand.u32 1, %s8664_s10   ;;  %s7125_s14 = sshll.u32 %s8593_s21, 4 }
 0x603   : > { %s6163_s27 = scalar_lea.vmem %s8576_s22, %s7125_s14 [#allocation16]   ;;  %s6165_s20 = scalar_lea.vmem %s8587_s25, %s7125_s14  }
 0x604   : > { %p7119_p13 = scmp.le.s32.totalorder %s8603_s16, 0 }
 0x605   : > { %s8104_s23 = smov (!%p7119_p13), %s6165_s20   ;;  %s8108_s24 = smov (!%p7119_p13), %s6163_s27  }
 0x606   : > { %6268 = sbr.rel (%p7119_p13) target bundleno = 1555 (0x613), region = 189  ;;  %s8112_s30 = smov (!%p7119_p13), 0  }
 0x607   : > { %s8116_s17 = smov (!%p7119_p13), 0  }
 0x60b LB: >> { %v6175_v61 = vld [vmem:[%s8110_s24] sm:$0xff]  ;;  %s6177_s10 = sadd.s32 1, %s8114_s30  ;;  %s6169_s17 = sadd.s32 1, %s8118_s17   ;;  %s8118_s17 = sphi %s8116_s17, %s6169_s17   ;;  %s8114_s30 = sphi %s8112_s30, %s8113_s30   ;;  %s8110_s24 = sphi %s8108_s24, %s6182_s24   ;;  %s8106_s23 = sphi %s8104_s23, %s6183_s23  }
 0x60c   : >> { %6176 = vst [vmem:[%s8106_s23] sm:$0xff] %v6175_v61  ;;  %p6178_p11 = scmp.ge.s32.totalorder %s6177_s10, %s8603_s16  ;;  %p6168_p7 = scmp.ge.s32.totalorder %s6169_s17, %s8603_s16 }
 0x60e   : >> { %s8668_s10 = smov (%p6178_p11, %s6177_s10), 0  ;;  %6171 = sbr.rel (!%p6168_p7) target bundleno = 1547 (0x60b), region = 195 }
 0x60f   : >> { %s7120_s22 = sshll.u32 %s8668_s10, 3  ;;  %s8113_s30 = smov %s8668_s10  }
 0x610   : >> { %s6182_s24 = scalar_lea.vmem %s6163_s27, %s7120_s22 [#allocation16]   ;;  %s6183_s23 = scalar_lea.vmem %s6165_s20, %s7120_s22  }
 0x613 PF: > { %s8656_s25 = sld [smem:[#allocation22_spill]]  ;;  %p25_p9 = scmp.ge.s32.totalorder %s8212_s15, 4  }
 0x614   : > { %s8657_s11 = smov %s8078_s12  ;;  %s8658_s12 = smov %s8082_s13 }
 0x615   : > { %s8660_s14 = smov %s8212_s15  ;;  %27 = sbr.rel (!%p25_p9) target bundleno = 10 (0xa), region = 206 }
 0x619   : > { %s8659_s13 = smov %s8656_s25 }
 0x61a   :  { %6199 = vsyncpa [#allocation4], 1 }
 0x61b   :  { %6201 = vsyncpa [#allocation4 + $0x1], 1 }
 0x61c   :  { %6202 = vsyncpa [#allocation6], 1 }
 0x61d   :  { %6203 = vsyncpa [#allocation9], 1 }
 0x61e   :  { %6204 = vsyncpa [#allocation12], 1 }
 0x61f   :  { %6205 = vsyncpa [#allocation15], 1 }

</bundles_post_ra>
